<compile_context>
chip_gen: v7x
topology: tpu7x:2x2x1
jax: 0.10.0
libtpu: 0.0.40
codegen_flags: <defaults>
</compile_context>

<pallas_src>
import functools

import jax
import jax.numpy as jnp
from jax.experimental import pallas as pl
from jax.experimental.pallas import tpu as pltpu


def _round_up(x, m):
    return (x + m - 1) // m * m


# ----------------------------------------------------------------------------
# Fused bidirectional LSTM layer kernel (optionally with fused FC epilogue).
# Gate order matches PyTorch: i, f, g, o.
# Row layout of x / gx / y: row = t*B + b (time-major).
# ----------------------------------------------------------------------------
def _make_bilstm_kernel(T, B, H, fuse_fc):
    H4 = 4 * H

    def kernel(*refs):
        if fuse_fc:
            (x_ref, wx_ref, b_ref, wh_ref, wfc_ref, bfc_ref,
             y_ref, gx_sc, hc_sc, cc_sc, yh_sc) = refs
        else:
            (x_ref, wx_ref, b_ref, wh_ref,
             y_ref, gx_sc, hc_sc, cc_sc) = refs
            yh_sc = y_ref                # write hidden states straight out

        # (1) input projection for ALL time steps & BOTH directions:
        #     one big bf16 MXU matmul, f32 accumulation, bias folded in.
        gx_sc[...] = (jnp.dot(x_ref[...], wx_ref[...],
                              preferred_element_type=jnp.float32)
                      + b_ref[...])                        # (T*B, 8H) f32

        # (2) recurrence; zero init == PyTorch init_hidden()
        hc_sc[...] = jnp.zeros_like(hc_sc)                 # (B, 2H) [fwd|bwd]
        cc_sc[...] = jnp.zeros_like(cc_sc)

        def cell(gates, c):                                # gates: (B, 4H) f32
            i = jax.nn.sigmoid(gates[:, 0 * H:1 * H])
            f = jax.nn.sigmoid(gates[:, 1 * H:2 * H])
            g = jnp.tanh(gates[:, 2 * H:3 * H])
            o = jax.nn.sigmoid(gates[:, 3 * H:4 * H])
            c_new = f * c + i * g
            return o * jnp.tanh(c_new), c_new

        def step(s, carry):
            rf = pl.multiple_of(s * B, B)               # fwd reads time s
            rb = pl.multiple_of((T - 1 - s) * B, B)     # bwd reads time T-1-s
            # one recurrent matmul for both directions (block-diag W_hh)
            gh = jnp.dot(hc_sc[...].astype(jnp.bfloat16), wh_ref[...],
                         preferred_element_type=jnp.float32)     # (B, 8H)
            gates_f = gx_sc[pl.ds(rf, B), 0:H4] + gh[:, 0:H4]
            gates_b = gx_sc[pl.ds(rb, B), H4:2 * H4] + gh[:, H4:2 * H4]
            h_f, c_f = cell(gates_f, cc_sc[:, 0:H])
            h_b, c_b = cell(gates_b, cc_sc[:, H:2 * H])
            hc_sc[...] = jnp.concatenate([h_f, h_b], axis=-1)
            cc_sc[...] = jnp.concatenate([c_f, c_b], axis=-1)
            yh_sc[pl.ds(rf, B), 0:H] = h_f.astype(yh_sc.dtype)
            yh_sc[pl.ds(rb, B), H:2 * H] = h_b.astype(yh_sc.dtype)
            return carry

        jax.lax.fori_loop(0, T, step, 0, unroll=(T <= 16))

        # (3) fused FC epilogue (last layer only): one lane-dense matmul with
        #     a zero-padded block-diagonal weight applies Linear(H->O) to the
        #     fwd and bwd halves of every time step at once.
        if fuse_fc:
            y_ref[...] = (jnp.dot(yh_sc[...], wfc_ref[...],
                                  preferred_element_type=jnp.float32)
                          + bfc_ref[...]).astype(y_ref.dtype)

    return kernel


def bilstm_layer(x2d, T, B, H, wx, bias, wh_bd, fc=None):
    """One fused bidirectional LSTM layer.

    x2d  : (T*B, I)  time-major rows (row = t*B + b), bf16
    wx   : (I, 8H)   [W_ih_fwd^T | W_ih_bwd^T], bf16
    bias : (1, 8H)   [b_ih+b_hh fwd | b_ih+b_hh bwd], f32
    wh_bd: (2H, 8H)  block_diag(W_hh_fwd^T, W_hh_bwd^T), bf16
    fc   : optional (wfc_bd (2H, OW) f32, bfc (1, OW) f32) fused FC epilogue
    Returns (T*B, 2H) bf16, or (T*B, OW) f32 when fc is given.
    """
    N, I = x2d.shape
    G = 8 * H
    fuse_fc = fc is not None

    in_arrays = [x2d, wx, bias, wh_bd]
    in_specs = [
        pl.BlockSpec((N, I), lambda i: (0, 0)),
        pl.BlockSpec((I, G), lambda i: (0, 0)),
        pl.BlockSpec((1, G), lambda i: (0, 0)),
        pl.BlockSpec((2 * H, G), lambda i: (0, 0)),
    ]
    scratch = [
        pltpu.VMEM((N, G), jnp.float32),       # gx: x-projection, all steps
        pltpu.VMEM((B, 2 * H), jnp.float32),   # h state [fwd | bwd]
        pltpu.VMEM((B, 2 * H), jnp.float32),   # c state [fwd | bwd]
    ]
    if fuse_fc:
        wfc_bd, bfc = fc
        OW = wfc_bd.shape[1]
        in_arrays += [wfc_bd, bfc]
        in_specs += [pl.BlockSpec((2 * H, OW), lambda i: (0, 0)),
                     pl.BlockSpec((1, OW), lambda i: (0, 0))]
        scratch += [pltpu.VMEM((N, 2 * H), jnp.float32)]   # pre-FC hidden
        out_shape = jax.ShapeDtypeStruct((N, OW), jnp.float32)
        out_spec = pl.BlockSpec((N, OW), lambda i: (0, 0))
    else:
        out_shape = jax.ShapeDtypeStruct((N, 2 * H), jnp.bfloat16)
        out_spec = pl.BlockSpec((N, 2 * H), lambda i: (0, 0))

    return pl.pallas_call(
        _make_bilstm_kernel(T, B, H, fuse_fc),
        out_shape=out_shape,
        grid_spec=pltpu.PrefetchScalarGridSpec(
            num_scalar_prefetch=0,
            grid=(1,),                       # whole sequence in one kernel step
            in_specs=in_specs,
            out_specs=out_spec,
            scratch_shapes=scratch,
        ),
        compiler_params=pltpu.CompilerParams(
            dimension_semantics=("arbitrary",),
            vmem_limit_bytes=32 * 1024 * 1024,
        ),
    )(*in_arrays)


# ----------------------------------------------------------------------------
# Full model forward (weight packing + one layout pass in plain JAX)
# ----------------------------------------------------------------------------
def lstm_model_forward(embeds_bte, params, n_layers, hidden_dim, output_size):
    B, T, E = embeds_bte.shape
    H, O = hidden_dim, output_size

    # single layout pass: batch-first -> time-major rows (row = t*B + b), bf16
    x = (jnp.transpose(embeds_bte, (1, 0, 2))
         .reshape(T * B, E).astype(jnp.bfloat16))

    # FC packed as a zero-padded block-diagonal (2H, OW>=128) matrix so both
    # the fwd and bwd halves of every time step are handled by one lane-dense
    # matmul fused into the last layer's epilogue.
    OW = _round_up(max(2 * O, 128), 128)
    wfc_bd = jnp.zeros((2 * H, OW), jnp.float32)
    wfc_bd = wfc_bd.at[:H, 0:O].set(params["fc_w"].T)
    wfc_bd = wfc_bd.at[H:, O:2 * O].set(params["fc_w"].T)
    bfc = jnp.zeros((1, OW), jnp.float32)
    bfc = bfc.at[0, 0:O].set(params["fc_b"])
    bfc = bfc.at[0, O:2 * O].set(params["fc_b"])

    for l in range(n_layers):
        w_ih_f, w_hh_f, b_ih_f, b_hh_f = params[f"l{l}_fwd"]
        w_ih_b, w_hh_b, b_ih_b, b_hh_b = params[f"l{l}_bwd"]
        wx = jnp.concatenate([w_ih_f.T, w_ih_b.T], axis=1).astype(jnp.bfloat16)
        bias = jnp.concatenate([b_ih_f + b_hh_f,
                                b_ih_b + b_hh_b]).reshape(1, 8 * H)
        bias = bias.astype(jnp.float32)
        wh_bd = jnp.zeros((2 * H, 8 * H), jnp.float32)
        wh_bd = wh_bd.at[:H, :4 * H].set(w_hh_f.T)
        wh_bd = wh_bd.at[H:, 4 * H:].set(w_hh_b.T)
        wh_bd = wh_bd.astype(jnp.bfloat16)

        last = (l == n_layers - 1)
        x = bilstm_layer(x, T, B, H, wx, bias, wh_bd,
                         fc=(wfc_bd, bfc) if last else None)
        # TODO(synk): inter-layer LSTM dropout (p=0.5) is train-mode only;
        # identity in eval mode.

    # TODO(synk): nn.Dropout(0.3) before the FC is identity in eval mode.
    # x: (T*B, OW); cols [0:O] = fwd-half FC, [O:2O] = bwd-half FC, rest pad.
    out = x[:, :2 * O].reshape(T, B, 2 * O)
    out = jnp.transpose(out, (1, 0, 2)).reshape(B, T * 2 * O)
    return out


# ----------------------------------------------------------------------------
# Pure-JAX reference (f32, for correctness check)
# ----------------------------------------------------------------------------
def _ref_lstm_layer(x_tbi, w_ih, w_hh, b_ih, b_hh):
    T, B, I = x_tbi.shape
    H = w_hh.shape[1]

    def step(carry, x_t):
        h, c = carry
        gates = x_t @ w_ih.T + h @ w_hh.T + b_ih + b_hh
        i = jax.nn.sigmoid(gates[:, 0 * H:1 * H])
        f = jax.nn.sigmoid(gates[:, 1 * H:2 * H])
        g = jnp.tanh(gates[:, 2 * H:3 * H])
        o = jax.nn.sigmoid(gates[:, 3 * H:4 * H])
        c = f * c + i * g
        h = o * jnp.tanh(c)
        return (h, c), h

    h0 = jnp.zeros((B, H), jnp.float32)
    (_, _), ys = jax.lax.scan(step, (h0, h0), x_tbi)
    return ys


def _ref_forward(embeds_bte, params, n_layers, hidden_dim, output_size):
    B, T, _ = embeds_bte.shape
    x = jnp.transpose(embeds_bte, (1, 0, 2))
    for l in range(n_layers):
        y_f = _ref_lstm_layer(x, *params[f"l{l}_fwd"])
        y_b = _ref_lstm_layer(x[::-1], *params[f"l{l}_bwd"])[::-1]
        x = jnp.concatenate([y_f, y_b], axis=-1)
    out = jnp.transpose(x, (1, 0, 2)).reshape(-1, hidden_dim)
    out = out @ params["fc_w"].T + params["fc_b"]
    return out.reshape(B, -1)


# ----------------------------------------------------------------------------
# Deterministic parameter init (PyTorch LSTM-style uniform(-1/sqrt(H), 1/sqrt(H)))
# ----------------------------------------------------------------------------
def init_params(key, embedding_dim, hidden_dim, output_size, n_layers):
    params = {}
    bound = 1.0 / jnp.sqrt(hidden_dim)

    def unif(k, shape):
        return jax.random.uniform(k, shape, jnp.float32, -bound, bound)

    for l in range(n_layers):
        in_dim = embedding_dim if l == 0 else 2 * hidden_dim
        for d in ("fwd", "bwd"):
            key, k1, k2, k3, k4 = jax.random.split(key, 5)
            params[f"l{l}_{d}"] = (
                unif(k1, (4 * hidden_dim, in_dim)),      # w_ih
                unif(k2, (4 * hidden_dim, hidden_dim)),  # w_hh
                unif(k3, (4 * hidden_dim,)),             # b_ih
                unif(k4, (4 * hidden_dim,)),             # b_hh
            )
    key, k1, k2 = jax.random.split(key, 3)
    fcb = 1.0 / jnp.sqrt(hidden_dim)
    params["fc_w"] = jax.random.uniform(k1, (output_size, hidden_dim),
                                        jnp.float32, -fcb, fcb)
    params["fc_b"] = jax.random.uniform(k2, (output_size,),
                                        jnp.float32, -fcb, fcb)
    return params


if __name__ == "__main__":
    # Small shapes consistent with the module's forward
    B, T = 8, 8               # batch, sequence length
    E, H = 32, 32             # embedding_dim, hidden_dim (scaled-down 300/256)
    O = 8                     # output_size (scaled-down 32)
    L = 2                     # n_layers, bidirectional

    key = jax.random.PRNGKey(0)
    key, k_emb = jax.random.split(key)
    # TODO(synk): the PyTorch forward builds `embeds` via a pickled-dict word
    # lookup (embed_dict/embedding); deterministic embedded inputs are built
    # directly instead.
    embeds = jax.random.normal(k_emb, (B, T, E), jnp.float32)

    params = init_params(key, E, H, O, L)

    run = functools.partial(lstm_model_forward, n_layers=L,
                            hidden_dim=H, output_size=O)
    out = jax.jit(run)(embeds, params)
    out = jax.block_until_ready(out)

    ref = _ref_forward(embeds, params, L, H, O)
    assert out.shape == (B, T * 2 * O), out.shape
    max_err = float(jnp.max(jnp.abs(out - ref)))
    # bf16 MXU operands (f32 accumulation) vs f32 reference -> relaxed tolerance
    assert jnp.allclose(out, ref, atol=3e-2, rtol=3e-2), max_err
    print("KERNEL_OK")
</pallas_src>

<mosaic_0001>
module attributes {stable_mosaic.version = 11 : i64} {
  func.func @kernel(%arg0: i32, %arg1: memref<64x32xbf16, #tpu.memory_space<vmem>>, %arg2: memref<32x256xbf16, #tpu.memory_space<vmem>>, %arg3: memref<1x256xf32, #tpu.memory_space<vmem>>, %arg4: memref<64x256xbf16, #tpu.memory_space<vmem>>, %arg5: memref<64x64xbf16, #tpu.memory_space<vmem>>, %arg6: memref<64x256xf32, #tpu.memory_space<vmem>>, %arg7: memref<8x64xf32, #tpu.memory_space<vmem>>, %arg8: memref<8x64xf32, #tpu.memory_space<vmem>>) attributes {dimension_semantics = [#tpu.dimension_semantics<arbitrary>], iteration_bounds = array<i64: 1>, scalar_prefetch = 0 : i64, scratch_operands = 3 : i64, tpu.core_type = #tpu.core_type<tc>, window_params = [{pipeline_mode = #tpu.pipeline_mode<synchronous>, transform_indices = @transform_0, window_bounds = array<i64: 64, 32>}, {pipeline_mode = #tpu.pipeline_mode<synchronous>, transform_indices = @transform_1, window_bounds = array<i64: 32, 256>}, {pipeline_mode = #tpu.pipeline_mode<synchronous>, transform_indices = @transform_2, window_bounds = array<i64: 1, 256>}, {pipeline_mode = #tpu.pipeline_mode<synchronous>, transform_indices = @transform_3, window_bounds = array<i64: 64, 256>}, {pipeline_mode = #tpu.pipeline_mode<synchronous>, transform_indices = @transform_4, window_bounds = array<i64: 64, 64>}]} {
    %c0 = arith.constant 0 : index
    %c0_0 = arith.constant 0 : index
    %0 = vector.load %arg1[%c0, %c0_0] : memref<64x32xbf16, #tpu.memory_space<vmem>>, vector<64x32xbf16>
    %c0_1 = arith.constant 0 : index
    %c0_2 = arith.constant 0 : index
    %1 = vector.load %arg2[%c0_1, %c0_2] : memref<32x256xbf16, #tpu.memory_space<vmem>>, vector<32x256xbf16>
    %cst = arith.constant dense<0.000000e+00> : vector<64x256xf32>
    %2 = tpu.matmul %0, %1, %cst {dimension_numbers = #tpu.dot_dimension_numbers<[1], [0], [0], [1], [0, 0, 1, 1], [], []>} : vector<64x32xbf16>, vector<32x256xbf16>, vector<64x256xf32> -> vector<64x256xf32>
    %c0_3 = arith.constant 0 : index
    %c0_4 = arith.constant 0 : index
    %3 = vector.load %arg3[%c0_3, %c0_4] : memref<1x256xf32, #tpu.memory_space<vmem>>, vector<1x256xf32>
    %4 = vector.broadcast %3 : vector<1x256xf32> to vector<64x256xf32>
    %5 = arith.addf %2, %4 : vector<64x256xf32>
    %c0_5 = arith.constant 0 : index
    %c0_6 = arith.constant 0 : index
    %6 = vector.load %arg6[%c0_5, %c0_6] : memref<64x256xf32, #tpu.memory_space<vmem>>, vector<64x256xf32>
    tpu.vector_store %arg6[%c0_5, %c0_6], %5 {strides = array<i32>} : memref<64x256xf32, #tpu.memory_space<vmem>>, vector<64x256xf32>,
    %cst_7 = arith.constant 0.000000e+00 : f32
    %7 = vector.broadcast %cst_7 : f32 to vector<8x64xf32>
    %c0_8 = arith.constant 0 : index
    %c0_9 = arith.constant 0 : index
    %8 = vector.load %arg7[%c0_8, %c0_9] : memref<8x64xf32, #tpu.memory_space<vmem>>, vector<8x64xf32>
    tpu.vector_store %arg7[%c0_8, %c0_9], %7 {strides = array<i32>} : memref<8x64xf32, #tpu.memory_space<vmem>>, vector<8x64xf32>,
    %cst_10 = arith.constant 0.000000e+00 : f32
    %9 = vector.broadcast %cst_10 : f32 to vector<8x64xf32>
    %c0_11 = arith.constant 0 : index
    %c0_12 = arith.constant 0 : index
    %10 = vector.load %arg8[%c0_11, %c0_12] : memref<8x64xf32, #tpu.memory_space<vmem>>, vector<8x64xf32>
    tpu.vector_store %arg8[%c0_11, %c0_12], %9 {strides = array<i32>} : memref<8x64xf32, #tpu.memory_space<vmem>>, vector<8x64xf32>,
    %c0_i32 = arith.constant 0 : i32
    %c8_i32 = arith.constant 8 : i32
    %11 = arith.muli %c0_i32, %c8_i32 : i32
    %12 = tpu.assume_multiple %11, 8 : i32
    %c7_i32 = arith.constant 7 : i32
    %13 = arith.subi %c7_i32, %c0_i32 : i32
    %c8_i32_13 = arith.constant 8 : i32
    %14 = arith.muli %13, %c8_i32_13 : i32
    %15 = tpu.assume_multiple %14, 8 : i32
    %c0_14 = arith.constant 0 : index
    %c0_15 = arith.constant 0 : index
    %16 = vector.load %arg7[%c0_14, %c0_15] : memref<8x64xf32, #tpu.memory_space<vmem>>, vector<8x64xf32>
    %17 = arith.truncf %16 : vector<8x64xf32> to vector<8x64xbf16>
    %c0_16 = arith.constant 0 : index
    %c0_17 = arith.constant 0 : index
    %18 = vector.load %arg4[%c0_16, %c0_17] : memref<64x256xbf16, #tpu.memory_space<vmem>>, vector<64x256xbf16>
    %cst_18 = arith.constant dense<0.000000e+00> : vector<8x256xf32>
    %19 = tpu.matmul %17, %18, %cst_18 {dimension_numbers = #tpu.dot_dimension_numbers<[1], [0], [0], [1], [0, 0, 1, 1], [], []>} : vector<8x64xbf16>, vector<64x256xbf16>, vector<8x256xf32> -> vector<8x256xf32>
    %20 = arith.index_cast %12 : i32 to index
    %c0_19 = arith.constant 0 : index
    %21 = vector.load %arg6[%20, %c0_19] : memref<64x256xf32, #tpu.memory_space<vmem>>, vector<8x128xf32>
    %22 = vector.extract_strided_slice %19 {offsets = [0, 0], sizes = [8, 128], strides = [1, 1]} : vector<8x256xf32> to vector<8x128xf32>
    %23 = arith.addf %21, %22 : vector<8x128xf32>
    %24 = arith.index_cast %15 : i32 to index
    %c128 = arith.constant 128 : index
    %25 = vector.load %arg6[%24, %c128] : memref<64x256xf32, #tpu.memory_space<vmem>>, vector<8x128xf32>
    %26 = vector.extract_strided_slice %19 {offsets = [0, 128], sizes = [8, 128], strides = [1, 1]} : vector<8x256xf32> to vector<8x128xf32>
    %27 = arith.addf %25, %26 : vector<8x128xf32>
    %c0_20 = arith.constant 0 : index
    %c0_21 = arith.constant 0 : index
    %28 = vector.load %arg8[%c0_20, %c0_21] : memref<8x64xf32, #tpu.memory_space<vmem>>, vector<8x32xf32>
    %29 = vector.extract_strided_slice %23 {offsets = [0, 0], sizes = [8, 32], strides = [1, 1]} : vector<8x128xf32> to vector<8x32xf32>
    %30 = arith.negf %29 : vector<8x32xf32>
    %31 = math.exp %30 : vector<8x32xf32>
    %cst_22 = arith.constant 1.000000e+00 : f32
    %32 = vector.broadcast %cst_22 : f32 to vector<8x32xf32>
    %33 = arith.addf %32, %31 : vector<8x32xf32>
    %34 = arith.divf %32, %33 : vector<8x32xf32>
    %35 = vector.extract_strided_slice %23 {offsets = [0, 32], sizes = [8, 32], strides = [1, 1]} : vector<8x128xf32> to vector<8x32xf32>
    %36 = arith.negf %35 : vector<8x32xf32>
    %37 = math.exp %36 : vector<8x32xf32>
    %cst_23 = arith.constant 1.000000e+00 : f32
    %38 = vector.broadcast %cst_23 : f32 to vector<8x32xf32>
    %39 = arith.addf %38, %37 : vector<8x32xf32>
    %40 = arith.divf %38, %39 : vector<8x32xf32>
    %41 = vector.extract_strided_slice %23 {offsets = [0, 64], sizes = [8, 32], strides = [1, 1]} : vector<8x128xf32> to vector<8x32xf32>
    %42 = math.tanh %41 : vector<8x32xf32>
    %43 = vector.extract_strided_slice %23 {offsets = [0, 96], sizes = [8, 32], strides = [1, 1]} : vector<8x128xf32> to vector<8x32xf32>
    %44 = arith.negf %43 : vector<8x32xf32>
    %45 = math.exp %44 : vector<8x32xf32>
    %cst_24 = arith.constant 1.000000e+00 : f32
    %46 = vector.broadcast %cst_24 : f32 to vector<8x32xf32>
    %47 = arith.addf %46, %45 : vector<8x32xf32>
    %48 = arith.divf %46, %47 : vector<8x32xf32>
    %49 = arith.mulf %40, %28 : vector<8x32xf32>
    %50 = arith.mulf %34, %42 : vector<8x32xf32>
    %51 = arith.addf %49, %50 : vector<8x32xf32>
    %52 = math.tanh %51 : vector<8x32xf32>
    %53 = arith.mulf %48, %52 : vector<8x32xf32>
    %c0_25 = arith.constant 0 : index
    %c32 = arith.constant 32 : index
    %54 = vector.load %arg8[%c0_25, %c32] : memref<8x64xf32, #tpu.memory_space<vmem>>, vector<8x32xf32>
    %55 = vector.extract_strided_slice %27 {offsets = [0, 0], sizes = [8, 32], strides = [1, 1]} : vector<8x128xf32> to vector<8x32xf32>
    %56 = arith.negf %55 : vector<8x32xf32>
    %57 = math.exp %56 : vector<8x32xf32>
    %cst_26 = arith.constant 1.000000e+00 : f32
    %58 = vector.broadcast %cst_26 : f32 to vector<8x32xf32>
    %59 = arith.addf %58, %57 : vector<8x32xf32>
    %60 = arith.divf %58, %59 : vector<8x32xf32>
    %61 = vector.extract_strided_slice %27 {offsets = [0, 32], sizes = [8, 32], strides = [1, 1]} : vector<8x128xf32> to vector<8x32xf32>
    %62 = arith.negf %61 : vector<8x32xf32>
    %63 = math.exp %62 : vector<8x32xf32>
    %cst_27 = arith.constant 1.000000e+00 : f32
    %64 = vector.broadcast %cst_27 : f32 to vector<8x32xf32>
    %65 = arith.addf %64, %63 : vector<8x32xf32>
    %66 = arith.divf %64, %65 : vector<8x32xf32>
    %67 = vector.extract_strided_slice %27 {offsets = [0, 64], sizes = [8, 32], strides = [1, 1]} : vector<8x128xf32> to vector<8x32xf32>
    %68 = math.tanh %67 : vector<8x32xf32>
    %69 = vector.extract_strided_slice %27 {offsets = [0, 96], sizes = [8, 32], strides = [1, 1]} : vector<8x128xf32> to vector<8x32xf32>
    %70 = arith.negf %69 : vector<8x32xf32>
    %71 = math.exp %70 : vector<8x32xf32>
    %cst_28 = arith.constant 1.000000e+00 : f32
    %72 = vector.broadcast %cst_28 : f32 to vector<8x32xf32>
    %73 = arith.addf %72, %71 : vector<8x32xf32>
    %74 = arith.divf %72, %73 : vector<8x32xf32>
    %75 = arith.mulf %66, %54 : vector<8x32xf32>
    %76 = arith.mulf %60, %68 : vector<8x32xf32>
    %77 = arith.addf %75, %76 : vector<8x32xf32>
    %78 = math.tanh %77 : vector<8x32xf32>
    %79 = arith.mulf %74, %78 : vector<8x32xf32>
    %80 = tpu.concatenate %53, %79 in 1 : vector<8x32xf32>, vector<8x32xf32> -> vector<8x64xf32>
    %c0_29 = arith.constant 0 : index
    %c0_30 = arith.constant 0 : index
    %81 = vector.load %arg7[%c0_29, %c0_30] : memref<8x64xf32, #tpu.memory_space<vmem>>, vector<8x64xf32>
    tpu.vector_store %arg7[%c0_29, %c0_30], %80 {strides = array<i32>} : memref<8x64xf32, #tpu.memory_space<vmem>>, vector<8x64xf32>,
    %82 = tpu.concatenate %51, %77 in 1 : vector<8x32xf32>, vector<8x32xf32> -> vector<8x64xf32>
    %c0_31 = arith.constant 0 : index
    %c0_32 = arith.constant 0 : index
    %83 = vector.load %arg8[%c0_31, %c0_32] : memref<8x64xf32, #tpu.memory_space<vmem>>, vector<8x64xf32>
    tpu.vector_store %arg8[%c0_31, %c0_32], %82 {strides = array<i32>} : memref<8x64xf32, #tpu.memory_space<vmem>>, vector<8x64xf32>,
    %84 = arith.truncf %53 : vector<8x32xf32> to vector<8x32xbf16>
    %85 = arith.index_cast %12 : i32 to index
    %c0_33 = arith.constant 0 : index
    %86 = vector.load %arg5[%85, %c0_33] : memref<64x64xbf16, #tpu.memory_space<vmem>>, vector<8x32xbf16>
    tpu.vector_store %arg5[%85, %c0_33], %84 {strides = array<i32>} : memref<64x64xbf16, #tpu.memory_space<vmem>>, vector<8x32xbf16>,
    %87 = arith.truncf %79 : vector<8x32xf32> to vector<8x32xbf16>
    %88 = arith.index_cast %15 : i32 to index
    %c32_34 = arith.constant 32 : index
    %89 = vector.load %arg5[%88, %c32_34] : memref<64x64xbf16, #tpu.memory_space<vmem>>, vector<8x32xbf16>
    tpu.vector_store %arg5[%88, %c32_34], %87 {strides = array<i32>} : memref<64x64xbf16, #tpu.memory_space<vmem>>, vector<8x32xbf16>,
    %c1_i32 = arith.constant 1 : i32
    %c8_i32_35 = arith.constant 8 : i32
    %90 = arith.muli %c1_i32, %c8_i32_35 : i32
    %91 = tpu.assume_multiple %90, 8 : i32
    %c7_i32_36 = arith.constant 7 : i32
    %92 = arith.subi %c7_i32_36, %c1_i32 : i32
    %c8_i32_37 = arith.constant 8 : i32
    %93 = arith.muli %92, %c8_i32_37 : i32
    %94 = tpu.assume_multiple %93, 8 : i32
    %c0_38 = arith.constant 0 : index
    %c0_39 = arith.constant 0 : index
    %95 = vector.load %arg7[%c0_38, %c0_39] : memref<8x64xf32, #tpu.memory_space<vmem>>, vector<8x64xf32>
    %96 = arith.truncf %95 : vector<8x64xf32> to vector<8x64xbf16>
    %c0_40 = arith.constant 0 : index
    %c0_41 = arith.constant 0 : index
    %97 = vector.load %arg4[%c0_40, %c0_41] : memref<64x256xbf16, #tpu.memory_space<vmem>>, vector<64x256xbf16>
    %cst_42 = arith.constant dense<0.000000e+00> : vector<8x256xf32>
    %98 = tpu.matmul %96, %97, %cst_42 {dimension_numbers = #tpu.dot_dimension_numbers<[1], [0], [0], [1], [0, 0, 1, 1], [], []>} : vector<8x64xbf16>, vector<64x256xbf16>, vector<8x256xf32> -> vector<8x256xf32>
    %99 = arith.index_cast %91 : i32 to index
    %c0_43 = arith.constant 0 : index
    %100 = vector.load %arg6[%99, %c0_43] : memref<64x256xf32, #tpu.memory_space<vmem>>, vector<8x128xf32>
    %101 = vector.extract_strided_slice %98 {offsets = [0, 0], sizes = [8, 128], strides = [1, 1]} : vector<8x256xf32> to vector<8x128xf32>
    %102 = arith.addf %100, %101 : vector<8x128xf32>
    %103 = arith.index_cast %94 : i32 to index
    %c128_44 = arith.constant 128 : index
    %104 = vector.load %arg6[%103, %c128_44] : memref<64x256xf32, #tpu.memory_space<vmem>>, vector<8x128xf32>
    %105 = vector.extract_strided_slice %98 {offsets = [0, 128], sizes = [8, 128], strides = [1, 1]} : vector<8x256xf32> to vector<8x128xf32>
    %106 = arith.addf %104, %105 : vector<8x128xf32>
    %c0_45 = arith.constant 0 : index
    %c0_46 = arith.constant 0 : index
    %107 = vector.load %arg8[%c0_45, %c0_46] : memref<8x64xf32, #tpu.memory_space<vmem>>, vector<8x32xf32>
    %108 = vector.extract_strided_slice %102 {offsets = [0, 0], sizes = [8, 32], strides = [1, 1]} : vector<8x128xf32> to vector<8x32xf32>
    %109 = arith.negf %108 : vector<8x32xf32>
    %110 = math.exp %109 : vector<8x32xf32>
    %cst_47 = arith.constant 1.000000e+00 : f32
    %111 = vector.broadcast %cst_47 : f32 to vector<8x32xf32>
    %112 = arith.addf %111, %110 : vector<8x32xf32>
    %113 = arith.divf %111, %112 : vector<8x32xf32>
    %114 = vector.extract_strided_slice %102 {offsets = [0, 32], sizes = [8, 32], strides = [1, 1]} : vector<8x128xf32> to vector<8x32xf32>
    %115 = arith.negf %114 : vector<8x32xf32>
    %116 = math.exp %115 : vector<8x32xf32>
    %cst_48 = arith.constant 1.000000e+00 : f32
    %117 = vector.broadcast %cst_48 : f32 to vector<8x32xf32>
    %118 = arith.addf %117, %116 : vector<8x32xf32>
    %119 = arith.divf %117, %118 : vector<8x32xf32>
    %120 = vector.extract_strided_slice %102 {offsets = [0, 64], sizes = [8, 32], strides = [1, 1]} : vector<8x128xf32> to vector<8x32xf32>
    %121 = math.tanh %120 : vector<8x32xf32>
    %122 = vector.extract_strided_slice %102 {offsets = [0, 96], sizes = [8, 32], strides = [1, 1]} : vector<8x128xf32> to vector<8x32xf32>
    %123 = arith.negf %122 : vector<8x32xf32>
    %124 = math.exp %123 : vector<8x32xf32>
    %cst_49 = arith.constant 1.000000e+00 : f32
    %125 = vector.broadcast %cst_49 : f32 to vector<8x32xf32>
    %126 = arith.addf %125, %124 : vector<8x32xf32>
    %127 = arith.divf %125, %126 : vector<8x32xf32>
    %128 = arith.mulf %119, %107 : vector<8x32xf32>
    %129 = arith.mulf %113, %121 : vector<8x32xf32>
    %130 = arith.addf %128, %129 : vector<8x32xf32>
    %131 = math.tanh %130 : vector<8x32xf32>
    %132 = arith.mulf %127, %131 : vector<8x32xf32>
    %c0_50 = arith.constant 0 : index
    %c32_51 = arith.constant 32 : index
    %133 = vector.load %arg8[%c0_50, %c32_51] : memref<8x64xf32, #tpu.memory_space<vmem>>, vector<8x32xf32>
    %134 = vector.extract_strided_slice %106 {offsets = [0, 0], sizes = [8, 32], strides = [1, 1]} : vector<8x128xf32> to vector<8x32xf32>
    %135 = arith.negf %134 : vector<8x32xf32>
    %136 = math.exp %135 : vector<8x32xf32>
    %cst_52 = arith.constant 1.000000e+00 : f32
    %137 = vector.broadcast %cst_52 : f32 to vector<8x32xf32>
    %138 = arith.addf %137, %136 : vector<8x32xf32>
    %139 = arith.divf %137, %138 : vector<8x32xf32>
    %140 = vector.extract_strided_slice %106 {offsets = [0, 32], sizes = [8, 32], strides = [1, 1]} : vector<8x128xf32> to vector<8x32xf32>
    %141 = arith.negf %140 : vector<8x32xf32>
    %142 = math.exp %141 : vector<8x32xf32>
    %cst_53 = arith.constant 1.000000e+00 : f32
    %143 = vector.broadcast %cst_53 : f32 to vector<8x32xf32>
    %144 = arith.addf %143, %142 : vector<8x32xf32>
    %145 = arith.divf %143, %144 : vector<8x32xf32>
    %146 = vector.extract_strided_slice %106 {offsets = [0, 64], sizes = [8, 32], strides = [1, 1]} : vector<8x128xf32> to vector<8x32xf32>
    %147 = math.tanh %146 : vector<8x32xf32>
    %148 = vector.extract_strided_slice %106 {offsets = [0, 96], sizes = [8, 32], strides = [1, 1]} : vector<8x128xf32> to vector<8x32xf32>
    %149 = arith.negf %148 : vector<8x32xf32>
    %150 = math.exp %149 : vector<8x32xf32>
    %cst_54 = arith.constant 1.000000e+00 : f32
    %151 = vector.broadcast %cst_54 : f32 to vector<8x32xf32>
    %152 = arith.addf %151, %150 : vector<8x32xf32>
    %153 = arith.divf %151, %152 : vector<8x32xf32>
    %154 = arith.mulf %145, %133 : vector<8x32xf32>
    %155 = arith.mulf %139, %147 : vector<8x32xf32>
    %156 = arith.addf %154, %155 : vector<8x32xf32>
    %157 = math.tanh %156 : vector<8x32xf32>
    %158 = arith.mulf %153, %157 : vector<8x32xf32>
    %159 = tpu.concatenate %132, %158 in 1 : vector<8x32xf32>, vector<8x32xf32> -> vector<8x64xf32>
    %c0_55 = arith.constant 0 : index
    %c0_56 = arith.constant 0 : index
    %160 = vector.load %arg7[%c0_55, %c0_56] : memref<8x64xf32, #tpu.memory_space<vmem>>, vector<8x64xf32>
    tpu.vector_store %arg7[%c0_55, %c0_56], %159 {strides = array<i32>} : memref<8x64xf32, #tpu.memory_space<vmem>>, vector<8x64xf32>,
    %161 = tpu.concatenate %130, %156 in 1 : vector<8x32xf32>, vector<8x32xf32> -> vector<8x64xf32>
    %c0_57 = arith.constant 0 : index
    %c0_58 = arith.constant 0 : index
    %162 = vector.load %arg8[%c0_57, %c0_58] : memref<8x64xf32, #tpu.memory_space<vmem>>, vector<8x64xf32>
    tpu.vector_store %arg8[%c0_57, %c0_58], %161 {strides = array<i32>} : memref<8x64xf32, #tpu.memory_space<vmem>>, vector<8x64xf32>,
    %163 = arith.truncf %132 : vector<8x32xf32> to vector<8x32xbf16>
    %164 = arith.index_cast %91 : i32 to index
    %c0_59 = arith.constant 0 : index
    %165 = vector.load %arg5[%164, %c0_59] : memref<64x64xbf16, #tpu.memory_space<vmem>>, vector<8x32xbf16>
    tpu.vector_store %arg5[%164, %c0_59], %163 {strides = array<i32>} : memref<64x64xbf16, #tpu.memory_space<vmem>>, vector<8x32xbf16>,
    %166 = arith.truncf %158 : vector<8x32xf32> to vector<8x32xbf16>
    %167 = arith.index_cast %94 : i32 to index
    %c32_60 = arith.constant 32 : index
    %168 = vector.load %arg5[%167, %c32_60] : memref<64x64xbf16, #tpu.memory_space<vmem>>, vector<8x32xbf16>
    tpu.vector_store %arg5[%167, %c32_60], %166 {strides = array<i32>} : memref<64x64xbf16, #tpu.memory_space<vmem>>, vector<8x32xbf16>,
    %c2_i32 = arith.constant 2 : i32
    %c8_i32_61 = arith.constant 8 : i32
    %169 = arith.muli %c2_i32, %c8_i32_61 : i32
    %170 = tpu.assume_multiple %169, 8 : i32
    %c7_i32_62 = arith.constant 7 : i32
    %171 = arith.subi %c7_i32_62, %c2_i32 : i32
    %c8_i32_63 = arith.constant 8 : i32
    %172 = arith.muli %171, %c8_i32_63 : i32
    %173 = tpu.assume_multiple %172, 8 : i32
    %c0_64 = arith.constant 0 : index
    %c0_65 = arith.constant 0 : index
    %174 = vector.load %arg7[%c0_64, %c0_65] : memref<8x64xf32, #tpu.memory_space<vmem>>, vector<8x64xf32>
    %175 = arith.truncf %174 : vector<8x64xf32> to vector<8x64xbf16>
    %c0_66 = arith.constant 0 : index
    %c0_67 = arith.constant 0 : index
    %176 = vector.load %arg4[%c0_66, %c0_67] : memref<64x256xbf16, #tpu.memory_space<vmem>>, vector<64x256xbf16>
    %cst_68 = arith.constant dense<0.000000e+00> : vector<8x256xf32>
    %177 = tpu.matmul %175, %176, %cst_68 {dimension_numbers = #tpu.dot_dimension_numbers<[1], [0], [0], [1], [0, 0, 1, 1], [], []>} : vector<8x64xbf16>, vector<64x256xbf16>, vector<8x256xf32> -> vector<8x256xf32>
    %178 = arith.index_cast %170 : i32 to index
    %c0_69 = arith.constant 0 : index
    %179 = vector.load %arg6[%178, %c0_69] : memref<64x256xf32, #tpu.memory_space<vmem>>, vector<8x128xf32>
    %180 = vector.extract_strided_slice %177 {offsets = [0, 0], sizes = [8, 128], strides = [1, 1]} : vector<8x256xf32> to vector<8x128xf32>
    %181 = arith.addf %179, %180 : vector<8x128xf32>
    %182 = arith.index_cast %173 : i32 to index
    %c128_70 = arith.constant 128 : index
    %183 = vector.load %arg6[%182, %c128_70] : memref<64x256xf32, #tpu.memory_space<vmem>>, vector<8x128xf32>
    %184 = vector.extract_strided_slice %177 {offsets = [0, 128], sizes = [8, 128], strides = [1, 1]} : vector<8x256xf32> to vector<8x128xf32>
    %185 = arith.addf %183, %184 : vector<8x128xf32>
    %c0_71 = arith.constant 0 : index
    %c0_72 = arith.constant 0 : index
    %186 = vector.load %arg8[%c0_71, %c0_72] : memref<8x64xf32, #tpu.memory_space<vmem>>, vector<8x32xf32>
    %187 = vector.extract_strided_slice %181 {offsets = [0, 0], sizes = [8, 32], strides = [1, 1]} : vector<8x128xf32> to vector<8x32xf32>
    %188 = arith.negf %187 : vector<8x32xf32>
    %189 = math.exp %188 : vector<8x32xf32>
    %cst_73 = arith.constant 1.000000e+00 : f32
    %190 = vector.broadcast %cst_73 : f32 to vector<8x32xf32>
    %191 = arith.addf %190, %189 : vector<8x32xf32>
    %192 = arith.divf %190, %191 : vector<8x32xf32>
    %193 = vector.extract_strided_slice %181 {offsets = [0, 32], sizes = [8, 32], strides = [1, 1]} : vector<8x128xf32> to vector<8x32xf32>
    %194 = arith.negf %193 : vector<8x32xf32>
    %195 = math.exp %194 : vector<8x32xf32>
    %cst_74 = arith.constant 1.000000e+00 : f32
    %196 = vector.broadcast %cst_74 : f32 to vector<8x32xf32>
    %197 = arith.addf %196, %195 : vector<8x32xf32>
    %198 = arith.divf %196, %197 : vector<8x32xf32>
    %199 = vector.extract_strided_slice %181 {offsets = [0, 64], sizes = [8, 32], strides = [1, 1]} : vector<8x128xf32> to vector<8x32xf32>
    %200 = math.tanh %199 : vector<8x32xf32>
    %201 = vector.extract_strided_slice %181 {offsets = [0, 96], sizes = [8, 32], strides = [1, 1]} : vector<8x128xf32> to vector<8x32xf32>
    %202 = arith.negf %201 : vector<8x32xf32>
    %203 = math.exp %202 : vector<8x32xf32>
    %cst_75 = arith.constant 1.000000e+00 : f32
    %204 = vector.broadcast %cst_75 : f32 to vector<8x32xf32>
    %205 = arith.addf %204, %203 : vector<8x32xf32>
    %206 = arith.divf %204, %205 : vector<8x32xf32>
    %207 = arith.mulf %198, %186 : vector<8x32xf32>
    %208 = arith.mulf %192, %200 : vector<8x32xf32>
    %209 = arith.addf %207, %208 : vector<8x32xf32>
    %210 = math.tanh %209 : vector<8x32xf32>
    %211 = arith.mulf %206, %210 : vector<8x32xf32>
    %c0_76 = arith.constant 0 : index
    %c32_77 = arith.constant 32 : index
    %212 = vector.load %arg8[%c0_76, %c32_77] : memref<8x64xf32, #tpu.memory_space<vmem>>, vector<8x32xf32>
    %213 = vector.extract_strided_slice %185 {offsets = [0, 0], sizes = [8, 32], strides = [1, 1]} : vector<8x128xf32> to vector<8x32xf32>
    %214 = arith.negf %213 : vector<8x32xf32>
    %215 = math.exp %214 : vector<8x32xf32>
    %cst_78 = arith.constant 1.000000e+00 : f32
    %216 = vector.broadcast %cst_78 : f32 to vector<8x32xf32>
    %217 = arith.addf %216, %215 : vector<8x32xf32>
    %218 = arith.divf %216, %217 : vector<8x32xf32>
    %219 = vector.extract_strided_slice %185 {offsets = [0, 32], sizes = [8, 32], strides = [1, 1]} : vector<8x128xf32> to vector<8x32xf32>
    %220 = arith.negf %219 : vector<8x32xf32>
    %221 = math.exp %220 : vector<8x32xf32>
    %cst_79 = arith.constant 1.000000e+00 : f32
    %222 = vector.broadcast %cst_79 : f32 to vector<8x32xf32>
    %223 = arith.addf %222, %221 : vector<8x32xf32>
    %224 = arith.divf %222, %223 : vector<8x32xf32>
    %225 = vector.extract_strided_slice %185 {offsets = [0, 64], sizes = [8, 32], strides = [1, 1]} : vector<8x128xf32> to vector<8x32xf32>
    %226 = math.tanh %225 : vector<8x32xf32>
    %227 = vector.extract_strided_slice %185 {offsets = [0, 96], sizes = [8, 32], strides = [1, 1]} : vector<8x128xf32> to vector<8x32xf32>
    %228 = arith.negf %227 : vector<8x32xf32>
    %229 = math.exp %228 : vector<8x32xf32>
    %cst_80 = arith.constant 1.000000e+00 : f32
    %230 = vector.broadcast %cst_80 : f32 to vector<8x32xf32>
    %231 = arith.addf %230, %229 : vector<8x32xf32>
    %232 = arith.divf %230, %231 : vector<8x32xf32>
    %233 = arith.mulf %224, %212 : vector<8x32xf32>
    %234 = arith.mulf %218, %226 : vector<8x32xf32>
    %235 = arith.addf %233, %234 : vector<8x32xf32>
    %236 = math.tanh %235 : vector<8x32xf32>
    %237 = arith.mulf %232, %236 : vector<8x32xf32>
    %238 = tpu.concatenate %211, %237 in 1 : vector<8x32xf32>, vector<8x32xf32> -> vector<8x64xf32>
    %c0_81 = arith.constant 0 : index
    %c0_82 = arith.constant 0 : index
    %239 = vector.load %arg7[%c0_81, %c0_82] : memref<8x64xf32, #tpu.memory_space<vmem>>, vector<8x64xf32>
    tpu.vector_store %arg7[%c0_81, %c0_82], %238 {strides = array<i32>} : memref<8x64xf32, #tpu.memory_space<vmem>>, vector<8x64xf32>,
    %240 = tpu.concatenate %209, %235 in 1 : vector<8x32xf32>, vector<8x32xf32> -> vector<8x64xf32>
    %c0_83 = arith.constant 0 : index
    %c0_84 = arith.constant 0 : index
    %241 = vector.load %arg8[%c0_83, %c0_84] : memref<8x64xf32, #tpu.memory_space<vmem>>, vector<8x64xf32>
    tpu.vector_store %arg8[%c0_83, %c0_84], %240 {strides = array<i32>} : memref<8x64xf32, #tpu.memory_space<vmem>>, vector<8x64xf32>,
    %242 = arith.truncf %211 : vector<8x32xf32> to vector<8x32xbf16>
    %243 = arith.index_cast %170 : i32 to index
    %c0_85 = arith.constant 0 : index
    %244 = vector.load %arg5[%243, %c0_85] : memref<64x64xbf16, #tpu.memory_space<vmem>>, vector<8x32xbf16>
    tpu.vector_store %arg5[%243, %c0_85], %242 {strides = array<i32>} : memref<64x64xbf16, #tpu.memory_space<vmem>>, vector<8x32xbf16>,
    %245 = arith.truncf %237 : vector<8x32xf32> to vector<8x32xbf16>
    %246 = arith.index_cast %173 : i32 to index
    %c32_86 = arith.constant 32 : index
    %247 = vector.load %arg5[%246, %c32_86] : memref<64x64xbf16, #tpu.memory_space<vmem>>, vector<8x32xbf16>
    tpu.vector_store %arg5[%246, %c32_86], %245 {strides = array<i32>} : memref<64x64xbf16, #tpu.memory_space<vmem>>, vector<8x32xbf16>,
    %c3_i32 = arith.constant 3 : i32
    %c8_i32_87 = arith.constant 8 : i32
    %248 = arith.muli %c3_i32, %c8_i32_87 : i32
    %249 = tpu.assume_multiple %248, 8 : i32
    %c7_i32_88 = arith.constant 7 : i32
    %250 = arith.subi %c7_i32_88, %c3_i32 : i32
    %c8_i32_89 = arith.constant 8 : i32
    %251 = arith.muli %250, %c8_i32_89 : i32
    %252 = tpu.assume_multiple %251, 8 : i32
    %c0_90 = arith.constant 0 : index
    %c0_91 = arith.constant 0 : index
    %253 = vector.load %arg7[%c0_90, %c0_91] : memref<8x64xf32, #tpu.memory_space<vmem>>, vector<8x64xf32>
    %254 = arith.truncf %253 : vector<8x64xf32> to vector<8x64xbf16>
    %c0_92 = arith.constant 0 : index
    %c0_93 = arith.constant 0 : index
    %255 = vector.load %arg4[%c0_92, %c0_93] : memref<64x256xbf16, #tpu.memory_space<vmem>>, vector<64x256xbf16>
    %cst_94 = arith.constant dense<0.000000e+00> : vector<8x256xf32>
    %256 = tpu.matmul %254, %255, %cst_94 {dimension_numbers = #tpu.dot_dimension_numbers<[1], [0], [0], [1], [0, 0, 1, 1], [], []>} : vector<8x64xbf16>, vector<64x256xbf16>, vector<8x256xf32> -> vector<8x256xf32>
    %257 = arith.index_cast %249 : i32 to index
    %c0_95 = arith.constant 0 : index
    %258 = vector.load %arg6[%257, %c0_95] : memref<64x256xf32, #tpu.memory_space<vmem>>, vector<8x128xf32>
    %259 = vector.extract_strided_slice %256 {offsets = [0, 0], sizes = [8, 128], strides = [1, 1]} : vector<8x256xf32> to vector<8x128xf32>
    %260 = arith.addf %258, %259 : vector<8x128xf32>
    %261 = arith.index_cast %252 : i32 to index
    %c128_96 = arith.constant 128 : index
    %262 = vector.load %arg6[%261, %c128_96] : memref<64x256xf32, #tpu.memory_space<vmem>>, vector<8x128xf32>
    %263 = vector.extract_strided_slice %256 {offsets = [0, 128], sizes = [8, 128], strides = [1, 1]} : vector<8x256xf32> to vector<8x128xf32>
    %264 = arith.addf %262, %263 : vector<8x128xf32>
    %c0_97 = arith.constant 0 : index
    %c0_98 = arith.constant 0 : index
    %265 = vector.load %arg8[%c0_97, %c0_98] : memref<8x64xf32, #tpu.memory_space<vmem>>, vector<8x32xf32>
    %266 = vector.extract_strided_slice %260 {offsets = [0, 0], sizes = [8, 32], strides = [1, 1]} : vector<8x128xf32> to vector<8x32xf32>
    %267 = arith.negf %266 : vector<8x32xf32>
    %268 = math.exp %267 : vector<8x32xf32>
    %cst_99 = arith.constant 1.000000e+00 : f32
    %269 = vector.broadcast %cst_99 : f32 to vector<8x32xf32>
    %270 = arith.addf %269, %268 : vector<8x32xf32>
    %271 = arith.divf %269, %270 : vector<8x32xf32>
    %272 = vector.extract_strided_slice %260 {offsets = [0, 32], sizes = [8, 32], strides = [1, 1]} : vector<8x128xf32> to vector<8x32xf32>
    %273 = arith.negf %272 : vector<8x32xf32>
    %274 = math.exp %273 : vector<8x32xf32>
    %cst_100 = arith.constant 1.000000e+00 : f32
    %275 = vector.broadcast %cst_100 : f32 to vector<8x32xf32>
    %276 = arith.addf %275, %274 : vector<8x32xf32>
    %277 = arith.divf %275, %276 : vector<8x32xf32>
    %278 = vector.extract_strided_slice %260 {offsets = [0, 64], sizes = [8, 32], strides = [1, 1]} : vector<8x128xf32> to vector<8x32xf32>
    %279 = math.tanh %278 : vector<8x32xf32>
    %280 = vector.extract_strided_slice %260 {offsets = [0, 96], sizes = [8, 32], strides = [1, 1]} : vector<8x128xf32> to vector<8x32xf32>
    %281 = arith.negf %280 : vector<8x32xf32>
    %282 = math.exp %281 : vector<8x32xf32>
    %cst_101 = arith.constant 1.000000e+00 : f32
    %283 = vector.broadcast %cst_101 : f32 to vector<8x32xf32>
    %284 = arith.addf %283, %282 : vector<8x32xf32>
    %285 = arith.divf %283, %284 : vector<8x32xf32>
    %286 = arith.mulf %277, %265 : vector<8x32xf32>
    %287 = arith.mulf %271, %279 : vector<8x32xf32>
    %288 = arith.addf %286, %287 : vector<8x32xf32>
    %289 = math.tanh %288 : vector<8x32xf32>
    %290 = arith.mulf %285, %289 : vector<8x32xf32>
    %c0_102 = arith.constant 0 : index
    %c32_103 = arith.constant 32 : index
    %291 = vector.load %arg8[%c0_102, %c32_103] : memref<8x64xf32, #tpu.memory_space<vmem>>, vector<8x32xf32>
    %292 = vector.extract_strided_slice %264 {offsets = [0, 0], sizes = [8, 32], strides = [1, 1]} : vector<8x128xf32> to vector<8x32xf32>
    %293 = arith.negf %292 : vector<8x32xf32>
    %294 = math.exp %293 : vector<8x32xf32>
    %cst_104 = arith.constant 1.000000e+00 : f32
    %295 = vector.broadcast %cst_104 : f32 to vector<8x32xf32>
    %296 = arith.addf %295, %294 : vector<8x32xf32>
    %297 = arith.divf %295, %296 : vector<8x32xf32>
    %298 = vector.extract_strided_slice %264 {offsets = [0, 32], sizes = [8, 32], strides = [1, 1]} : vector<8x128xf32> to vector<8x32xf32>
    %299 = arith.negf %298 : vector<8x32xf32>
    %300 = math.exp %299 : vector<8x32xf32>
    %cst_105 = arith.constant 1.000000e+00 : f32
    %301 = vector.broadcast %cst_105 : f32 to vector<8x32xf32>
    %302 = arith.addf %301, %300 : vector<8x32xf32>
    %303 = arith.divf %301, %302 : vector<8x32xf32>
    %304 = vector.extract_strided_slice %264 {offsets = [0, 64], sizes = [8, 32], strides = [1, 1]} : vector<8x128xf32> to vector<8x32xf32>
    %305 = math.tanh %304 : vector<8x32xf32>
    %306 = vector.extract_strided_slice %264 {offsets = [0, 96], sizes = [8, 32], strides = [1, 1]} : vector<8x128xf32> to vector<8x32xf32>
    %307 = arith.negf %306 : vector<8x32xf32>
    %308 = math.exp %307 : vector<8x32xf32>
    %cst_106 = arith.constant 1.000000e+00 : f32
    %309 = vector.broadcast %cst_106 : f32 to vector<8x32xf32>
    %310 = arith.addf %309, %308 : vector<8x32xf32>
    %311 = arith.divf %309, %310 : vector<8x32xf32>
    %312 = arith.mulf %303, %291 : vector<8x32xf32>
    %313 = arith.mulf %297, %305 : vector<8x32xf32>
    %314 = arith.addf %312, %313 : vector<8x32xf32>
    %315 = math.tanh %314 : vector<8x32xf32>
    %316 = arith.mulf %311, %315 : vector<8x32xf32>
    %317 = tpu.concatenate %290, %316 in 1 : vector<8x32xf32>, vector<8x32xf32> -> vector<8x64xf32>
    %c0_107 = arith.constant 0 : index
    %c0_108 = arith.constant 0 : index
    %318 = vector.load %arg7[%c0_107, %c0_108] : memref<8x64xf32, #tpu.memory_space<vmem>>, vector<8x64xf32>
    tpu.vector_store %arg7[%c0_107, %c0_108], %317 {strides = array<i32>} : memref<8x64xf32, #tpu.memory_space<vmem>>, vector<8x64xf32>,
    %319 = tpu.concatenate %288, %314 in 1 : vector<8x32xf32>, vector<8x32xf32> -> vector<8x64xf32>
    %c0_109 = arith.constant 0 : index
    %c0_110 = arith.constant 0 : index
    %320 = vector.load %arg8[%c0_109, %c0_110] : memref<8x64xf32, #tpu.memory_space<vmem>>, vector<8x64xf32>
    tpu.vector_store %arg8[%c0_109, %c0_110], %319 {strides = array<i32>} : memref<8x64xf32, #tpu.memory_space<vmem>>, vector<8x64xf32>,
    %321 = arith.truncf %290 : vector<8x32xf32> to vector<8x32xbf16>
    %322 = arith.index_cast %249 : i32 to index
    %c0_111 = arith.constant 0 : index
    %323 = vector.load %arg5[%322, %c0_111] : memref<64x64xbf16, #tpu.memory_space<vmem>>, vector<8x32xbf16>
    tpu.vector_store %arg5[%322, %c0_111], %321 {strides = array<i32>} : memref<64x64xbf16, #tpu.memory_space<vmem>>, vector<8x32xbf16>,
    %324 = arith.truncf %316 : vector<8x32xf32> to vector<8x32xbf16>
    %325 = arith.index_cast %252 : i32 to index
    %c32_112 = arith.constant 32 : index
    %326 = vector.load %arg5[%325, %c32_112] : memref<64x64xbf16, #tpu.memory_space<vmem>>, vector<8x32xbf16>
    tpu.vector_store %arg5[%325, %c32_112], %324 {strides = array<i32>} : memref<64x64xbf16, #tpu.memory_space<vmem>>, vector<8x32xbf16>,
    %c4_i32 = arith.constant 4 : i32
    %c8_i32_113 = arith.constant 8 : i32
    %327 = arith.muli %c4_i32, %c8_i32_113 : i32
    %328 = tpu.assume_multiple %327, 8 : i32
    %c7_i32_114 = arith.constant 7 : i32
    %329 = arith.subi %c7_i32_114, %c4_i32 : i32
    %c8_i32_115 = arith.constant 8 : i32
    %330 = arith.muli %329, %c8_i32_115 : i32
    %331 = tpu.assume_multiple %330, 8 : i32
    %c0_116 = arith.constant 0 : index
    %c0_117 = arith.constant 0 : index
    %332 = vector.load %arg7[%c0_116, %c0_117] : memref<8x64xf32, #tpu.memory_space<vmem>>, vector<8x64xf32>
    %333 = arith.truncf %332 : vector<8x64xf32> to vector<8x64xbf16>
    %c0_118 = arith.constant 0 : index
    %c0_119 = arith.constant 0 : index
    %334 = vector.load %arg4[%c0_118, %c0_119] : memref<64x256xbf16, #tpu.memory_space<vmem>>, vector<64x256xbf16>
    %cst_120 = arith.constant dense<0.000000e+00> : vector<8x256xf32>
    %335 = tpu.matmul %333, %334, %cst_120 {dimension_numbers = #tpu.dot_dimension_numbers<[1], [0], [0], [1], [0, 0, 1, 1], [], []>} : vector<8x64xbf16>, vector<64x256xbf16>, vector<8x256xf32> -> vector<8x256xf32>
    %336 = arith.index_cast %328 : i32 to index
    %c0_121 = arith.constant 0 : index
    %337 = vector.load %arg6[%336, %c0_121] : memref<64x256xf32, #tpu.memory_space<vmem>>, vector<8x128xf32>
    %338 = vector.extract_strided_slice %335 {offsets = [0, 0], sizes = [8, 128], strides = [1, 1]} : vector<8x256xf32> to vector<8x128xf32>
    %339 = arith.addf %337, %338 : vector<8x128xf32>
    %340 = arith.index_cast %331 : i32 to index
    %c128_122 = arith.constant 128 : index
    %341 = vector.load %arg6[%340, %c128_122] : memref<64x256xf32, #tpu.memory_space<vmem>>, vector<8x128xf32>
    %342 = vector.extract_strided_slice %335 {offsets = [0, 128], sizes = [8, 128], strides = [1, 1]} : vector<8x256xf32> to vector<8x128xf32>
    %343 = arith.addf %341, %342 : vector<8x128xf32>
    %c0_123 = arith.constant 0 : index
    %c0_124 = arith.constant 0 : index
    %344 = vector.load %arg8[%c0_123, %c0_124] : memref<8x64xf32, #tpu.memory_space<vmem>>, vector<8x32xf32>
    %345 = vector.extract_strided_slice %339 {offsets = [0, 0], sizes = [8, 32], strides = [1, 1]} : vector<8x128xf32> to vector<8x32xf32>
    %346 = arith.negf %345 : vector<8x32xf32>
    %347 = math.exp %346 : vector<8x32xf32>
    %cst_125 = arith.constant 1.000000e+00 : f32
    %348 = vector.broadcast %cst_125 : f32 to vector<8x32xf32>
    %349 = arith.addf %348, %347 : vector<8x32xf32>
    %350 = arith.divf %348, %349 : vector<8x32xf32>
    %351 = vector.extract_strided_slice %339 {offsets = [0, 32], sizes = [8, 32], strides = [1, 1]} : vector<8x128xf32> to vector<8x32xf32>
    %352 = arith.negf %351 : vector<8x32xf32>
    %353 = math.exp %352 : vector<8x32xf32>
    %cst_126 = arith.constant 1.000000e+00 : f32
    %354 = vector.broadcast %cst_126 : f32 to vector<8x32xf32>
    %355 = arith.addf %354, %353 : vector<8x32xf32>
    %356 = arith.divf %354, %355 : vector<8x32xf32>
    %357 = vector.extract_strided_slice %339 {offsets = [0, 64], sizes = [8, 32], strides = [1, 1]} : vector<8x128xf32> to vector<8x32xf32>
    %358 = math.tanh %357 : vector<8x32xf32>
    %359 = vector.extract_strided_slice %339 {offsets = [0, 96], sizes = [8, 32], strides = [1, 1]} : vector<8x128xf32> to vector<8x32xf32>
    %360 = arith.negf %359 : vector<8x32xf32>
    %361 = math.exp %360 : vector<8x32xf32>
    %cst_127 = arith.constant 1.000000e+00 : f32
    %362 = vector.broadcast %cst_127 : f32 to vector<8x32xf32>
    %363 = arith.addf %362, %361 : vector<8x32xf32>
    %364 = arith.divf %362, %363 : vector<8x32xf32>
    %365 = arith.mulf %356, %344 : vector<8x32xf32>
    %366 = arith.mulf %350, %358 : vector<8x32xf32>
    %367 = arith.addf %365, %366 : vector<8x32xf32>
    %368 = math.tanh %367 : vector<8x32xf32>
    %369 = arith.mulf %364, %368 : vector<8x32xf32>
    %c0_128 = arith.constant 0 : index
    %c32_129 = arith.constant 32 : index
    %370 = vector.load %arg8[%c0_128, %c32_129] : memref<8x64xf32, #tpu.memory_space<vmem>>, vector<8x32xf32>
    %371 = vector.extract_strided_slice %343 {offsets = [0, 0], sizes = [8, 32], strides = [1, 1]} : vector<8x128xf32> to vector<8x32xf32>
    %372 = arith.negf %371 : vector<8x32xf32>
    %373 = math.exp %372 : vector<8x32xf32>
    %cst_130 = arith.constant 1.000000e+00 : f32
    %374 = vector.broadcast %cst_130 : f32 to vector<8x32xf32>
    %375 = arith.addf %374, %373 : vector<8x32xf32>
    %376 = arith.divf %374, %375 : vector<8x32xf32>
    %377 = vector.extract_strided_slice %343 {offsets = [0, 32], sizes = [8, 32], strides = [1, 1]} : vector<8x128xf32> to vector<8x32xf32>
    %378 = arith.negf %377 : vector<8x32xf32>
    %379 = math.exp %378 : vector<8x32xf32>
    %cst_131 = arith.constant 1.000000e+00 : f32
    %380 = vector.broadcast %cst_131 : f32 to vector<8x32xf32>
    %381 = arith.addf %380, %379 : vector<8x32xf32>
    %382 = arith.divf %380, %381 : vector<8x32xf32>
    %383 = vector.extract_strided_slice %343 {offsets = [0, 64], sizes = [8, 32], strides = [1, 1]} : vector<8x128xf32> to vector<8x32xf32>
    %384 = math.tanh %383 : vector<8x32xf32>
    %385 = vector.extract_strided_slice %343 {offsets = [0, 96], sizes = [8, 32], strides = [1, 1]} : vector<8x128xf32> to vector<8x32xf32>
    %386 = arith.negf %385 : vector<8x32xf32>
    %387 = math.exp %386 : vector<8x32xf32>
    %cst_132 = arith.constant 1.000000e+00 : f32
    %388 = vector.broadcast %cst_132 : f32 to vector<8x32xf32>
    %389 = arith.addf %388, %387 : vector<8x32xf32>
    %390 = arith.divf %388, %389 : vector<8x32xf32>
    %391 = arith.mulf %382, %370 : vector<8x32xf32>
    %392 = arith.mulf %376, %384 : vector<8x32xf32>
    %393 = arith.addf %391, %392 : vector<8x32xf32>
    %394 = math.tanh %393 : vector<8x32xf32>
    %395 = arith.mulf %390, %394 : vector<8x32xf32>
    %396 = tpu.concatenate %369, %395 in 1 : vector<8x32xf32>, vector<8x32xf32> -> vector<8x64xf32>
    %c0_133 = arith.constant 0 : index
    %c0_134 = arith.constant 0 : index
    %397 = vector.load %arg7[%c0_133, %c0_134] : memref<8x64xf32, #tpu.memory_space<vmem>>, vector<8x64xf32>
    tpu.vector_store %arg7[%c0_133, %c0_134], %396 {strides = array<i32>} : memref<8x64xf32, #tpu.memory_space<vmem>>, vector<8x64xf32>,
    %398 = tpu.concatenate %367, %393 in 1 : vector<8x32xf32>, vector<8x32xf32> -> vector<8x64xf32>
    %c0_135 = arith.constant 0 : index
    %c0_136 = arith.constant 0 : index
    %399 = vector.load %arg8[%c0_135, %c0_136] : memref<8x64xf32, #tpu.memory_space<vmem>>, vector<8x64xf32>
    tpu.vector_store %arg8[%c0_135, %c0_136], %398 {strides = array<i32>} : memref<8x64xf32, #tpu.memory_space<vmem>>, vector<8x64xf32>,
    %400 = arith.truncf %369 : vector<8x32xf32> to vector<8x32xbf16>
    %401 = arith.index_cast %328 : i32 to index
    %c0_137 = arith.constant 0 : index
    %402 = vector.load %arg5[%401, %c0_137] : memref<64x64xbf16, #tpu.memory_space<vmem>>, vector<8x32xbf16>
    tpu.vector_store %arg5[%401, %c0_137], %400 {strides = array<i32>} : memref<64x64xbf16, #tpu.memory_space<vmem>>, vector<8x32xbf16>,
    %403 = arith.truncf %395 : vector<8x32xf32> to vector<8x32xbf16>
    %404 = arith.index_cast %331 : i32 to index
    %c32_138 = arith.constant 32 : index
    %405 = vector.load %arg5[%404, %c32_138] : memref<64x64xbf16, #tpu.memory_space<vmem>>, vector<8x32xbf16>
    tpu.vector_store %arg5[%404, %c32_138], %403 {strides = array<i32>} : memref<64x64xbf16, #tpu.memory_space<vmem>>, vector<8x32xbf16>,
    %c5_i32 = arith.constant 5 : i32
    %c8_i32_139 = arith.constant 8 : i32
    %406 = arith.muli %c5_i32, %c8_i32_139 : i32
    %407 = tpu.assume_multiple %406, 8 : i32
    %c7_i32_140 = arith.constant 7 : i32
    %408 = arith.subi %c7_i32_140, %c5_i32 : i32
    %c8_i32_141 = arith.constant 8 : i32
    %409 = arith.muli %408, %c8_i32_141 : i32
    %410 = tpu.assume_multiple %409, 8 : i32
    %c0_142 = arith.constant 0 : index
    %c0_143 = arith.constant 0 : index
    %411 = vector.load %arg7[%c0_142, %c0_143] : memref<8x64xf32, #tpu.memory_space<vmem>>, vector<8x64xf32>
    %412 = arith.truncf %411 : vector<8x64xf32> to vector<8x64xbf16>
    %c0_144 = arith.constant 0 : index
    %c0_145 = arith.constant 0 : index
    %413 = vector.load %arg4[%c0_144, %c0_145] : memref<64x256xbf16, #tpu.memory_space<vmem>>, vector<64x256xbf16>
    %cst_146 = arith.constant dense<0.000000e+00> : vector<8x256xf32>
    %414 = tpu.matmul %412, %413, %cst_146 {dimension_numbers = #tpu.dot_dimension_numbers<[1], [0], [0], [1], [0, 0, 1, 1], [], []>} : vector<8x64xbf16>, vector<64x256xbf16>, vector<8x256xf32> -> vector<8x256xf32>
    %415 = arith.index_cast %407 : i32 to index
    %c0_147 = arith.constant 0 : index
    %416 = vector.load %arg6[%415, %c0_147] : memref<64x256xf32, #tpu.memory_space<vmem>>, vector<8x128xf32>
    %417 = vector.extract_strided_slice %414 {offsets = [0, 0], sizes = [8, 128], strides = [1, 1]} : vector<8x256xf32> to vector<8x128xf32>
    %418 = arith.addf %416, %417 : vector<8x128xf32>
    %419 = arith.index_cast %410 : i32 to index
    %c128_148 = arith.constant 128 : index
    %420 = vector.load %arg6[%419, %c128_148] : memref<64x256xf32, #tpu.memory_space<vmem>>, vector<8x128xf32>
    %421 = vector.extract_strided_slice %414 {offsets = [0, 128], sizes = [8, 128], strides = [1, 1]} : vector<8x256xf32> to vector<8x128xf32>
    %422 = arith.addf %420, %421 : vector<8x128xf32>
    %c0_149 = arith.constant 0 : index
    %c0_150 = arith.constant 0 : index
    %423 = vector.load %arg8[%c0_149, %c0_150] : memref<8x64xf32, #tpu.memory_space<vmem>>, vector<8x32xf32>
    %424 = vector.extract_strided_slice %418 {offsets = [0, 0], sizes = [8, 32], strides = [1, 1]} : vector<8x128xf32> to vector<8x32xf32>
    %425 = arith.negf %424 : vector<8x32xf32>
    %426 = math.exp %425 : vector<8x32xf32>
    %cst_151 = arith.constant 1.000000e+00 : f32
    %427 = vector.broadcast %cst_151 : f32 to vector<8x32xf32>
    %428 = arith.addf %427, %426 : vector<8x32xf32>
    %429 = arith.divf %427, %428 : vector<8x32xf32>
    %430 = vector.extract_strided_slice %418 {offsets = [0, 32], sizes = [8, 32], strides = [1, 1]} : vector<8x128xf32> to vector<8x32xf32>
    %431 = arith.negf %430 : vector<8x32xf32>
    %432 = math.exp %431 : vector<8x32xf32>
    %cst_152 = arith.constant 1.000000e+00 : f32
    %433 = vector.broadcast %cst_152 : f32 to vector<8x32xf32>
    %434 = arith.addf %433, %432 : vector<8x32xf32>
    %435 = arith.divf %433, %434 : vector<8x32xf32>
    %436 = vector.extract_strided_slice %418 {offsets = [0, 64], sizes = [8, 32], strides = [1, 1]} : vector<8x128xf32> to vector<8x32xf32>
    %437 = math.tanh %436 : vector<8x32xf32>
    %438 = vector.extract_strided_slice %418 {offsets = [0, 96], sizes = [8, 32], strides = [1, 1]} : vector<8x128xf32> to vector<8x32xf32>
    %439 = arith.negf %438 : vector<8x32xf32>
    %440 = math.exp %439 : vector<8x32xf32>
    %cst_153 = arith.constant 1.000000e+00 : f32
    %441 = vector.broadcast %cst_153 : f32 to vector<8x32xf32>
    %442 = arith.addf %441, %440 : vector<8x32xf32>
    %443 = arith.divf %441, %442 : vector<8x32xf32>
    %444 = arith.mulf %435, %423 : vector<8x32xf32>
    %445 = arith.mulf %429, %437 : vector<8x32xf32>
    %446 = arith.addf %444, %445 : vector<8x32xf32>
    %447 = math.tanh %446 : vector<8x32xf32>
    %448 = arith.mulf %443, %447 : vector<8x32xf32>
    %c0_154 = arith.constant 0 : index
    %c32_155 = arith.constant 32 : index
    %449 = vector.load %arg8[%c0_154, %c32_155] : memref<8x64xf32, #tpu.memory_space<vmem>>, vector<8x32xf32>
    %450 = vector.extract_strided_slice %422 {offsets = [0, 0], sizes = [8, 32], strides = [1, 1]} : vector<8x128xf32> to vector<8x32xf32>
    %451 = arith.negf %450 : vector<8x32xf32>
    %452 = math.exp %451 : vector<8x32xf32>
    %cst_156 = arith.constant 1.000000e+00 : f32
    %453 = vector.broadcast %cst_156 : f32 to vector<8x32xf32>
    %454 = arith.addf %453, %452 : vector<8x32xf32>
    %455 = arith.divf %453, %454 : vector<8x32xf32>
    %456 = vector.extract_strided_slice %422 {offsets = [0, 32], sizes = [8, 32], strides = [1, 1]} : vector<8x128xf32> to vector<8x32xf32>
    %457 = arith.negf %456 : vector<8x32xf32>
    %458 = math.exp %457 : vector<8x32xf32>
    %cst_157 = arith.constant 1.000000e+00 : f32
    %459 = vector.broadcast %cst_157 : f32 to vector<8x32xf32>
    %460 = arith.addf %459, %458 : vector<8x32xf32>
    %461 = arith.divf %459, %460 : vector<8x32xf32>
    %462 = vector.extract_strided_slice %422 {offsets = [0, 64], sizes = [8, 32], strides = [1, 1]} : vector<8x128xf32> to vector<8x32xf32>
    %463 = math.tanh %462 : vector<8x32xf32>
    %464 = vector.extract_strided_slice %422 {offsets = [0, 96], sizes = [8, 32], strides = [1, 1]} : vector<8x128xf32> to vector<8x32xf32>
    %465 = arith.negf %464 : vector<8x32xf32>
    %466 = math.exp %465 : vector<8x32xf32>
    %cst_158 = arith.constant 1.000000e+00 : f32
    %467 = vector.broadcast %cst_158 : f32 to vector<8x32xf32>
    %468 = arith.addf %467, %466 : vector<8x32xf32>
    %469 = arith.divf %467, %468 : vector<8x32xf32>
    %470 = arith.mulf %461, %449 : vector<8x32xf32>
    %471 = arith.mulf %455, %463 : vector<8x32xf32>
    %472 = arith.addf %470, %471 : vector<8x32xf32>
    %473 = math.tanh %472 : vector<8x32xf32>
    %474 = arith.mulf %469, %473 : vector<8x32xf32>
    %475 = tpu.concatenate %448, %474 in 1 : vector<8x32xf32>, vector<8x32xf32> -> vector<8x64xf32>
    %c0_159 = arith.constant 0 : index
    %c0_160 = arith.constant 0 : index
    %476 = vector.load %arg7[%c0_159, %c0_160] : memref<8x64xf32, #tpu.memory_space<vmem>>, vector<8x64xf32>
    tpu.vector_store %arg7[%c0_159, %c0_160], %475 {strides = array<i32>} : memref<8x64xf32, #tpu.memory_space<vmem>>, vector<8x64xf32>,
    %477 = tpu.concatenate %446, %472 in 1 : vector<8x32xf32>, vector<8x32xf32> -> vector<8x64xf32>
    %c0_161 = arith.constant 0 : index
    %c0_162 = arith.constant 0 : index
    %478 = vector.load %arg8[%c0_161, %c0_162] : memref<8x64xf32, #tpu.memory_space<vmem>>, vector<8x64xf32>
    tpu.vector_store %arg8[%c0_161, %c0_162], %477 {strides = array<i32>} : memref<8x64xf32, #tpu.memory_space<vmem>>, vector<8x64xf32>,
    %479 = arith.truncf %448 : vector<8x32xf32> to vector<8x32xbf16>
    %480 = arith.index_cast %407 : i32 to index
    %c0_163 = arith.constant 0 : index
    %481 = vector.load %arg5[%480, %c0_163] : memref<64x64xbf16, #tpu.memory_space<vmem>>, vector<8x32xbf16>
    tpu.vector_store %arg5[%480, %c0_163], %479 {strides = array<i32>} : memref<64x64xbf16, #tpu.memory_space<vmem>>, vector<8x32xbf16>,
    %482 = arith.truncf %474 : vector<8x32xf32> to vector<8x32xbf16>
    %483 = arith.index_cast %410 : i32 to index
    %c32_164 = arith.constant 32 : index
    %484 = vector.load %arg5[%483, %c32_164] : memref<64x64xbf16, #tpu.memory_space<vmem>>, vector<8x32xbf16>
    tpu.vector_store %arg5[%483, %c32_164], %482 {strides = array<i32>} : memref<64x64xbf16, #tpu.memory_space<vmem>>, vector<8x32xbf16>,
    %c6_i32 = arith.constant 6 : i32
    %c8_i32_165 = arith.constant 8 : i32
    %485 = arith.muli %c6_i32, %c8_i32_165 : i32
    %486 = tpu.assume_multiple %485, 8 : i32
    %c7_i32_166 = arith.constant 7 : i32
    %487 = arith.subi %c7_i32_166, %c6_i32 : i32
    %c8_i32_167 = arith.constant 8 : i32
    %488 = arith.muli %487, %c8_i32_167 : i32
    %489 = tpu.assume_multiple %488, 8 : i32
    %c0_168 = arith.constant 0 : index
    %c0_169 = arith.constant 0 : index
    %490 = vector.load %arg7[%c0_168, %c0_169] : memref<8x64xf32, #tpu.memory_space<vmem>>, vector<8x64xf32>
    %491 = arith.truncf %490 : vector<8x64xf32> to vector<8x64xbf16>
    %c0_170 = arith.constant 0 : index
    %c0_171 = arith.constant 0 : index
    %492 = vector.load %arg4[%c0_170, %c0_171] : memref<64x256xbf16, #tpu.memory_space<vmem>>, vector<64x256xbf16>
    %cst_172 = arith.constant dense<0.000000e+00> : vector<8x256xf32>
    %493 = tpu.matmul %491, %492, %cst_172 {dimension_numbers = #tpu.dot_dimension_numbers<[1], [0], [0], [1], [0, 0, 1, 1], [], []>} : vector<8x64xbf16>, vector<64x256xbf16>, vector<8x256xf32> -> vector<8x256xf32>
    %494 = arith.index_cast %486 : i32 to index
    %c0_173 = arith.constant 0 : index
    %495 = vector.load %arg6[%494, %c0_173] : memref<64x256xf32, #tpu.memory_space<vmem>>, vector<8x128xf32>
    %496 = vector.extract_strided_slice %493 {offsets = [0, 0], sizes = [8, 128], strides = [1, 1]} : vector<8x256xf32> to vector<8x128xf32>
    %497 = arith.addf %495, %496 : vector<8x128xf32>
    %498 = arith.index_cast %489 : i32 to index
    %c128_174 = arith.constant 128 : index
    %499 = vector.load %arg6[%498, %c128_174] : memref<64x256xf32, #tpu.memory_space<vmem>>, vector<8x128xf32>
    %500 = vector.extract_strided_slice %493 {offsets = [0, 128], sizes = [8, 128], strides = [1, 1]} : vector<8x256xf32> to vector<8x128xf32>
    %501 = arith.addf %499, %500 : vector<8x128xf32>
    %c0_175 = arith.constant 0 : index
    %c0_176 = arith.constant 0 : index
    %502 = vector.load %arg8[%c0_175, %c0_176] : memref<8x64xf32, #tpu.memory_space<vmem>>, vector<8x32xf32>
    %503 = vector.extract_strided_slice %497 {offsets = [0, 0], sizes = [8, 32], strides = [1, 1]} : vector<8x128xf32> to vector<8x32xf32>
    %504 = arith.negf %503 : vector<8x32xf32>
    %505 = math.exp %504 : vector<8x32xf32>
    %cst_177 = arith.constant 1.000000e+00 : f32
    %506 = vector.broadcast %cst_177 : f32 to vector<8x32xf32>
    %507 = arith.addf %506, %505 : vector<8x32xf32>
    %508 = arith.divf %506, %507 : vector<8x32xf32>
    %509 = vector.extract_strided_slice %497 {offsets = [0, 32], sizes = [8, 32], strides = [1, 1]} : vector<8x128xf32> to vector<8x32xf32>
    %510 = arith.negf %509 : vector<8x32xf32>
    %511 = math.exp %510 : vector<8x32xf32>
    %cst_178 = arith.constant 1.000000e+00 : f32
    %512 = vector.broadcast %cst_178 : f32 to vector<8x32xf32>
    %513 = arith.addf %512, %511 : vector<8x32xf32>
    %514 = arith.divf %512, %513 : vector<8x32xf32>
    %515 = vector.extract_strided_slice %497 {offsets = [0, 64], sizes = [8, 32], strides = [1, 1]} : vector<8x128xf32> to vector<8x32xf32>
    %516 = math.tanh %515 : vector<8x32xf32>
    %517 = vector.extract_strided_slice %497 {offsets = [0, 96], sizes = [8, 32], strides = [1, 1]} : vector<8x128xf32> to vector<8x32xf32>
    %518 = arith.negf %517 : vector<8x32xf32>
    %519 = math.exp %518 : vector<8x32xf32>
    %cst_179 = arith.constant 1.000000e+00 : f32
    %520 = vector.broadcast %cst_179 : f32 to vector<8x32xf32>
    %521 = arith.addf %520, %519 : vector<8x32xf32>
    %522 = arith.divf %520, %521 : vector<8x32xf32>
    %523 = arith.mulf %514, %502 : vector<8x32xf32>
    %524 = arith.mulf %508, %516 : vector<8x32xf32>
    %525 = arith.addf %523, %524 : vector<8x32xf32>
    %526 = math.tanh %525 : vector<8x32xf32>
    %527 = arith.mulf %522, %526 : vector<8x32xf32>
    %c0_180 = arith.constant 0 : index
    %c32_181 = arith.constant 32 : index
    %528 = vector.load %arg8[%c0_180, %c32_181] : memref<8x64xf32, #tpu.memory_space<vmem>>, vector<8x32xf32>
    %529 = vector.extract_strided_slice %501 {offsets = [0, 0], sizes = [8, 32], strides = [1, 1]} : vector<8x128xf32> to vector<8x32xf32>
    %530 = arith.negf %529 : vector<8x32xf32>
    %531 = math.exp %530 : vector<8x32xf32>
    %cst_182 = arith.constant 1.000000e+00 : f32
    %532 = vector.broadcast %cst_182 : f32 to vector<8x32xf32>
    %533 = arith.addf %532, %531 : vector<8x32xf32>
    %534 = arith.divf %532, %533 : vector<8x32xf32>
    %535 = vector.extract_strided_slice %501 {offsets = [0, 32], sizes = [8, 32], strides = [1, 1]} : vector<8x128xf32> to vector<8x32xf32>
    %536 = arith.negf %535 : vector<8x32xf32>
    %537 = math.exp %536 : vector<8x32xf32>
    %cst_183 = arith.constant 1.000000e+00 : f32
    %538 = vector.broadcast %cst_183 : f32 to vector<8x32xf32>
    %539 = arith.addf %538, %537 : vector<8x32xf32>
    %540 = arith.divf %538, %539 : vector<8x32xf32>
    %541 = vector.extract_strided_slice %501 {offsets = [0, 64], sizes = [8, 32], strides = [1, 1]} : vector<8x128xf32> to vector<8x32xf32>
    %542 = math.tanh %541 : vector<8x32xf32>
    %543 = vector.extract_strided_slice %501 {offsets = [0, 96], sizes = [8, 32], strides = [1, 1]} : vector<8x128xf32> to vector<8x32xf32>
    %544 = arith.negf %543 : vector<8x32xf32>
    %545 = math.exp %544 : vector<8x32xf32>
    %cst_184 = arith.constant 1.000000e+00 : f32
    %546 = vector.broadcast %cst_184 : f32 to vector<8x32xf32>
    %547 = arith.addf %546, %545 : vector<8x32xf32>
    %548 = arith.divf %546, %547 : vector<8x32xf32>
    %549 = arith.mulf %540, %528 : vector<8x32xf32>
    %550 = arith.mulf %534, %542 : vector<8x32xf32>
    %551 = arith.addf %549, %550 : vector<8x32xf32>
    %552 = math.tanh %551 : vector<8x32xf32>
    %553 = arith.mulf %548, %552 : vector<8x32xf32>
    %554 = tpu.concatenate %527, %553 in 1 : vector<8x32xf32>, vector<8x32xf32> -> vector<8x64xf32>
    %c0_185 = arith.constant 0 : index
    %c0_186 = arith.constant 0 : index
    %555 = vector.load %arg7[%c0_185, %c0_186] : memref<8x64xf32, #tpu.memory_space<vmem>>, vector<8x64xf32>
    tpu.vector_store %arg7[%c0_185, %c0_186], %554 {strides = array<i32>} : memref<8x64xf32, #tpu.memory_space<vmem>>, vector<8x64xf32>,
    %556 = tpu.concatenate %525, %551 in 1 : vector<8x32xf32>, vector<8x32xf32> -> vector<8x64xf32>
    %c0_187 = arith.constant 0 : index
    %c0_188 = arith.constant 0 : index
    %557 = vector.load %arg8[%c0_187, %c0_188] : memref<8x64xf32, #tpu.memory_space<vmem>>, vector<8x64xf32>
    tpu.vector_store %arg8[%c0_187, %c0_188], %556 {strides = array<i32>} : memref<8x64xf32, #tpu.memory_space<vmem>>, vector<8x64xf32>,
    %558 = arith.truncf %527 : vector<8x32xf32> to vector<8x32xbf16>
    %559 = arith.index_cast %486 : i32 to index
    %c0_189 = arith.constant 0 : index
    %560 = vector.load %arg5[%559, %c0_189] : memref<64x64xbf16, #tpu.memory_space<vmem>>, vector<8x32xbf16>
    tpu.vector_store %arg5[%559, %c0_189], %558 {strides = array<i32>} : memref<64x64xbf16, #tpu.memory_space<vmem>>, vector<8x32xbf16>,
    %561 = arith.truncf %553 : vector<8x32xf32> to vector<8x32xbf16>
    %562 = arith.index_cast %489 : i32 to index
    %c32_190 = arith.constant 32 : index
    %563 = vector.load %arg5[%562, %c32_190] : memref<64x64xbf16, #tpu.memory_space<vmem>>, vector<8x32xbf16>
    tpu.vector_store %arg5[%562, %c32_190], %561 {strides = array<i32>} : memref<64x64xbf16, #tpu.memory_space<vmem>>, vector<8x32xbf16>,
    %c7_i32_191 = arith.constant 7 : i32
    %c8_i32_192 = arith.constant 8 : i32
    %564 = arith.muli %c7_i32_191, %c8_i32_192 : i32
    %565 = tpu.assume_multiple %564, 8 : i32
    %c7_i32_193 = arith.constant 7 : i32
    %566 = arith.subi %c7_i32_193, %c7_i32_191 : i32
    %c8_i32_194 = arith.constant 8 : i32
    %567 = arith.muli %566, %c8_i32_194 : i32
    %568 = tpu.assume_multiple %567, 8 : i32
    %c0_195 = arith.constant 0 : index
    %c0_196 = arith.constant 0 : index
    %569 = vector.load %arg7[%c0_195, %c0_196] : memref<8x64xf32, #tpu.memory_space<vmem>>, vector<8x64xf32>
    %570 = arith.truncf %569 : vector<8x64xf32> to vector<8x64xbf16>
    %c0_197 = arith.constant 0 : index
    %c0_198 = arith.constant 0 : index
    %571 = vector.load %arg4[%c0_197, %c0_198] : memref<64x256xbf16, #tpu.memory_space<vmem>>, vector<64x256xbf16>
    %cst_199 = arith.constant dense<0.000000e+00> : vector<8x256xf32>
    %572 = tpu.matmul %570, %571, %cst_199 {dimension_numbers = #tpu.dot_dimension_numbers<[1], [0], [0], [1], [0, 0, 1, 1], [], []>} : vector<8x64xbf16>, vector<64x256xbf16>, vector<8x256xf32> -> vector<8x256xf32>
    %573 = arith.index_cast %565 : i32 to index
    %c0_200 = arith.constant 0 : index
    %574 = vector.load %arg6[%573, %c0_200] : memref<64x256xf32, #tpu.memory_space<vmem>>, vector<8x128xf32>
    %575 = vector.extract_strided_slice %572 {offsets = [0, 0], sizes = [8, 128], strides = [1, 1]} : vector<8x256xf32> to vector<8x128xf32>
    %576 = arith.addf %574, %575 : vector<8x128xf32>
    %577 = arith.index_cast %568 : i32 to index
    %c128_201 = arith.constant 128 : index
    %578 = vector.load %arg6[%577, %c128_201] : memref<64x256xf32, #tpu.memory_space<vmem>>, vector<8x128xf32>
    %579 = vector.extract_strided_slice %572 {offsets = [0, 128], sizes = [8, 128], strides = [1, 1]} : vector<8x256xf32> to vector<8x128xf32>
    %580 = arith.addf %578, %579 : vector<8x128xf32>
    %c0_202 = arith.constant 0 : index
    %c0_203 = arith.constant 0 : index
    %581 = vector.load %arg8[%c0_202, %c0_203] : memref<8x64xf32, #tpu.memory_space<vmem>>, vector<8x32xf32>
    %582 = vector.extract_strided_slice %576 {offsets = [0, 0], sizes = [8, 32], strides = [1, 1]} : vector<8x128xf32> to vector<8x32xf32>
    %583 = arith.negf %582 : vector<8x32xf32>
    %584 = math.exp %583 : vector<8x32xf32>
    %cst_204 = arith.constant 1.000000e+00 : f32
    %585 = vector.broadcast %cst_204 : f32 to vector<8x32xf32>
    %586 = arith.addf %585, %584 : vector<8x32xf32>
    %587 = arith.divf %585, %586 : vector<8x32xf32>
    %588 = vector.extract_strided_slice %576 {offsets = [0, 32], sizes = [8, 32], strides = [1, 1]} : vector<8x128xf32> to vector<8x32xf32>
    %589 = arith.negf %588 : vector<8x32xf32>
    %590 = math.exp %589 : vector<8x32xf32>
    %cst_205 = arith.constant 1.000000e+00 : f32
    %591 = vector.broadcast %cst_205 : f32 to vector<8x32xf32>
    %592 = arith.addf %591, %590 : vector<8x32xf32>
    %593 = arith.divf %591, %592 : vector<8x32xf32>
    %594 = vector.extract_strided_slice %576 {offsets = [0, 64], sizes = [8, 32], strides = [1, 1]} : vector<8x128xf32> to vector<8x32xf32>
    %595 = math.tanh %594 : vector<8x32xf32>
    %596 = vector.extract_strided_slice %576 {offsets = [0, 96], sizes = [8, 32], strides = [1, 1]} : vector<8x128xf32> to vector<8x32xf32>
    %597 = arith.negf %596 : vector<8x32xf32>
    %598 = math.exp %597 : vector<8x32xf32>
    %cst_206 = arith.constant 1.000000e+00 : f32
    %599 = vector.broadcast %cst_206 : f32 to vector<8x32xf32>
    %600 = arith.addf %599, %598 : vector<8x32xf32>
    %601 = arith.divf %599, %600 : vector<8x32xf32>
    %602 = arith.mulf %593, %581 : vector<8x32xf32>
    %603 = arith.mulf %587, %595 : vector<8x32xf32>
    %604 = arith.addf %602, %603 : vector<8x32xf32>
    %605 = math.tanh %604 : vector<8x32xf32>
    %606 = arith.mulf %601, %605 : vector<8x32xf32>
    %c0_207 = arith.constant 0 : index
    %c32_208 = arith.constant 32 : index
    %607 = vector.load %arg8[%c0_207, %c32_208] : memref<8x64xf32, #tpu.memory_space<vmem>>, vector<8x32xf32>
    %608 = vector.extract_strided_slice %580 {offsets = [0, 0], sizes = [8, 32], strides = [1, 1]} : vector<8x128xf32> to vector<8x32xf32>
    %609 = arith.negf %608 : vector<8x32xf32>
    %610 = math.exp %609 : vector<8x32xf32>
    %cst_209 = arith.constant 1.000000e+00 : f32
    %611 = vector.broadcast %cst_209 : f32 to vector<8x32xf32>
    %612 = arith.addf %611, %610 : vector<8x32xf32>
    %613 = arith.divf %611, %612 : vector<8x32xf32>
    %614 = vector.extract_strided_slice %580 {offsets = [0, 32], sizes = [8, 32], strides = [1, 1]} : vector<8x128xf32> to vector<8x32xf32>
    %615 = arith.negf %614 : vector<8x32xf32>
    %616 = math.exp %615 : vector<8x32xf32>
    %cst_210 = arith.constant 1.000000e+00 : f32
    %617 = vector.broadcast %cst_210 : f32 to vector<8x32xf32>
    %618 = arith.addf %617, %616 : vector<8x32xf32>
    %619 = arith.divf %617, %618 : vector<8x32xf32>
    %620 = vector.extract_strided_slice %580 {offsets = [0, 64], sizes = [8, 32], strides = [1, 1]} : vector<8x128xf32> to vector<8x32xf32>
    %621 = math.tanh %620 : vector<8x32xf32>
    %622 = vector.extract_strided_slice %580 {offsets = [0, 96], sizes = [8, 32], strides = [1, 1]} : vector<8x128xf32> to vector<8x32xf32>
    %623 = arith.negf %622 : vector<8x32xf32>
    %624 = math.exp %623 : vector<8x32xf32>
    %cst_211 = arith.constant 1.000000e+00 : f32
    %625 = vector.broadcast %cst_211 : f32 to vector<8x32xf32>
    %626 = arith.addf %625, %624 : vector<8x32xf32>
    %627 = arith.divf %625, %626 : vector<8x32xf32>
    %628 = arith.mulf %619, %607 : vector<8x32xf32>
    %629 = arith.mulf %613, %621 : vector<8x32xf32>
    %630 = arith.addf %628, %629 : vector<8x32xf32>
    %631 = math.tanh %630 : vector<8x32xf32>
    %632 = arith.mulf %627, %631 : vector<8x32xf32>
    %633 = tpu.concatenate %606, %632 in 1 : vector<8x32xf32>, vector<8x32xf32> -> vector<8x64xf32>
    %c0_212 = arith.constant 0 : index
    %c0_213 = arith.constant 0 : index
    %634 = vector.load %arg7[%c0_212, %c0_213] : memref<8x64xf32, #tpu.memory_space<vmem>>, vector<8x64xf32>
    tpu.vector_store %arg7[%c0_212, %c0_213], %633 {strides = array<i32>} : memref<8x64xf32, #tpu.memory_space<vmem>>, vector<8x64xf32>,
    %635 = tpu.concatenate %604, %630 in 1 : vector<8x32xf32>, vector<8x32xf32> -> vector<8x64xf32>
    %c0_214 = arith.constant 0 : index
    %c0_215 = arith.constant 0 : index
    %636 = vector.load %arg8[%c0_214, %c0_215] : memref<8x64xf32, #tpu.memory_space<vmem>>, vector<8x64xf32>
    tpu.vector_store %arg8[%c0_214, %c0_215], %635 {strides = array<i32>} : memref<8x64xf32, #tpu.memory_space<vmem>>, vector<8x64xf32>,
    %637 = arith.truncf %606 : vector<8x32xf32> to vector<8x32xbf16>
    %638 = arith.index_cast %565 : i32 to index
    %c0_216 = arith.constant 0 : index
    %639 = vector.load %arg5[%638, %c0_216] : memref<64x64xbf16, #tpu.memory_space<vmem>>, vector<8x32xbf16>
    tpu.vector_store %arg5[%638, %c0_216], %637 {strides = array<i32>} : memref<64x64xbf16, #tpu.memory_space<vmem>>, vector<8x32xbf16>,
    %640 = arith.truncf %632 : vector<8x32xf32> to vector<8x32xbf16>
    %641 = arith.index_cast %568 : i32 to index
    %c32_217 = arith.constant 32 : index
    %642 = vector.load %arg5[%641, %c32_217] : memref<64x64xbf16, #tpu.memory_space<vmem>>, vector<8x32xbf16>
    tpu.vector_store %arg5[%641, %c32_217], %640 {strides = array<i32>} : memref<64x64xbf16, #tpu.memory_space<vmem>>, vector<8x32xbf16>,
    %c8_i32_218 = arith.constant 8 : i32
    return
  }
  func.func @transform_0(%arg0: i32) -> (i32, i32) {
    %c0_i32 = arith.constant 0 : i32
    %c0_i32_0 = arith.constant 0 : i32
    %c0_i32_1 = arith.constant 0 : i32
    return %c0_i32, %c0_i32_0 : i32, i32
  }
  func.func @transform_1(%arg0: i32) -> (i32, i32) {
    %c0_i32 = arith.constant 0 : i32
    %c0_i32_0 = arith.constant 0 : i32
    %c0_i32_1 = arith.constant 0 : i32
    return %c0_i32, %c0_i32_0 : i32, i32
  }
  func.func @transform_2(%arg0: i32) -> (i32, i32) {
    %c0_i32 = arith.constant 0 : i32
    %c0_i32_0 = arith.constant 0 : i32
    %c0_i32_1 = arith.constant 0 : i32
    return %c0_i32, %c0_i32_0 : i32, i32
  }
  func.func @transform_3(%arg0: i32) -> (i32, i32) {
    %c0_i32 = arith.constant 0 : i32
    %c0_i32_0 = arith.constant 0 : i32
    %c0_i32_1 = arith.constant 0 : i32
    return %c0_i32, %c0_i32_0 : i32, i32
  }
  func.func @transform_4(%arg0: i32) -> (i32, i32) {
    %c0_i32 = arith.constant 0 : i32
    %c0_i32_0 = arith.constant 0 : i32
    %c0_i32_1 = arith.constant 0 : i32
    return %c0_i32, %c0_i32_0 : i32, i32
  }
}

module attributes {stable_mosaic.version = 11 : i64} {
  func.func @kernel(%arg0: i32, %arg1: memref<64x64xbf16, #tpu.memory_space<vmem>>, %arg2: memref<64x256xbf16, #tpu.memory_space<vmem>>, %arg3: memref<1x256xf32, #tpu.memory_space<vmem>>, %arg4: memref<64x256xbf16, #tpu.memory_space<vmem>>, %arg5: memref<64x128xf32, #tpu.memory_space<vmem>>, %arg6: memref<1x128xf32, #tpu.memory_space<vmem>>, %arg7: memref<64x128xf32, #tpu.memory_space<vmem>>, %arg8: memref<64x256xf32, #tpu.memory_space<vmem>>, %arg9: memref<8x64xf32, #tpu.memory_space<vmem>>, %arg10: memref<8x64xf32, #tpu.memory_space<vmem>>, %arg11: memref<64x64xf32, #tpu.memory_space<vmem>>) attributes {dimension_semantics = [#tpu.dimension_semantics<arbitrary>], iteration_bounds = array<i64: 1>, scalar_prefetch = 0 : i64, scratch_operands = 4 : i64, tpu.core_type = #tpu.core_type<tc>, window_params = [{pipeline_mode = #tpu.pipeline_mode<synchronous>, transform_indices = @transform_0, window_bounds = array<i64: 64, 64>}, {pipeline_mode = #tpu.pipeline_mode<synchronous>, transform_indices = @transform_1, window_bounds = array<i64: 64, 256>}, {pipeline_mode = #tpu.pipeline_mode<synchronous>, transform_indices = @transform_2, window_bounds = array<i64: 1, 256>}, {pipeline_mode = #tpu.pipeline_mode<synchronous>, transform_indices = @transform_3, window_bounds = array<i64: 64, 256>}, {pipeline_mode = #tpu.pipeline_mode<synchronous>, transform_indices = @transform_4, window_bounds = array<i64: 64, 128>}, {pipeline_mode = #tpu.pipeline_mode<synchronous>, transform_indices = @transform_5, window_bounds = array<i64: 1, 128>}, {pipeline_mode = #tpu.pipeline_mode<synchronous>, transform_indices = @transform_6, window_bounds = array<i64: 64, 128>}]} {
    %c0 = arith.constant 0 : index
    %c0_0 = arith.constant 0 : index
    %0 = vector.load %arg1[%c0, %c0_0] : memref<64x64xbf16, #tpu.memory_space<vmem>>, vector<64x64xbf16>
    %c0_1 = arith.constant 0 : index
    %c0_2 = arith.constant 0 : index
    %1 = vector.load %arg2[%c0_1, %c0_2] : memref<64x256xbf16, #tpu.memory_space<vmem>>, vector<64x256xbf16>
    %cst = arith.constant dense<0.000000e+00> : vector<64x256xf32>
    %2 = tpu.matmul %0, %1, %cst {dimension_numbers = #tpu.dot_dimension_numbers<[1], [0], [0], [1], [0, 0, 1, 1], [], []>} : vector<64x64xbf16>, vector<64x256xbf16>, vector<64x256xf32> -> vector<64x256xf32>
    %c0_3 = arith.constant 0 : index
    %c0_4 = arith.constant 0 : index
    %3 = vector.load %arg3[%c0_3, %c0_4] : memref<1x256xf32, #tpu.memory_space<vmem>>, vector<1x256xf32>
    %4 = vector.broadcast %3 : vector<1x256xf32> to vector<64x256xf32>
    %5 = arith.addf %2, %4 : vector<64x256xf32>
    %c0_5 = arith.constant 0 : index
    %c0_6 = arith.constant 0 : index
    %6 = vector.load %arg8[%c0_5, %c0_6] : memref<64x256xf32, #tpu.memory_space<vmem>>, vector<64x256xf32>
    tpu.vector_store %arg8[%c0_5, %c0_6], %5 {strides = array<i32>} : memref<64x256xf32, #tpu.memory_space<vmem>>, vector<64x256xf32>,
    %cst_7 = arith.constant 0.000000e+00 : f32
    %7 = vector.broadcast %cst_7 : f32 to vector<8x64xf32>
    %c0_8 = arith.constant 0 : index
    %c0_9 = arith.constant 0 : index
    %8 = vector.load %arg9[%c0_8, %c0_9] : memref<8x64xf32, #tpu.memory_space<vmem>>, vector<8x64xf32>
    tpu.vector_store %arg9[%c0_8, %c0_9], %7 {strides = array<i32>} : memref<8x64xf32, #tpu.memory_space<vmem>>, vector<8x64xf32>,
    %cst_10 = arith.constant 0.000000e+00 : f32
    %9 = vector.broadcast %cst_10 : f32 to vector<8x64xf32>
    %c0_11 = arith.constant 0 : index
    %c0_12 = arith.constant 0 : index
    %10 = vector.load %arg10[%c0_11, %c0_12] : memref<8x64xf32, #tpu.memory_space<vmem>>, vector<8x64xf32>
    tpu.vector_store %arg10[%c0_11, %c0_12], %9 {strides = array<i32>} : memref<8x64xf32, #tpu.memory_space<vmem>>, vector<8x64xf32>,
    %c0_i32 = arith.constant 0 : i32
    %c8_i32 = arith.constant 8 : i32
    %11 = arith.muli %c0_i32, %c8_i32 : i32
    %12 = tpu.assume_multiple %11, 8 : i32
    %c7_i32 = arith.constant 7 : i32
    %13 = arith.subi %c7_i32, %c0_i32 : i32
    %c8_i32_13 = arith.constant 8 : i32
    %14 = arith.muli %13, %c8_i32_13 : i32
    %15 = tpu.assume_multiple %14, 8 : i32
    %c0_14 = arith.constant 0 : index
    %c0_15 = arith.constant 0 : index
    %16 = vector.load %arg9[%c0_14, %c0_15] : memref<8x64xf32, #tpu.memory_space<vmem>>, vector<8x64xf32>
    %17 = arith.truncf %16 : vector<8x64xf32> to vector<8x64xbf16>
    %c0_16 = arith.constant 0 : index
    %c0_17 = arith.constant 0 : index
    %18 = vector.load %arg4[%c0_16, %c0_17] : memref<64x256xbf16, #tpu.memory_space<vmem>>, vector<64x256xbf16>
    %cst_18 = arith.constant dense<0.000000e+00> : vector<8x256xf32>
    %19 = tpu.matmul %17, %18, %cst_18 {dimension_numbers = #tpu.dot_dimension_numbers<[1], [0], [0], [1], [0, 0, 1, 1], [], []>} : vector<8x64xbf16>, vector<64x256xbf16>, vector<8x256xf32> -> vector<8x256xf32>
    %20 = arith.index_cast %12 : i32 to index
    %c0_19 = arith.constant 0 : index
    %21 = vector.load %arg8[%20, %c0_19] : memref<64x256xf32, #tpu.memory_space<vmem>>, vector<8x128xf32>
    %22 = vector.extract_strided_slice %19 {offsets = [0, 0], sizes = [8, 128], strides = [1, 1]} : vector<8x256xf32> to vector<8x128xf32>
    %23 = arith.addf %21, %22 : vector<8x128xf32>
    %24 = arith.index_cast %15 : i32 to index
    %c128 = arith.constant 128 : index
    %25 = vector.load %arg8[%24, %c128] : memref<64x256xf32, #tpu.memory_space<vmem>>, vector<8x128xf32>
    %26 = vector.extract_strided_slice %19 {offsets = [0, 128], sizes = [8, 128], strides = [1, 1]} : vector<8x256xf32> to vector<8x128xf32>
    %27 = arith.addf %25, %26 : vector<8x128xf32>
    %c0_20 = arith.constant 0 : index
    %c0_21 = arith.constant 0 : index
    %28 = vector.load %arg10[%c0_20, %c0_21] : memref<8x64xf32, #tpu.memory_space<vmem>>, vector<8x32xf32>
    %29 = vector.extract_strided_slice %23 {offsets = [0, 0], sizes = [8, 32], strides = [1, 1]} : vector<8x128xf32> to vector<8x32xf32>
    %30 = arith.negf %29 : vector<8x32xf32>
    %31 = math.exp %30 : vector<8x32xf32>
    %cst_22 = arith.constant 1.000000e+00 : f32
    %32 = vector.broadcast %cst_22 : f32 to vector<8x32xf32>
    %33 = arith.addf %32, %31 : vector<8x32xf32>
    %34 = arith.divf %32, %33 : vector<8x32xf32>
    %35 = vector.extract_strided_slice %23 {offsets = [0, 32], sizes = [8, 32], strides = [1, 1]} : vector<8x128xf32> to vector<8x32xf32>
    %36 = arith.negf %35 : vector<8x32xf32>
    %37 = math.exp %36 : vector<8x32xf32>
    %cst_23 = arith.constant 1.000000e+00 : f32
    %38 = vector.broadcast %cst_23 : f32 to vector<8x32xf32>
    %39 = arith.addf %38, %37 : vector<8x32xf32>
    %40 = arith.divf %38, %39 : vector<8x32xf32>
    %41 = vector.extract_strided_slice %23 {offsets = [0, 64], sizes = [8, 32], strides = [1, 1]} : vector<8x128xf32> to vector<8x32xf32>
    %42 = math.tanh %41 : vector<8x32xf32>
    %43 = vector.extract_strided_slice %23 {offsets = [0, 96], sizes = [8, 32], strides = [1, 1]} : vector<8x128xf32> to vector<8x32xf32>
    %44 = arith.negf %43 : vector<8x32xf32>
    %45 = math.exp %44 : vector<8x32xf32>
    %cst_24 = arith.constant 1.000000e+00 : f32
    %46 = vector.broadcast %cst_24 : f32 to vector<8x32xf32>
    %47 = arith.addf %46, %45 : vector<8x32xf32>
    %48 = arith.divf %46, %47 : vector<8x32xf32>
    %49 = arith.mulf %40, %28 : vector<8x32xf32>
    %50 = arith.mulf %34, %42 : vector<8x32xf32>
    %51 = arith.addf %49, %50 : vector<8x32xf32>
    %52 = math.tanh %51 : vector<8x32xf32>
    %53 = arith.mulf %48, %52 : vector<8x32xf32>
    %c0_25 = arith.constant 0 : index
    %c32 = arith.constant 32 : index
    %54 = vector.load %arg10[%c0_25, %c32] : memref<8x64xf32, #tpu.memory_space<vmem>>, vector<8x32xf32>
    %55 = vector.extract_strided_slice %27 {offsets = [0, 0], sizes = [8, 32], strides = [1, 1]} : vector<8x128xf32> to vector<8x32xf32>
    %56 = arith.negf %55 : vector<8x32xf32>
    %57 = math.exp %56 : vector<8x32xf32>
    %cst_26 = arith.constant 1.000000e+00 : f32
    %58 = vector.broadcast %cst_26 : f32 to vector<8x32xf32>
    %59 = arith.addf %58, %57 : vector<8x32xf32>
    %60 = arith.divf %58, %59 : vector<8x32xf32>
    %61 = vector.extract_strided_slice %27 {offsets = [0, 32], sizes = [8, 32], strides = [1, 1]} : vector<8x128xf32> to vector<8x32xf32>
    %62 = arith.negf %61 : vector<8x32xf32>
    %63 = math.exp %62 : vector<8x32xf32>
    %cst_27 = arith.constant 1.000000e+00 : f32
    %64 = vector.broadcast %cst_27 : f32 to vector<8x32xf32>
    %65 = arith.addf %64, %63 : vector<8x32xf32>
    %66 = arith.divf %64, %65 : vector<8x32xf32>
    %67 = vector.extract_strided_slice %27 {offsets = [0, 64], sizes = [8, 32], strides = [1, 1]} : vector<8x128xf32> to vector<8x32xf32>
    %68 = math.tanh %67 : vector<8x32xf32>
    %69 = vector.extract_strided_slice %27 {offsets = [0, 96], sizes = [8, 32], strides = [1, 1]} : vector<8x128xf32> to vector<8x32xf32>
    %70 = arith.negf %69 : vector<8x32xf32>
    %71 = math.exp %70 : vector<8x32xf32>
    %cst_28 = arith.constant 1.000000e+00 : f32
    %72 = vector.broadcast %cst_28 : f32 to vector<8x32xf32>
    %73 = arith.addf %72, %71 : vector<8x32xf32>
    %74 = arith.divf %72, %73 : vector<8x32xf32>
    %75 = arith.mulf %66, %54 : vector<8x32xf32>
    %76 = arith.mulf %60, %68 : vector<8x32xf32>
    %77 = arith.addf %75, %76 : vector<8x32xf32>
    %78 = math.tanh %77 : vector<8x32xf32>
    %79 = arith.mulf %74, %78 : vector<8x32xf32>
    %80 = tpu.concatenate %53, %79 in 1 : vector<8x32xf32>, vector<8x32xf32> -> vector<8x64xf32>
    %c0_29 = arith.constant 0 : index
    %c0_30 = arith.constant 0 : index
    %81 = vector.load %arg9[%c0_29, %c0_30] : memref<8x64xf32, #tpu.memory_space<vmem>>, vector<8x64xf32>
    tpu.vector_store %arg9[%c0_29, %c0_30], %80 {strides = array<i32>} : memref<8x64xf32, #tpu.memory_space<vmem>>, vector<8x64xf32>,
    %82 = tpu.concatenate %51, %77 in 1 : vector<8x32xf32>, vector<8x32xf32> -> vector<8x64xf32>
    %c0_31 = arith.constant 0 : index
    %c0_32 = arith.constant 0 : index
    %83 = vector.load %arg10[%c0_31, %c0_32] : memref<8x64xf32, #tpu.memory_space<vmem>>, vector<8x64xf32>
    tpu.vector_store %arg10[%c0_31, %c0_32], %82 {strides = array<i32>} : memref<8x64xf32, #tpu.memory_space<vmem>>, vector<8x64xf32>,
    %84 = arith.index_cast %12 : i32 to index
    %c0_33 = arith.constant 0 : index
    %85 = vector.load %arg11[%84, %c0_33] : memref<64x64xf32, #tpu.memory_space<vmem>>, vector<8x32xf32>
    tpu.vector_store %arg11[%84, %c0_33], %53 {strides = array<i32>} : memref<64x64xf32, #tpu.memory_space<vmem>>, vector<8x32xf32>,
    %86 = arith.index_cast %15 : i32 to index
    %c32_34 = arith.constant 32 : index
    %87 = vector.load %arg11[%86, %c32_34] : memref<64x64xf32, #tpu.memory_space<vmem>>, vector<8x32xf32>
    tpu.vector_store %arg11[%86, %c32_34], %79 {strides = array<i32>} : memref<64x64xf32, #tpu.memory_space<vmem>>, vector<8x32xf32>,
    %c1_i32 = arith.constant 1 : i32
    %c8_i32_35 = arith.constant 8 : i32
    %88 = arith.muli %c1_i32, %c8_i32_35 : i32
    %89 = tpu.assume_multiple %88, 8 : i32
    %c7_i32_36 = arith.constant 7 : i32
    %90 = arith.subi %c7_i32_36, %c1_i32 : i32
    %c8_i32_37 = arith.constant 8 : i32
    %91 = arith.muli %90, %c8_i32_37 : i32
    %92 = tpu.assume_multiple %91, 8 : i32
    %c0_38 = arith.constant 0 : index
    %c0_39 = arith.constant 0 : index
    %93 = vector.load %arg9[%c0_38, %c0_39] : memref<8x64xf32, #tpu.memory_space<vmem>>, vector<8x64xf32>
    %94 = arith.truncf %93 : vector<8x64xf32> to vector<8x64xbf16>
    %c0_40 = arith.constant 0 : index
    %c0_41 = arith.constant 0 : index
    %95 = vector.load %arg4[%c0_40, %c0_41] : memref<64x256xbf16, #tpu.memory_space<vmem>>, vector<64x256xbf16>
    %cst_42 = arith.constant dense<0.000000e+00> : vector<8x256xf32>
    %96 = tpu.matmul %94, %95, %cst_42 {dimension_numbers = #tpu.dot_dimension_numbers<[1], [0], [0], [1], [0, 0, 1, 1], [], []>} : vector<8x64xbf16>, vector<64x256xbf16>, vector<8x256xf32> -> vector<8x256xf32>
    %97 = arith.index_cast %89 : i32 to index
    %c0_43 = arith.constant 0 : index
    %98 = vector.load %arg8[%97, %c0_43] : memref<64x256xf32, #tpu.memory_space<vmem>>, vector<8x128xf32>
    %99 = vector.extract_strided_slice %96 {offsets = [0, 0], sizes = [8, 128], strides = [1, 1]} : vector<8x256xf32> to vector<8x128xf32>
    %100 = arith.addf %98, %99 : vector<8x128xf32>
    %101 = arith.index_cast %92 : i32 to index
    %c128_44 = arith.constant 128 : index
    %102 = vector.load %arg8[%101, %c128_44] : memref<64x256xf32, #tpu.memory_space<vmem>>, vector<8x128xf32>
    %103 = vector.extract_strided_slice %96 {offsets = [0, 128], sizes = [8, 128], strides = [1, 1]} : vector<8x256xf32> to vector<8x128xf32>
    %104 = arith.addf %102, %103 : vector<8x128xf32>
    %c0_45 = arith.constant 0 : index
    %c0_46 = arith.constant 0 : index
    %105 = vector.load %arg10[%c0_45, %c0_46] : memref<8x64xf32, #tpu.memory_space<vmem>>, vector<8x32xf32>
    %106 = vector.extract_strided_slice %100 {offsets = [0, 0], sizes = [8, 32], strides = [1, 1]} : vector<8x128xf32> to vector<8x32xf32>
    %107 = arith.negf %106 : vector<8x32xf32>
    %108 = math.exp %107 : vector<8x32xf32>
    %cst_47 = arith.constant 1.000000e+00 : f32
    %109 = vector.broadcast %cst_47 : f32 to vector<8x32xf32>
    %110 = arith.addf %109, %108 : vector<8x32xf32>
    %111 = arith.divf %109, %110 : vector<8x32xf32>
    %112 = vector.extract_strided_slice %100 {offsets = [0, 32], sizes = [8, 32], strides = [1, 1]} : vector<8x128xf32> to vector<8x32xf32>
    %113 = arith.negf %112 : vector<8x32xf32>
    %114 = math.exp %113 : vector<8x32xf32>
    %cst_48 = arith.constant 1.000000e+00 : f32
    %115 = vector.broadcast %cst_48 : f32 to vector<8x32xf32>
    %116 = arith.addf %115, %114 : vector<8x32xf32>
    %117 = arith.divf %115, %116 : vector<8x32xf32>
    %118 = vector.extract_strided_slice %100 {offsets = [0, 64], sizes = [8, 32], strides = [1, 1]} : vector<8x128xf32> to vector<8x32xf32>
    %119 = math.tanh %118 : vector<8x32xf32>
    %120 = vector.extract_strided_slice %100 {offsets = [0, 96], sizes = [8, 32], strides = [1, 1]} : vector<8x128xf32> to vector<8x32xf32>
    %121 = arith.negf %120 : vector<8x32xf32>
    %122 = math.exp %121 : vector<8x32xf32>
    %cst_49 = arith.constant 1.000000e+00 : f32
    %123 = vector.broadcast %cst_49 : f32 to vector<8x32xf32>
    %124 = arith.addf %123, %122 : vector<8x32xf32>
    %125 = arith.divf %123, %124 : vector<8x32xf32>
    %126 = arith.mulf %117, %105 : vector<8x32xf32>
    %127 = arith.mulf %111, %119 : vector<8x32xf32>
    %128 = arith.addf %126, %127 : vector<8x32xf32>
    %129 = math.tanh %128 : vector<8x32xf32>
    %130 = arith.mulf %125, %129 : vector<8x32xf32>
    %c0_50 = arith.constant 0 : index
    %c32_51 = arith.constant 32 : index
    %131 = vector.load %arg10[%c0_50, %c32_51] : memref<8x64xf32, #tpu.memory_space<vmem>>, vector<8x32xf32>
    %132 = vector.extract_strided_slice %104 {offsets = [0, 0], sizes = [8, 32], strides = [1, 1]} : vector<8x128xf32> to vector<8x32xf32>
    %133 = arith.negf %132 : vector<8x32xf32>
    %134 = math.exp %133 : vector<8x32xf32>
    %cst_52 = arith.constant 1.000000e+00 : f32
    %135 = vector.broadcast %cst_52 : f32 to vector<8x32xf32>
    %136 = arith.addf %135, %134 : vector<8x32xf32>
    %137 = arith.divf %135, %136 : vector<8x32xf32>
    %138 = vector.extract_strided_slice %104 {offsets = [0, 32], sizes = [8, 32], strides = [1, 1]} : vector<8x128xf32> to vector<8x32xf32>
    %139 = arith.negf %138 : vector<8x32xf32>
    %140 = math.exp %139 : vector<8x32xf32>
    %cst_53 = arith.constant 1.000000e+00 : f32
    %141 = vector.broadcast %cst_53 : f32 to vector<8x32xf32>
    %142 = arith.addf %141, %140 : vector<8x32xf32>
    %143 = arith.divf %141, %142 : vector<8x32xf32>
    %144 = vector.extract_strided_slice %104 {offsets = [0, 64], sizes = [8, 32], strides = [1, 1]} : vector<8x128xf32> to vector<8x32xf32>
    %145 = math.tanh %144 : vector<8x32xf32>
    %146 = vector.extract_strided_slice %104 {offsets = [0, 96], sizes = [8, 32], strides = [1, 1]} : vector<8x128xf32> to vector<8x32xf32>
    %147 = arith.negf %146 : vector<8x32xf32>
    %148 = math.exp %147 : vector<8x32xf32>
    %cst_54 = arith.constant 1.000000e+00 : f32
    %149 = vector.broadcast %cst_54 : f32 to vector<8x32xf32>
    %150 = arith.addf %149, %148 : vector<8x32xf32>
    %151 = arith.divf %149, %150 : vector<8x32xf32>
    %152 = arith.mulf %143, %131 : vector<8x32xf32>
    %153 = arith.mulf %137, %145 : vector<8x32xf32>
    %154 = arith.addf %152, %153 : vector<8x32xf32>
    %155 = math.tanh %154 : vector<8x32xf32>
    %156 = arith.mulf %151, %155 : vector<8x32xf32>
    %157 = tpu.concatenate %130, %156 in 1 : vector<8x32xf32>, vector<8x32xf32> -> vector<8x64xf32>
    %c0_55 = arith.constant 0 : index
    %c0_56 = arith.constant 0 : index
    %158 = vector.load %arg9[%c0_55, %c0_56] : memref<8x64xf32, #tpu.memory_space<vmem>>, vector<8x64xf32>
    tpu.vector_store %arg9[%c0_55, %c0_56], %157 {strides = array<i32>} : memref<8x64xf32, #tpu.memory_space<vmem>>, vector<8x64xf32>,
    %159 = tpu.concatenate %128, %154 in 1 : vector<8x32xf32>, vector<8x32xf32> -> vector<8x64xf32>
    %c0_57 = arith.constant 0 : index
    %c0_58 = arith.constant 0 : index
    %160 = vector.load %arg10[%c0_57, %c0_58] : memref<8x64xf32, #tpu.memory_space<vmem>>, vector<8x64xf32>
    tpu.vector_store %arg10[%c0_57, %c0_58], %159 {strides = array<i32>} : memref<8x64xf32, #tpu.memory_space<vmem>>, vector<8x64xf32>,
    %161 = arith.index_cast %89 : i32 to index
    %c0_59 = arith.constant 0 : index
    %162 = vector.load %arg11[%161, %c0_59] : memref<64x64xf32, #tpu.memory_space<vmem>>, vector<8x32xf32>
    tpu.vector_store %arg11[%161, %c0_59], %130 {strides = array<i32>} : memref<64x64xf32, #tpu.memory_space<vmem>>, vector<8x32xf32>,
    %163 = arith.index_cast %92 : i32 to index
    %c32_60 = arith.constant 32 : index
    %164 = vector.load %arg11[%163, %c32_60] : memref<64x64xf32, #tpu.memory_space<vmem>>, vector<8x32xf32>
    tpu.vector_store %arg11[%163, %c32_60], %156 {strides = array<i32>} : memref<64x64xf32, #tpu.memory_space<vmem>>, vector<8x32xf32>,
    %c2_i32 = arith.constant 2 : i32
    %c8_i32_61 = arith.constant 8 : i32
    %165 = arith.muli %c2_i32, %c8_i32_61 : i32
    %166 = tpu.assume_multiple %165, 8 : i32
    %c7_i32_62 = arith.constant 7 : i32
    %167 = arith.subi %c7_i32_62, %c2_i32 : i32
    %c8_i32_63 = arith.constant 8 : i32
    %168 = arith.muli %167, %c8_i32_63 : i32
    %169 = tpu.assume_multiple %168, 8 : i32
    %c0_64 = arith.constant 0 : index
    %c0_65 = arith.constant 0 : index
    %170 = vector.load %arg9[%c0_64, %c0_65] : memref<8x64xf32, #tpu.memory_space<vmem>>, vector<8x64xf32>
    %171 = arith.truncf %170 : vector<8x64xf32> to vector<8x64xbf16>
    %c0_66 = arith.constant 0 : index
    %c0_67 = arith.constant 0 : index
    %172 = vector.load %arg4[%c0_66, %c0_67] : memref<64x256xbf16, #tpu.memory_space<vmem>>, vector<64x256xbf16>
    %cst_68 = arith.constant dense<0.000000e+00> : vector<8x256xf32>
    %173 = tpu.matmul %171, %172, %cst_68 {dimension_numbers = #tpu.dot_dimension_numbers<[1], [0], [0], [1], [0, 0, 1, 1], [], []>} : vector<8x64xbf16>, vector<64x256xbf16>, vector<8x256xf32> -> vector<8x256xf32>
    %174 = arith.index_cast %166 : i32 to index
    %c0_69 = arith.constant 0 : index
    %175 = vector.load %arg8[%174, %c0_69] : memref<64x256xf32, #tpu.memory_space<vmem>>, vector<8x128xf32>
    %176 = vector.extract_strided_slice %173 {offsets = [0, 0], sizes = [8, 128], strides = [1, 1]} : vector<8x256xf32> to vector<8x128xf32>
    %177 = arith.addf %175, %176 : vector<8x128xf32>
    %178 = arith.index_cast %169 : i32 to index
    %c128_70 = arith.constant 128 : index
    %179 = vector.load %arg8[%178, %c128_70] : memref<64x256xf32, #tpu.memory_space<vmem>>, vector<8x128xf32>
    %180 = vector.extract_strided_slice %173 {offsets = [0, 128], sizes = [8, 128], strides = [1, 1]} : vector<8x256xf32> to vector<8x128xf32>
    %181 = arith.addf %179, %180 : vector<8x128xf32>
    %c0_71 = arith.constant 0 : index
    %c0_72 = arith.constant 0 : index
    %182 = vector.load %arg10[%c0_71, %c0_72] : memref<8x64xf32, #tpu.memory_space<vmem>>, vector<8x32xf32>
    %183 = vector.extract_strided_slice %177 {offsets = [0, 0], sizes = [8, 32], strides = [1, 1]} : vector<8x128xf32> to vector<8x32xf32>
    %184 = arith.negf %183 : vector<8x32xf32>
    %185 = math.exp %184 : vector<8x32xf32>
    %cst_73 = arith.constant 1.000000e+00 : f32
    %186 = vector.broadcast %cst_73 : f32 to vector<8x32xf32>
    %187 = arith.addf %186, %185 : vector<8x32xf32>
    %188 = arith.divf %186, %187 : vector<8x32xf32>
    %189 = vector.extract_strided_slice %177 {offsets = [0, 32], sizes = [8, 32], strides = [1, 1]} : vector<8x128xf32> to vector<8x32xf32>
    %190 = arith.negf %189 : vector<8x32xf32>
    %191 = math.exp %190 : vector<8x32xf32>
    %cst_74 = arith.constant 1.000000e+00 : f32
    %192 = vector.broadcast %cst_74 : f32 to vector<8x32xf32>
    %193 = arith.addf %192, %191 : vector<8x32xf32>
    %194 = arith.divf %192, %193 : vector<8x32xf32>
    %195 = vector.extract_strided_slice %177 {offsets = [0, 64], sizes = [8, 32], strides = [1, 1]} : vector<8x128xf32> to vector<8x32xf32>
    %196 = math.tanh %195 : vector<8x32xf32>
    %197 = vector.extract_strided_slice %177 {offsets = [0, 96], sizes = [8, 32], strides = [1, 1]} : vector<8x128xf32> to vector<8x32xf32>
    %198 = arith.negf %197 : vector<8x32xf32>
    %199 = math.exp %198 : vector<8x32xf32>
    %cst_75 = arith.constant 1.000000e+00 : f32
    %200 = vector.broadcast %cst_75 : f32 to vector<8x32xf32>
    %201 = arith.addf %200, %199 : vector<8x32xf32>
    %202 = arith.divf %200, %201 : vector<8x32xf32>
    %203 = arith.mulf %194, %182 : vector<8x32xf32>
    %204 = arith.mulf %188, %196 : vector<8x32xf32>
    %205 = arith.addf %203, %204 : vector<8x32xf32>
    %206 = math.tanh %205 : vector<8x32xf32>
    %207 = arith.mulf %202, %206 : vector<8x32xf32>
    %c0_76 = arith.constant 0 : index
    %c32_77 = arith.constant 32 : index
    %208 = vector.load %arg10[%c0_76, %c32_77] : memref<8x64xf32, #tpu.memory_space<vmem>>, vector<8x32xf32>
    %209 = vector.extract_strided_slice %181 {offsets = [0, 0], sizes = [8, 32], strides = [1, 1]} : vector<8x128xf32> to vector<8x32xf32>
    %210 = arith.negf %209 : vector<8x32xf32>
    %211 = math.exp %210 : vector<8x32xf32>
    %cst_78 = arith.constant 1.000000e+00 : f32
    %212 = vector.broadcast %cst_78 : f32 to vector<8x32xf32>
    %213 = arith.addf %212, %211 : vector<8x32xf32>
    %214 = arith.divf %212, %213 : vector<8x32xf32>
    %215 = vector.extract_strided_slice %181 {offsets = [0, 32], sizes = [8, 32], strides = [1, 1]} : vector<8x128xf32> to vector<8x32xf32>
    %216 = arith.negf %215 : vector<8x32xf32>
    %217 = math.exp %216 : vector<8x32xf32>
    %cst_79 = arith.constant 1.000000e+00 : f32
    %218 = vector.broadcast %cst_79 : f32 to vector<8x32xf32>
    %219 = arith.addf %218, %217 : vector<8x32xf32>
    %220 = arith.divf %218, %219 : vector<8x32xf32>
    %221 = vector.extract_strided_slice %181 {offsets = [0, 64], sizes = [8, 32], strides = [1, 1]} : vector<8x128xf32> to vector<8x32xf32>
    %222 = math.tanh %221 : vector<8x32xf32>
    %223 = vector.extract_strided_slice %181 {offsets = [0, 96], sizes = [8, 32], strides = [1, 1]} : vector<8x128xf32> to vector<8x32xf32>
    %224 = arith.negf %223 : vector<8x32xf32>
    %225 = math.exp %224 : vector<8x32xf32>
    %cst_80 = arith.constant 1.000000e+00 : f32
    %226 = vector.broadcast %cst_80 : f32 to vector<8x32xf32>
    %227 = arith.addf %226, %225 : vector<8x32xf32>
    %228 = arith.divf %226, %227 : vector<8x32xf32>
    %229 = arith.mulf %220, %208 : vector<8x32xf32>
    %230 = arith.mulf %214, %222 : vector<8x32xf32>
    %231 = arith.addf %229, %230 : vector<8x32xf32>
    %232 = math.tanh %231 : vector<8x32xf32>
    %233 = arith.mulf %228, %232 : vector<8x32xf32>
    %234 = tpu.concatenate %207, %233 in 1 : vector<8x32xf32>, vector<8x32xf32> -> vector<8x64xf32>
    %c0_81 = arith.constant 0 : index
    %c0_82 = arith.constant 0 : index
    %235 = vector.load %arg9[%c0_81, %c0_82] : memref<8x64xf32, #tpu.memory_space<vmem>>, vector<8x64xf32>
    tpu.vector_store %arg9[%c0_81, %c0_82], %234 {strides = array<i32>} : memref<8x64xf32, #tpu.memory_space<vmem>>, vector<8x64xf32>,
    %236 = tpu.concatenate %205, %231 in 1 : vector<8x32xf32>, vector<8x32xf32> -> vector<8x64xf32>
    %c0_83 = arith.constant 0 : index
    %c0_84 = arith.constant 0 : index
    %237 = vector.load %arg10[%c0_83, %c0_84] : memref<8x64xf32, #tpu.memory_space<vmem>>, vector<8x64xf32>
    tpu.vector_store %arg10[%c0_83, %c0_84], %236 {strides = array<i32>} : memref<8x64xf32, #tpu.memory_space<vmem>>, vector<8x64xf32>,
    %238 = arith.index_cast %166 : i32 to index
    %c0_85 = arith.constant 0 : index
    %239 = vector.load %arg11[%238, %c0_85] : memref<64x64xf32, #tpu.memory_space<vmem>>, vector<8x32xf32>
    tpu.vector_store %arg11[%238, %c0_85], %207 {strides = array<i32>} : memref<64x64xf32, #tpu.memory_space<vmem>>, vector<8x32xf32>,
    %240 = arith.index_cast %169 : i32 to index
    %c32_86 = arith.constant 32 : index
    %241 = vector.load %arg11[%240, %c32_86] : memref<64x64xf32, #tpu.memory_space<vmem>>, vector<8x32xf32>
    tpu.vector_store %arg11[%240, %c32_86], %233 {strides = array<i32>} : memref<64x64xf32, #tpu.memory_space<vmem>>, vector<8x32xf32>,
    %c3_i32 = arith.constant 3 : i32
    %c8_i32_87 = arith.constant 8 : i32
    %242 = arith.muli %c3_i32, %c8_i32_87 : i32
    %243 = tpu.assume_multiple %242, 8 : i32
    %c7_i32_88 = arith.constant 7 : i32
    %244 = arith.subi %c7_i32_88, %c3_i32 : i32
    %c8_i32_89 = arith.constant 8 : i32
    %245 = arith.muli %244, %c8_i32_89 : i32
    %246 = tpu.assume_multiple %245, 8 : i32
    %c0_90 = arith.constant 0 : index
    %c0_91 = arith.constant 0 : index
    %247 = vector.load %arg9[%c0_90, %c0_91] : memref<8x64xf32, #tpu.memory_space<vmem>>, vector<8x64xf32>
    %248 = arith.truncf %247 : vector<8x64xf32> to vector<8x64xbf16>
    %c0_92 = arith.constant 0 : index
    %c0_93 = arith.constant 0 : index
    %249 = vector.load %arg4[%c0_92, %c0_93] : memref<64x256xbf16, #tpu.memory_space<vmem>>, vector<64x256xbf16>
    %cst_94 = arith.constant dense<0.000000e+00> : vector<8x256xf32>
    %250 = tpu.matmul %248, %249, %cst_94 {dimension_numbers = #tpu.dot_dimension_numbers<[1], [0], [0], [1], [0, 0, 1, 1], [], []>} : vector<8x64xbf16>, vector<64x256xbf16>, vector<8x256xf32> -> vector<8x256xf32>
    %251 = arith.index_cast %243 : i32 to index
    %c0_95 = arith.constant 0 : index
    %252 = vector.load %arg8[%251, %c0_95] : memref<64x256xf32, #tpu.memory_space<vmem>>, vector<8x128xf32>
    %253 = vector.extract_strided_slice %250 {offsets = [0, 0], sizes = [8, 128], strides = [1, 1]} : vector<8x256xf32> to vector<8x128xf32>
    %254 = arith.addf %252, %253 : vector<8x128xf32>
    %255 = arith.index_cast %246 : i32 to index
    %c128_96 = arith.constant 128 : index
    %256 = vector.load %arg8[%255, %c128_96] : memref<64x256xf32, #tpu.memory_space<vmem>>, vector<8x128xf32>
    %257 = vector.extract_strided_slice %250 {offsets = [0, 128], sizes = [8, 128], strides = [1, 1]} : vector<8x256xf32> to vector<8x128xf32>
    %258 = arith.addf %256, %257 : vector<8x128xf32>
    %c0_97 = arith.constant 0 : index
    %c0_98 = arith.constant 0 : index
    %259 = vector.load %arg10[%c0_97, %c0_98] : memref<8x64xf32, #tpu.memory_space<vmem>>, vector<8x32xf32>
    %260 = vector.extract_strided_slice %254 {offsets = [0, 0], sizes = [8, 32], strides = [1, 1]} : vector<8x128xf32> to vector<8x32xf32>
    %261 = arith.negf %260 : vector<8x32xf32>
    %262 = math.exp %261 : vector<8x32xf32>
    %cst_99 = arith.constant 1.000000e+00 : f32
    %263 = vector.broadcast %cst_99 : f32 to vector<8x32xf32>
    %264 = arith.addf %263, %262 : vector<8x32xf32>
    %265 = arith.divf %263, %264 : vector<8x32xf32>
    %266 = vector.extract_strided_slice %254 {offsets = [0, 32], sizes = [8, 32], strides = [1, 1]} : vector<8x128xf32> to vector<8x32xf32>
    %267 = arith.negf %266 : vector<8x32xf32>
    %268 = math.exp %267 : vector<8x32xf32>
    %cst_100 = arith.constant 1.000000e+00 : f32
    %269 = vector.broadcast %cst_100 : f32 to vector<8x32xf32>
    %270 = arith.addf %269, %268 : vector<8x32xf32>
    %271 = arith.divf %269, %270 : vector<8x32xf32>
    %272 = vector.extract_strided_slice %254 {offsets = [0, 64], sizes = [8, 32], strides = [1, 1]} : vector<8x128xf32> to vector<8x32xf32>
    %273 = math.tanh %272 : vector<8x32xf32>
    %274 = vector.extract_strided_slice %254 {offsets = [0, 96], sizes = [8, 32], strides = [1, 1]} : vector<8x128xf32> to vector<8x32xf32>
    %275 = arith.negf %274 : vector<8x32xf32>
    %276 = math.exp %275 : vector<8x32xf32>
    %cst_101 = arith.constant 1.000000e+00 : f32
    %277 = vector.broadcast %cst_101 : f32 to vector<8x32xf32>
    %278 = arith.addf %277, %276 : vector<8x32xf32>
    %279 = arith.divf %277, %278 : vector<8x32xf32>
    %280 = arith.mulf %271, %259 : vector<8x32xf32>
    %281 = arith.mulf %265, %273 : vector<8x32xf32>
    %282 = arith.addf %280, %281 : vector<8x32xf32>
    %283 = math.tanh %282 : vector<8x32xf32>
    %284 = arith.mulf %279, %283 : vector<8x32xf32>
    %c0_102 = arith.constant 0 : index
    %c32_103 = arith.constant 32 : index
    %285 = vector.load %arg10[%c0_102, %c32_103] : memref<8x64xf32, #tpu.memory_space<vmem>>, vector<8x32xf32>
    %286 = vector.extract_strided_slice %258 {offsets = [0, 0], sizes = [8, 32], strides = [1, 1]} : vector<8x128xf32> to vector<8x32xf32>
    %287 = arith.negf %286 : vector<8x32xf32>
    %288 = math.exp %287 : vector<8x32xf32>
    %cst_104 = arith.constant 1.000000e+00 : f32
    %289 = vector.broadcast %cst_104 : f32 to vector<8x32xf32>
    %290 = arith.addf %289, %288 : vector<8x32xf32>
    %291 = arith.divf %289, %290 : vector<8x32xf32>
    %292 = vector.extract_strided_slice %258 {offsets = [0, 32], sizes = [8, 32], strides = [1, 1]} : vector<8x128xf32> to vector<8x32xf32>
    %293 = arith.negf %292 : vector<8x32xf32>
    %294 = math.exp %293 : vector<8x32xf32>
    %cst_105 = arith.constant 1.000000e+00 : f32
    %295 = vector.broadcast %cst_105 : f32 to vector<8x32xf32>
    %296 = arith.addf %295, %294 : vector<8x32xf32>
    %297 = arith.divf %295, %296 : vector<8x32xf32>
    %298 = vector.extract_strided_slice %258 {offsets = [0, 64], sizes = [8, 32], strides = [1, 1]} : vector<8x128xf32> to vector<8x32xf32>
    %299 = math.tanh %298 : vector<8x32xf32>
    %300 = vector.extract_strided_slice %258 {offsets = [0, 96], sizes = [8, 32], strides = [1, 1]} : vector<8x128xf32> to vector<8x32xf32>
    %301 = arith.negf %300 : vector<8x32xf32>
    %302 = math.exp %301 : vector<8x32xf32>
    %cst_106 = arith.constant 1.000000e+00 : f32
    %303 = vector.broadcast %cst_106 : f32 to vector<8x32xf32>
    %304 = arith.addf %303, %302 : vector<8x32xf32>
    %305 = arith.divf %303, %304 : vector<8x32xf32>
    %306 = arith.mulf %297, %285 : vector<8x32xf32>
    %307 = arith.mulf %291, %299 : vector<8x32xf32>
    %308 = arith.addf %306, %307 : vector<8x32xf32>
    %309 = math.tanh %308 : vector<8x32xf32>
    %310 = arith.mulf %305, %309 : vector<8x32xf32>
    %311 = tpu.concatenate %284, %310 in 1 : vector<8x32xf32>, vector<8x32xf32> -> vector<8x64xf32>
    %c0_107 = arith.constant 0 : index
    %c0_108 = arith.constant 0 : index
    %312 = vector.load %arg9[%c0_107, %c0_108] : memref<8x64xf32, #tpu.memory_space<vmem>>, vector<8x64xf32>
    tpu.vector_store %arg9[%c0_107, %c0_108], %311 {strides = array<i32>} : memref<8x64xf32, #tpu.memory_space<vmem>>, vector<8x64xf32>,
    %313 = tpu.concatenate %282, %308 in 1 : vector<8x32xf32>, vector<8x32xf32> -> vector<8x64xf32>
    %c0_109 = arith.constant 0 : index
    %c0_110 = arith.constant 0 : index
    %314 = vector.load %arg10[%c0_109, %c0_110] : memref<8x64xf32, #tpu.memory_space<vmem>>, vector<8x64xf32>
    tpu.vector_store %arg10[%c0_109, %c0_110], %313 {strides = array<i32>} : memref<8x64xf32, #tpu.memory_space<vmem>>, vector<8x64xf32>,
    %315 = arith.index_cast %243 : i32 to index
    %c0_111 = arith.constant 0 : index
    %316 = vector.load %arg11[%315, %c0_111] : memref<64x64xf32, #tpu.memory_space<vmem>>, vector<8x32xf32>
    tpu.vector_store %arg11[%315, %c0_111], %284 {strides = array<i32>} : memref<64x64xf32, #tpu.memory_space<vmem>>, vector<8x32xf32>,
    %317 = arith.index_cast %246 : i32 to index
    %c32_112 = arith.constant 32 : index
    %318 = vector.load %arg11[%317, %c32_112] : memref<64x64xf32, #tpu.memory_space<vmem>>, vector<8x32xf32>
    tpu.vector_store %arg11[%317, %c32_112], %310 {strides = array<i32>} : memref<64x64xf32, #tpu.memory_space<vmem>>, vector<8x32xf32>,
    %c4_i32 = arith.constant 4 : i32
    %c8_i32_113 = arith.constant 8 : i32
    %319 = arith.muli %c4_i32, %c8_i32_113 : i32
    %320 = tpu.assume_multiple %319, 8 : i32
    %c7_i32_114 = arith.constant 7 : i32
    %321 = arith.subi %c7_i32_114, %c4_i32 : i32
    %c8_i32_115 = arith.constant 8 : i32
    %322 = arith.muli %321, %c8_i32_115 : i32
    %323 = tpu.assume_multiple %322, 8 : i32
    %c0_116 = arith.constant 0 : index
    %c0_117 = arith.constant 0 : index
    %324 = vector.load %arg9[%c0_116, %c0_117] : memref<8x64xf32, #tpu.memory_space<vmem>>, vector<8x64xf32>
    %325 = arith.truncf %324 : vector<8x64xf32> to vector<8x64xbf16>
    %c0_118 = arith.constant 0 : index
    %c0_119 = arith.constant 0 : index
    %326 = vector.load %arg4[%c0_118, %c0_119] : memref<64x256xbf16, #tpu.memory_space<vmem>>, vector<64x256xbf16>
    %cst_120 = arith.constant dense<0.000000e+00> : vector<8x256xf32>
    %327 = tpu.matmul %325, %326, %cst_120 {dimension_numbers = #tpu.dot_dimension_numbers<[1], [0], [0], [1], [0, 0, 1, 1], [], []>} : vector<8x64xbf16>, vector<64x256xbf16>, vector<8x256xf32> -> vector<8x256xf32>
    %328 = arith.index_cast %320 : i32 to index
    %c0_121 = arith.constant 0 : index
    %329 = vector.load %arg8[%328, %c0_121] : memref<64x256xf32, #tpu.memory_space<vmem>>, vector<8x128xf32>
    %330 = vector.extract_strided_slice %327 {offsets = [0, 0], sizes = [8, 128], strides = [1, 1]} : vector<8x256xf32> to vector<8x128xf32>
    %331 = arith.addf %329, %330 : vector<8x128xf32>
    %332 = arith.index_cast %323 : i32 to index
    %c128_122 = arith.constant 128 : index
    %333 = vector.load %arg8[%332, %c128_122] : memref<64x256xf32, #tpu.memory_space<vmem>>, vector<8x128xf32>
    %334 = vector.extract_strided_slice %327 {offsets = [0, 128], sizes = [8, 128], strides = [1, 1]} : vector<8x256xf32> to vector<8x128xf32>
    %335 = arith.addf %333, %334 : vector<8x128xf32>
    %c0_123 = arith.constant 0 : index
    %c0_124 = arith.constant 0 : index
    %336 = vector.load %arg10[%c0_123, %c0_124] : memref<8x64xf32, #tpu.memory_space<vmem>>, vector<8x32xf32>
    %337 = vector.extract_strided_slice %331 {offsets = [0, 0], sizes = [8, 32], strides = [1, 1]} : vector<8x128xf32> to vector<8x32xf32>
    %338 = arith.negf %337 : vector<8x32xf32>
    %339 = math.exp %338 : vector<8x32xf32>
    %cst_125 = arith.constant 1.000000e+00 : f32
    %340 = vector.broadcast %cst_125 : f32 to vector<8x32xf32>
    %341 = arith.addf %340, %339 : vector<8x32xf32>
    %342 = arith.divf %340, %341 : vector<8x32xf32>
    %343 = vector.extract_strided_slice %331 {offsets = [0, 32], sizes = [8, 32], strides = [1, 1]} : vector<8x128xf32> to vector<8x32xf32>
    %344 = arith.negf %343 : vector<8x32xf32>
    %345 = math.exp %344 : vector<8x32xf32>
    %cst_126 = arith.constant 1.000000e+00 : f32
    %346 = vector.broadcast %cst_126 : f32 to vector<8x32xf32>
    %347 = arith.addf %346, %345 : vector<8x32xf32>
    %348 = arith.divf %346, %347 : vector<8x32xf32>
    %349 = vector.extract_strided_slice %331 {offsets = [0, 64], sizes = [8, 32], strides = [1, 1]} : vector<8x128xf32> to vector<8x32xf32>
    %350 = math.tanh %349 : vector<8x32xf32>
    %351 = vector.extract_strided_slice %331 {offsets = [0, 96], sizes = [8, 32], strides = [1, 1]} : vector<8x128xf32> to vector<8x32xf32>
    %352 = arith.negf %351 : vector<8x32xf32>
    %353 = math.exp %352 : vector<8x32xf32>
    %cst_127 = arith.constant 1.000000e+00 : f32
    %354 = vector.broadcast %cst_127 : f32 to vector<8x32xf32>
    %355 = arith.addf %354, %353 : vector<8x32xf32>
    %356 = arith.divf %354, %355 : vector<8x32xf32>
    %357 = arith.mulf %348, %336 : vector<8x32xf32>
    %358 = arith.mulf %342, %350 : vector<8x32xf32>
    %359 = arith.addf %357, %358 : vector<8x32xf32>
    %360 = math.tanh %359 : vector<8x32xf32>
    %361 = arith.mulf %356, %360 : vector<8x32xf32>
    %c0_128 = arith.constant 0 : index
    %c32_129 = arith.constant 32 : index
    %362 = vector.load %arg10[%c0_128, %c32_129] : memref<8x64xf32, #tpu.memory_space<vmem>>, vector<8x32xf32>
    %363 = vector.extract_strided_slice %335 {offsets = [0, 0], sizes = [8, 32], strides = [1, 1]} : vector<8x128xf32> to vector<8x32xf32>
    %364 = arith.negf %363 : vector<8x32xf32>
    %365 = math.exp %364 : vector<8x32xf32>
    %cst_130 = arith.constant 1.000000e+00 : f32
    %366 = vector.broadcast %cst_130 : f32 to vector<8x32xf32>
    %367 = arith.addf %366, %365 : vector<8x32xf32>
    %368 = arith.divf %366, %367 : vector<8x32xf32>
    %369 = vector.extract_strided_slice %335 {offsets = [0, 32], sizes = [8, 32], strides = [1, 1]} : vector<8x128xf32> to vector<8x32xf32>
    %370 = arith.negf %369 : vector<8x32xf32>
    %371 = math.exp %370 : vector<8x32xf32>
    %cst_131 = arith.constant 1.000000e+00 : f32
    %372 = vector.broadcast %cst_131 : f32 to vector<8x32xf32>
    %373 = arith.addf %372, %371 : vector<8x32xf32>
    %374 = arith.divf %372, %373 : vector<8x32xf32>
    %375 = vector.extract_strided_slice %335 {offsets = [0, 64], sizes = [8, 32], strides = [1, 1]} : vector<8x128xf32> to vector<8x32xf32>
    %376 = math.tanh %375 : vector<8x32xf32>
    %377 = vector.extract_strided_slice %335 {offsets = [0, 96], sizes = [8, 32], strides = [1, 1]} : vector<8x128xf32> to vector<8x32xf32>
    %378 = arith.negf %377 : vector<8x32xf32>
    %379 = math.exp %378 : vector<8x32xf32>
    %cst_132 = arith.constant 1.000000e+00 : f32
    %380 = vector.broadcast %cst_132 : f32 to vector<8x32xf32>
    %381 = arith.addf %380, %379 : vector<8x32xf32>
    %382 = arith.divf %380, %381 : vector<8x32xf32>
    %383 = arith.mulf %374, %362 : vector<8x32xf32>
    %384 = arith.mulf %368, %376 : vector<8x32xf32>
    %385 = arith.addf %383, %384 : vector<8x32xf32>
    %386 = math.tanh %385 : vector<8x32xf32>
    %387 = arith.mulf %382, %386 : vector<8x32xf32>
    %388 = tpu.concatenate %361, %387 in 1 : vector<8x32xf32>, vector<8x32xf32> -> vector<8x64xf32>
    %c0_133 = arith.constant 0 : index
    %c0_134 = arith.constant 0 : index
    %389 = vector.load %arg9[%c0_133, %c0_134] : memref<8x64xf32, #tpu.memory_space<vmem>>, vector<8x64xf32>
    tpu.vector_store %arg9[%c0_133, %c0_134], %388 {strides = array<i32>} : memref<8x64xf32, #tpu.memory_space<vmem>>, vector<8x64xf32>,
    %390 = tpu.concatenate %359, %385 in 1 : vector<8x32xf32>, vector<8x32xf32> -> vector<8x64xf32>
    %c0_135 = arith.constant 0 : index
    %c0_136 = arith.constant 0 : index
    %391 = vector.load %arg10[%c0_135, %c0_136] : memref<8x64xf32, #tpu.memory_space<vmem>>, vector<8x64xf32>
    tpu.vector_store %arg10[%c0_135, %c0_136], %390 {strides = array<i32>} : memref<8x64xf32, #tpu.memory_space<vmem>>, vector<8x64xf32>,
    %392 = arith.index_cast %320 : i32 to index
    %c0_137 = arith.constant 0 : index
    %393 = vector.load %arg11[%392, %c0_137] : memref<64x64xf32, #tpu.memory_space<vmem>>, vector<8x32xf32>
    tpu.vector_store %arg11[%392, %c0_137], %361 {strides = array<i32>} : memref<64x64xf32, #tpu.memory_space<vmem>>, vector<8x32xf32>,
    %394 = arith.index_cast %323 : i32 to index
    %c32_138 = arith.constant 32 : index
    %395 = vector.load %arg11[%394, %c32_138] : memref<64x64xf32, #tpu.memory_space<vmem>>, vector<8x32xf32>
    tpu.vector_store %arg11[%394, %c32_138], %387 {strides = array<i32>} : memref<64x64xf32, #tpu.memory_space<vmem>>, vector<8x32xf32>,
    %c5_i32 = arith.constant 5 : i32
    %c8_i32_139 = arith.constant 8 : i32
    %396 = arith.muli %c5_i32, %c8_i32_139 : i32
    %397 = tpu.assume_multiple %396, 8 : i32
    %c7_i32_140 = arith.constant 7 : i32
    %398 = arith.subi %c7_i32_140, %c5_i32 : i32
    %c8_i32_141 = arith.constant 8 : i32
    %399 = arith.muli %398, %c8_i32_141 : i32
    %400 = tpu.assume_multiple %399, 8 : i32
    %c0_142 = arith.constant 0 : index
    %c0_143 = arith.constant 0 : index
    %401 = vector.load %arg9[%c0_142, %c0_143] : memref<8x64xf32, #tpu.memory_space<vmem>>, vector<8x64xf32>
    %402 = arith.truncf %401 : vector<8x64xf32> to vector<8x64xbf16>
    %c0_144 = arith.constant 0 : index
    %c0_145 = arith.constant 0 : index
    %403 = vector.load %arg4[%c0_144, %c0_145] : memref<64x256xbf16, #tpu.memory_space<vmem>>, vector<64x256xbf16>
    %cst_146 = arith.constant dense<0.000000e+00> : vector<8x256xf32>
    %404 = tpu.matmul %402, %403, %cst_146 {dimension_numbers = #tpu.dot_dimension_numbers<[1], [0], [0], [1], [0, 0, 1, 1], [], []>} : vector<8x64xbf16>, vector<64x256xbf16>, vector<8x256xf32> -> vector<8x256xf32>
    %405 = arith.index_cast %397 : i32 to index
    %c0_147 = arith.constant 0 : index
    %406 = vector.load %arg8[%405, %c0_147] : memref<64x256xf32, #tpu.memory_space<vmem>>, vector<8x128xf32>
    %407 = vector.extract_strided_slice %404 {offsets = [0, 0], sizes = [8, 128], strides = [1, 1]} : vector<8x256xf32> to vector<8x128xf32>
    %408 = arith.addf %406, %407 : vector<8x128xf32>
    %409 = arith.index_cast %400 : i32 to index
    %c128_148 = arith.constant 128 : index
    %410 = vector.load %arg8[%409, %c128_148] : memref<64x256xf32, #tpu.memory_space<vmem>>, vector<8x128xf32>
    %411 = vector.extract_strided_slice %404 {offsets = [0, 128], sizes = [8, 128], strides = [1, 1]} : vector<8x256xf32> to vector<8x128xf32>
    %412 = arith.addf %410, %411 : vector<8x128xf32>
    %c0_149 = arith.constant 0 : index
    %c0_150 = arith.constant 0 : index
    %413 = vector.load %arg10[%c0_149, %c0_150] : memref<8x64xf32, #tpu.memory_space<vmem>>, vector<8x32xf32>
    %414 = vector.extract_strided_slice %408 {offsets = [0, 0], sizes = [8, 32], strides = [1, 1]} : vector<8x128xf32> to vector<8x32xf32>
    %415 = arith.negf %414 : vector<8x32xf32>
    %416 = math.exp %415 : vector<8x32xf32>
    %cst_151 = arith.constant 1.000000e+00 : f32
    %417 = vector.broadcast %cst_151 : f32 to vector<8x32xf32>
    %418 = arith.addf %417, %416 : vector<8x32xf32>
    %419 = arith.divf %417, %418 : vector<8x32xf32>
    %420 = vector.extract_strided_slice %408 {offsets = [0, 32], sizes = [8, 32], strides = [1, 1]} : vector<8x128xf32> to vector<8x32xf32>
    %421 = arith.negf %420 : vector<8x32xf32>
    %422 = math.exp %421 : vector<8x32xf32>
    %cst_152 = arith.constant 1.000000e+00 : f32
    %423 = vector.broadcast %cst_152 : f32 to vector<8x32xf32>
    %424 = arith.addf %423, %422 : vector<8x32xf32>
    %425 = arith.divf %423, %424 : vector<8x32xf32>
    %426 = vector.extract_strided_slice %408 {offsets = [0, 64], sizes = [8, 32], strides = [1, 1]} : vector<8x128xf32> to vector<8x32xf32>
    %427 = math.tanh %426 : vector<8x32xf32>
    %428 = vector.extract_strided_slice %408 {offsets = [0, 96], sizes = [8, 32], strides = [1, 1]} : vector<8x128xf32> to vector<8x32xf32>
    %429 = arith.negf %428 : vector<8x32xf32>
    %430 = math.exp %429 : vector<8x32xf32>
    %cst_153 = arith.constant 1.000000e+00 : f32
    %431 = vector.broadcast %cst_153 : f32 to vector<8x32xf32>
    %432 = arith.addf %431, %430 : vector<8x32xf32>
    %433 = arith.divf %431, %432 : vector<8x32xf32>
    %434 = arith.mulf %425, %413 : vector<8x32xf32>
    %435 = arith.mulf %419, %427 : vector<8x32xf32>
    %436 = arith.addf %434, %435 : vector<8x32xf32>
    %437 = math.tanh %436 : vector<8x32xf32>
    %438 = arith.mulf %433, %437 : vector<8x32xf32>
    %c0_154 = arith.constant 0 : index
    %c32_155 = arith.constant 32 : index
    %439 = vector.load %arg10[%c0_154, %c32_155] : memref<8x64xf32, #tpu.memory_space<vmem>>, vector<8x32xf32>
    %440 = vector.extract_strided_slice %412 {offsets = [0, 0], sizes = [8, 32], strides = [1, 1]} : vector<8x128xf32> to vector<8x32xf32>
    %441 = arith.negf %440 : vector<8x32xf32>
    %442 = math.exp %441 : vector<8x32xf32>
    %cst_156 = arith.constant 1.000000e+00 : f32
    %443 = vector.broadcast %cst_156 : f32 to vector<8x32xf32>
    %444 = arith.addf %443, %442 : vector<8x32xf32>
    %445 = arith.divf %443, %444 : vector<8x32xf32>
    %446 = vector.extract_strided_slice %412 {offsets = [0, 32], sizes = [8, 32], strides = [1, 1]} : vector<8x128xf32> to vector<8x32xf32>
    %447 = arith.negf %446 : vector<8x32xf32>
    %448 = math.exp %447 : vector<8x32xf32>
    %cst_157 = arith.constant 1.000000e+00 : f32
    %449 = vector.broadcast %cst_157 : f32 to vector<8x32xf32>
    %450 = arith.addf %449, %448 : vector<8x32xf32>
    %451 = arith.divf %449, %450 : vector<8x32xf32>
    %452 = vector.extract_strided_slice %412 {offsets = [0, 64], sizes = [8, 32], strides = [1, 1]} : vector<8x128xf32> to vector<8x32xf32>
    %453 = math.tanh %452 : vector<8x32xf32>
    %454 = vector.extract_strided_slice %412 {offsets = [0, 96], sizes = [8, 32], strides = [1, 1]} : vector<8x128xf32> to vector<8x32xf32>
    %455 = arith.negf %454 : vector<8x32xf32>
    %456 = math.exp %455 : vector<8x32xf32>
    %cst_158 = arith.constant 1.000000e+00 : f32
    %457 = vector.broadcast %cst_158 : f32 to vector<8x32xf32>
    %458 = arith.addf %457, %456 : vector<8x32xf32>
    %459 = arith.divf %457, %458 : vector<8x32xf32>
    %460 = arith.mulf %451, %439 : vector<8x32xf32>
    %461 = arith.mulf %445, %453 : vector<8x32xf32>
    %462 = arith.addf %460, %461 : vector<8x32xf32>
    %463 = math.tanh %462 : vector<8x32xf32>
    %464 = arith.mulf %459, %463 : vector<8x32xf32>
    %465 = tpu.concatenate %438, %464 in 1 : vector<8x32xf32>, vector<8x32xf32> -> vector<8x64xf32>
    %c0_159 = arith.constant 0 : index
    %c0_160 = arith.constant 0 : index
    %466 = vector.load %arg9[%c0_159, %c0_160] : memref<8x64xf32, #tpu.memory_space<vmem>>, vector<8x64xf32>
    tpu.vector_store %arg9[%c0_159, %c0_160], %465 {strides = array<i32>} : memref<8x64xf32, #tpu.memory_space<vmem>>, vector<8x64xf32>,
    %467 = tpu.concatenate %436, %462 in 1 : vector<8x32xf32>, vector<8x32xf32> -> vector<8x64xf32>
    %c0_161 = arith.constant 0 : index
    %c0_162 = arith.constant 0 : index
    %468 = vector.load %arg10[%c0_161, %c0_162] : memref<8x64xf32, #tpu.memory_space<vmem>>, vector<8x64xf32>
    tpu.vector_store %arg10[%c0_161, %c0_162], %467 {strides = array<i32>} : memref<8x64xf32, #tpu.memory_space<vmem>>, vector<8x64xf32>,
    %469 = arith.index_cast %397 : i32 to index
    %c0_163 = arith.constant 0 : index
    %470 = vector.load %arg11[%469, %c0_163] : memref<64x64xf32, #tpu.memory_space<vmem>>, vector<8x32xf32>
    tpu.vector_store %arg11[%469, %c0_163], %438 {strides = array<i32>} : memref<64x64xf32, #tpu.memory_space<vmem>>, vector<8x32xf32>,
    %471 = arith.index_cast %400 : i32 to index
    %c32_164 = arith.constant 32 : index
    %472 = vector.load %arg11[%471, %c32_164] : memref<64x64xf32, #tpu.memory_space<vmem>>, vector<8x32xf32>
    tpu.vector_store %arg11[%471, %c32_164], %464 {strides = array<i32>} : memref<64x64xf32, #tpu.memory_space<vmem>>, vector<8x32xf32>,
    %c6_i32 = arith.constant 6 : i32
    %c8_i32_165 = arith.constant 8 : i32
    %473 = arith.muli %c6_i32, %c8_i32_165 : i32
    %474 = tpu.assume_multiple %473, 8 : i32
    %c7_i32_166 = arith.constant 7 : i32
    %475 = arith.subi %c7_i32_166, %c6_i32 : i32
    %c8_i32_167 = arith.constant 8 : i32
    %476 = arith.muli %475, %c8_i32_167 : i32
    %477 = tpu.assume_multiple %476, 8 : i32
    %c0_168 = arith.constant 0 : index
    %c0_169 = arith.constant 0 : index
    %478 = vector.load %arg9[%c0_168, %c0_169] : memref<8x64xf32, #tpu.memory_space<vmem>>, vector<8x64xf32>
    %479 = arith.truncf %478 : vector<8x64xf32> to vector<8x64xbf16>
    %c0_170 = arith.constant 0 : index
    %c0_171 = arith.constant 0 : index
    %480 = vector.load %arg4[%c0_170, %c0_171] : memref<64x256xbf16, #tpu.memory_space<vmem>>, vector<64x256xbf16>
    %cst_172 = arith.constant dense<0.000000e+00> : vector<8x256xf32>
    %481 = tpu.matmul %479, %480, %cst_172 {dimension_numbers = #tpu.dot_dimension_numbers<[1], [0], [0], [1], [0, 0, 1, 1], [], []>} : vector<8x64xbf16>, vector<64x256xbf16>, vector<8x256xf32> -> vector<8x256xf32>
    %482 = arith.index_cast %474 : i32 to index
    %c0_173 = arith.constant 0 : index
    %483 = vector.load %arg8[%482, %c0_173] : memref<64x256xf32, #tpu.memory_space<vmem>>, vector<8x128xf32>
    %484 = vector.extract_strided_slice %481 {offsets = [0, 0], sizes = [8, 128], strides = [1, 1]} : vector<8x256xf32> to vector<8x128xf32>
    %485 = arith.addf %483, %484 : vector<8x128xf32>
    %486 = arith.index_cast %477 : i32 to index
    %c128_174 = arith.constant 128 : index
    %487 = vector.load %arg8[%486, %c128_174] : memref<64x256xf32, #tpu.memory_space<vmem>>, vector<8x128xf32>
    %488 = vector.extract_strided_slice %481 {offsets = [0, 128], sizes = [8, 128], strides = [1, 1]} : vector<8x256xf32> to vector<8x128xf32>
    %489 = arith.addf %487, %488 : vector<8x128xf32>
    %c0_175 = arith.constant 0 : index
    %c0_176 = arith.constant 0 : index
    %490 = vector.load %arg10[%c0_175, %c0_176] : memref<8x64xf32, #tpu.memory_space<vmem>>, vector<8x32xf32>
    %491 = vector.extract_strided_slice %485 {offsets = [0, 0], sizes = [8, 32], strides = [1, 1]} : vector<8x128xf32> to vector<8x32xf32>
    %492 = arith.negf %491 : vector<8x32xf32>
    %493 = math.exp %492 : vector<8x32xf32>
    %cst_177 = arith.constant 1.000000e+00 : f32
    %494 = vector.broadcast %cst_177 : f32 to vector<8x32xf32>
    %495 = arith.addf %494, %493 : vector<8x32xf32>
    %496 = arith.divf %494, %495 : vector<8x32xf32>
    %497 = vector.extract_strided_slice %485 {offsets = [0, 32], sizes = [8, 32], strides = [1, 1]} : vector<8x128xf32> to vector<8x32xf32>
    %498 = arith.negf %497 : vector<8x32xf32>
    %499 = math.exp %498 : vector<8x32xf32>
    %cst_178 = arith.constant 1.000000e+00 : f32
    %500 = vector.broadcast %cst_178 : f32 to vector<8x32xf32>
    %501 = arith.addf %500, %499 : vector<8x32xf32>
    %502 = arith.divf %500, %501 : vector<8x32xf32>
    %503 = vector.extract_strided_slice %485 {offsets = [0, 64], sizes = [8, 32], strides = [1, 1]} : vector<8x128xf32> to vector<8x32xf32>
    %504 = math.tanh %503 : vector<8x32xf32>
    %505 = vector.extract_strided_slice %485 {offsets = [0, 96], sizes = [8, 32], strides = [1, 1]} : vector<8x128xf32> to vector<8x32xf32>
    %506 = arith.negf %505 : vector<8x32xf32>
    %507 = math.exp %506 : vector<8x32xf32>
    %cst_179 = arith.constant 1.000000e+00 : f32
    %508 = vector.broadcast %cst_179 : f32 to vector<8x32xf32>
    %509 = arith.addf %508, %507 : vector<8x32xf32>
    %510 = arith.divf %508, %509 : vector<8x32xf32>
    %511 = arith.mulf %502, %490 : vector<8x32xf32>
    %512 = arith.mulf %496, %504 : vector<8x32xf32>
    %513 = arith.addf %511, %512 : vector<8x32xf32>
    %514 = math.tanh %513 : vector<8x32xf32>
    %515 = arith.mulf %510, %514 : vector<8x32xf32>
    %c0_180 = arith.constant 0 : index
    %c32_181 = arith.constant 32 : index
    %516 = vector.load %arg10[%c0_180, %c32_181] : memref<8x64xf32, #tpu.memory_space<vmem>>, vector<8x32xf32>
    %517 = vector.extract_strided_slice %489 {offsets = [0, 0], sizes = [8, 32], strides = [1, 1]} : vector<8x128xf32> to vector<8x32xf32>
    %518 = arith.negf %517 : vector<8x32xf32>
    %519 = math.exp %518 : vector<8x32xf32>
    %cst_182 = arith.constant 1.000000e+00 : f32
    %520 = vector.broadcast %cst_182 : f32 to vector<8x32xf32>
    %521 = arith.addf %520, %519 : vector<8x32xf32>
    %522 = arith.divf %520, %521 : vector<8x32xf32>
    %523 = vector.extract_strided_slice %489 {offsets = [0, 32], sizes = [8, 32], strides = [1, 1]} : vector<8x128xf32> to vector<8x32xf32>
    %524 = arith.negf %523 : vector<8x32xf32>
    %525 = math.exp %524 : vector<8x32xf32>
    %cst_183 = arith.constant 1.000000e+00 : f32
    %526 = vector.broadcast %cst_183 : f32 to vector<8x32xf32>
    %527 = arith.addf %526, %525 : vector<8x32xf32>
    %528 = arith.divf %526, %527 : vector<8x32xf32>
    %529 = vector.extract_strided_slice %489 {offsets = [0, 64], sizes = [8, 32], strides = [1, 1]} : vector<8x128xf32> to vector<8x32xf32>
    %530 = math.tanh %529 : vector<8x32xf32>
    %531 = vector.extract_strided_slice %489 {offsets = [0, 96], sizes = [8, 32], strides = [1, 1]} : vector<8x128xf32> to vector<8x32xf32>
    %532 = arith.negf %531 : vector<8x32xf32>
    %533 = math.exp %532 : vector<8x32xf32>
    %cst_184 = arith.constant 1.000000e+00 : f32
    %534 = vector.broadcast %cst_184 : f32 to vector<8x32xf32>
    %535 = arith.addf %534, %533 : vector<8x32xf32>
    %536 = arith.divf %534, %535 : vector<8x32xf32>
    %537 = arith.mulf %528, %516 : vector<8x32xf32>
    %538 = arith.mulf %522, %530 : vector<8x32xf32>
    %539 = arith.addf %537, %538 : vector<8x32xf32>
    %540 = math.tanh %539 : vector<8x32xf32>
    %541 = arith.mulf %536, %540 : vector<8x32xf32>
    %542 = tpu.concatenate %515, %541 in 1 : vector<8x32xf32>, vector<8x32xf32> -> vector<8x64xf32>
    %c0_185 = arith.constant 0 : index
    %c0_186 = arith.constant 0 : index
    %543 = vector.load %arg9[%c0_185, %c0_186] : memref<8x64xf32, #tpu.memory_space<vmem>>, vector<8x64xf32>
    tpu.vector_store %arg9[%c0_185, %c0_186], %542 {strides = array<i32>} : memref<8x64xf32, #tpu.memory_space<vmem>>, vector<8x64xf32>,
    %544 = tpu.concatenate %513, %539 in 1 : vector<8x32xf32>, vector<8x32xf32> -> vector<8x64xf32>
    %c0_187 = arith.constant 0 : index
    %c0_188 = arith.constant 0 : index
    %545 = vector.load %arg10[%c0_187, %c0_188] : memref<8x64xf32, #tpu.memory_space<vmem>>, vector<8x64xf32>
    tpu.vector_store %arg10[%c0_187, %c0_188], %544 {strides = array<i32>} : memref<8x64xf32, #tpu.memory_space<vmem>>, vector<8x64xf32>,
    %546 = arith.index_cast %474 : i32 to index
    %c0_189 = arith.constant 0 : index
    %547 = vector.load %arg11[%546, %c0_189] : memref<64x64xf32, #tpu.memory_space<vmem>>, vector<8x32xf32>
    tpu.vector_store %arg11[%546, %c0_189], %515 {strides = array<i32>} : memref<64x64xf32, #tpu.memory_space<vmem>>, vector<8x32xf32>,
    %548 = arith.index_cast %477 : i32 to index
    %c32_190 = arith.constant 32 : index
    %549 = vector.load %arg11[%548, %c32_190] : memref<64x64xf32, #tpu.memory_space<vmem>>, vector<8x32xf32>
    tpu.vector_store %arg11[%548, %c32_190], %541 {strides = array<i32>} : memref<64x64xf32, #tpu.memory_space<vmem>>, vector<8x32xf32>,
    %c7_i32_191 = arith.constant 7 : i32
    %c8_i32_192 = arith.constant 8 : i32
    %550 = arith.muli %c7_i32_191, %c8_i32_192 : i32
    %551 = tpu.assume_multiple %550, 8 : i32
    %c7_i32_193 = arith.constant 7 : i32
    %552 = arith.subi %c7_i32_193, %c7_i32_191 : i32
    %c8_i32_194 = arith.constant 8 : i32
    %553 = arith.muli %552, %c8_i32_194 : i32
    %554 = tpu.assume_multiple %553, 8 : i32
    %c0_195 = arith.constant 0 : index
    %c0_196 = arith.constant 0 : index
    %555 = vector.load %arg9[%c0_195, %c0_196] : memref<8x64xf32, #tpu.memory_space<vmem>>, vector<8x64xf32>
    %556 = arith.truncf %555 : vector<8x64xf32> to vector<8x64xbf16>
    %c0_197 = arith.constant 0 : index
    %c0_198 = arith.constant 0 : index
    %557 = vector.load %arg4[%c0_197, %c0_198] : memref<64x256xbf16, #tpu.memory_space<vmem>>, vector<64x256xbf16>
    %cst_199 = arith.constant dense<0.000000e+00> : vector<8x256xf32>
    %558 = tpu.matmul %556, %557, %cst_199 {dimension_numbers = #tpu.dot_dimension_numbers<[1], [0], [0], [1], [0, 0, 1, 1], [], []>} : vector<8x64xbf16>, vector<64x256xbf16>, vector<8x256xf32> -> vector<8x256xf32>
    %559 = arith.index_cast %551 : i32 to index
    %c0_200 = arith.constant 0 : index
    %560 = vector.load %arg8[%559, %c0_200] : memref<64x256xf32, #tpu.memory_space<vmem>>, vector<8x128xf32>
    %561 = vector.extract_strided_slice %558 {offsets = [0, 0], sizes = [8, 128], strides = [1, 1]} : vector<8x256xf32> to vector<8x128xf32>
    %562 = arith.addf %560, %561 : vector<8x128xf32>
    %563 = arith.index_cast %554 : i32 to index
    %c128_201 = arith.constant 128 : index
    %564 = vector.load %arg8[%563, %c128_201] : memref<64x256xf32, #tpu.memory_space<vmem>>, vector<8x128xf32>
    %565 = vector.extract_strided_slice %558 {offsets = [0, 128], sizes = [8, 128], strides = [1, 1]} : vector<8x256xf32> to vector<8x128xf32>
    %566 = arith.addf %564, %565 : vector<8x128xf32>
    %c0_202 = arith.constant 0 : index
    %c0_203 = arith.constant 0 : index
    %567 = vector.load %arg10[%c0_202, %c0_203] : memref<8x64xf32, #tpu.memory_space<vmem>>, vector<8x32xf32>
    %568 = vector.extract_strided_slice %562 {offsets = [0, 0], sizes = [8, 32], strides = [1, 1]} : vector<8x128xf32> to vector<8x32xf32>
    %569 = arith.negf %568 : vector<8x32xf32>
    %570 = math.exp %569 : vector<8x32xf32>
    %cst_204 = arith.constant 1.000000e+00 : f32
    %571 = vector.broadcast %cst_204 : f32 to vector<8x32xf32>
    %572 = arith.addf %571, %570 : vector<8x32xf32>
    %573 = arith.divf %571, %572 : vector<8x32xf32>
    %574 = vector.extract_strided_slice %562 {offsets = [0, 32], sizes = [8, 32], strides = [1, 1]} : vector<8x128xf32> to vector<8x32xf32>
    %575 = arith.negf %574 : vector<8x32xf32>
    %576 = math.exp %575 : vector<8x32xf32>
    %cst_205 = arith.constant 1.000000e+00 : f32
    %577 = vector.broadcast %cst_205 : f32 to vector<8x32xf32>
    %578 = arith.addf %577, %576 : vector<8x32xf32>
    %579 = arith.divf %577, %578 : vector<8x32xf32>
    %580 = vector.extract_strided_slice %562 {offsets = [0, 64], sizes = [8, 32], strides = [1, 1]} : vector<8x128xf32> to vector<8x32xf32>
    %581 = math.tanh %580 : vector<8x32xf32>
    %582 = vector.extract_strided_slice %562 {offsets = [0, 96], sizes = [8, 32], strides = [1, 1]} : vector<8x128xf32> to vector<8x32xf32>
    %583 = arith.negf %582 : vector<8x32xf32>
    %584 = math.exp %583 : vector<8x32xf32>
    %cst_206 = arith.constant 1.000000e+00 : f32
    %585 = vector.broadcast %cst_206 : f32 to vector<8x32xf32>
    %586 = arith.addf %585, %584 : vector<8x32xf32>
    %587 = arith.divf %585, %586 : vector<8x32xf32>
    %588 = arith.mulf %579, %567 : vector<8x32xf32>
    %589 = arith.mulf %573, %581 : vector<8x32xf32>
    %590 = arith.addf %588, %589 : vector<8x32xf32>
    %591 = math.tanh %590 : vector<8x32xf32>
    %592 = arith.mulf %587, %591 : vector<8x32xf32>
    %c0_207 = arith.constant 0 : index
    %c32_208 = arith.constant 32 : index
    %593 = vector.load %arg10[%c0_207, %c32_208] : memref<8x64xf32, #tpu.memory_space<vmem>>, vector<8x32xf32>
    %594 = vector.extract_strided_slice %566 {offsets = [0, 0], sizes = [8, 32], strides = [1, 1]} : vector<8x128xf32> to vector<8x32xf32>
    %595 = arith.negf %594 : vector<8x32xf32>
    %596 = math.exp %595 : vector<8x32xf32>
    %cst_209 = arith.constant 1.000000e+00 : f32
    %597 = vector.broadcast %cst_209 : f32 to vector<8x32xf32>
    %598 = arith.addf %597, %596 : vector<8x32xf32>
    %599 = arith.divf %597, %598 : vector<8x32xf32>
    %600 = vector.extract_strided_slice %566 {offsets = [0, 32], sizes = [8, 32], strides = [1, 1]} : vector<8x128xf32> to vector<8x32xf32>
    %601 = arith.negf %600 : vector<8x32xf32>
    %602 = math.exp %601 : vector<8x32xf32>
    %cst_210 = arith.constant 1.000000e+00 : f32
    %603 = vector.broadcast %cst_210 : f32 to vector<8x32xf32>
    %604 = arith.addf %603, %602 : vector<8x32xf32>
    %605 = arith.divf %603, %604 : vector<8x32xf32>
    %606 = vector.extract_strided_slice %566 {offsets = [0, 64], sizes = [8, 32], strides = [1, 1]} : vector<8x128xf32> to vector<8x32xf32>
    %607 = math.tanh %606 : vector<8x32xf32>
    %608 = vector.extract_strided_slice %566 {offsets = [0, 96], sizes = [8, 32], strides = [1, 1]} : vector<8x128xf32> to vector<8x32xf32>
    %609 = arith.negf %608 : vector<8x32xf32>
    %610 = math.exp %609 : vector<8x32xf32>
    %cst_211 = arith.constant 1.000000e+00 : f32
    %611 = vector.broadcast %cst_211 : f32 to vector<8x32xf32>
    %612 = arith.addf %611, %610 : vector<8x32xf32>
    %613 = arith.divf %611, %612 : vector<8x32xf32>
    %614 = arith.mulf %605, %593 : vector<8x32xf32>
    %615 = arith.mulf %599, %607 : vector<8x32xf32>
    %616 = arith.addf %614, %615 : vector<8x32xf32>
    %617 = math.tanh %616 : vector<8x32xf32>
    %618 = arith.mulf %613, %617 : vector<8x32xf32>
    %619 = tpu.concatenate %592, %618 in 1 : vector<8x32xf32>, vector<8x32xf32> -> vector<8x64xf32>
    %c0_212 = arith.constant 0 : index
    %c0_213 = arith.constant 0 : index
    %620 = vector.load %arg9[%c0_212, %c0_213] : memref<8x64xf32, #tpu.memory_space<vmem>>, vector<8x64xf32>
    tpu.vector_store %arg9[%c0_212, %c0_213], %619 {strides = array<i32>} : memref<8x64xf32, #tpu.memory_space<vmem>>, vector<8x64xf32>,
    %621 = tpu.concatenate %590, %616 in 1 : vector<8x32xf32>, vector<8x32xf32> -> vector<8x64xf32>
    %c0_214 = arith.constant 0 : index
    %c0_215 = arith.constant 0 : index
    %622 = vector.load %arg10[%c0_214, %c0_215] : memref<8x64xf32, #tpu.memory_space<vmem>>, vector<8x64xf32>
    tpu.vector_store %arg10[%c0_214, %c0_215], %621 {strides = array<i32>} : memref<8x64xf32, #tpu.memory_space<vmem>>, vector<8x64xf32>,
    %623 = arith.index_cast %551 : i32 to index
    %c0_216 = arith.constant 0 : index
    %624 = vector.load %arg11[%623, %c0_216] : memref<64x64xf32, #tpu.memory_space<vmem>>, vector<8x32xf32>
    tpu.vector_store %arg11[%623, %c0_216], %592 {strides = array<i32>} : memref<64x64xf32, #tpu.memory_space<vmem>>, vector<8x32xf32>,
    %625 = arith.index_cast %554 : i32 to index
    %c32_217 = arith.constant 32 : index
    %626 = vector.load %arg11[%625, %c32_217] : memref<64x64xf32, #tpu.memory_space<vmem>>, vector<8x32xf32>
    tpu.vector_store %arg11[%625, %c32_217], %618 {strides = array<i32>} : memref<64x64xf32, #tpu.memory_space<vmem>>, vector<8x32xf32>,
    %c8_i32_218 = arith.constant 8 : i32
    %c0_219 = arith.constant 0 : index
    %c0_220 = arith.constant 0 : index
    %627 = vector.load %arg11[%c0_219, %c0_220] : memref<64x64xf32, #tpu.memory_space<vmem>>, vector<64x64xf32>
    %c0_221 = arith.constant 0 : index
    %c0_222 = arith.constant 0 : index
    %628 = vector.load %arg5[%c0_221, %c0_222] : memref<64x128xf32, #tpu.memory_space<vmem>>, vector<64x128xf32>
    %cst_223 = arith.constant dense<0.000000e+00> : vector<64x128xf32>
    %629 = tpu.matmul %627, %628, %cst_223 {dimension_numbers = #tpu.dot_dimension_numbers<[1], [0], [0], [1], [0, 0, 1, 1], [], []>} : vector<64x64xf32>, vector<64x128xf32>, vector<64x128xf32> -> vector<64x128xf32>
    %c0_224 = arith.constant 0 : index
    %c0_225 = arith.constant 0 : index
    %630 = vector.load %arg6[%c0_224, %c0_225] : memref<1x128xf32, #tpu.memory_space<vmem>>, vector<1x128xf32>
    %631 = vector.broadcast %630 : vector<1x128xf32> to vector<64x128xf32>
    %632 = arith.addf %629, %631 : vector<64x128xf32>
    %c0_226 = arith.constant 0 : index
    %c0_227 = arith.constant 0 : index
    %633 = vector.load %arg7[%c0_226, %c0_227] : memref<64x128xf32, #tpu.memory_space<vmem>>, vector<64x128xf32>
    tpu.vector_store %arg7[%c0_226, %c0_227], %632 {strides = array<i32>} : memref<64x128xf32, #tpu.memory_space<vmem>>, vector<64x128xf32>,
    return
  }
  func.func @transform_0(%arg0: i32) -> (i32, i32) {
    %c0_i32 = arith.constant 0 : i32
    %c0_i32_0 = arith.constant 0 : i32
    %c0_i32_1 = arith.constant 0 : i32
    return %c0_i32, %c0_i32_0 : i32, i32
  }
  func.func @transform_1(%arg0: i32) -> (i32, i32) {
    %c0_i32 = arith.constant 0 : i32
    %c0_i32_0 = arith.constant 0 : i32
    %c0_i32_1 = arith.constant 0 : i32
    return %c0_i32, %c0_i32_0 : i32, i32
  }
  func.func @transform_2(%arg0: i32) -> (i32, i32) {
    %c0_i32 = arith.constant 0 : i32
    %c0_i32_0 = arith.constant 0 : i32
    %c0_i32_1 = arith.constant 0 : i32
    return %c0_i32, %c0_i32_0 : i32, i32
  }
  func.func @transform_3(%arg0: i32) -> (i32, i32) {
    %c0_i32 = arith.constant 0 : i32
    %c0_i32_0 = arith.constant 0 : i32
    %c0_i32_1 = arith.constant 0 : i32
    return %c0_i32, %c0_i32_0 : i32, i32
  }
  func.func @transform_4(%arg0: i32) -> (i32, i32) {
    %c0_i32 = arith.constant 0 : i32
    %c0_i32_0 = arith.constant 0 : i32
    %c0_i32_1 = arith.constant 0 : i32
    return %c0_i32, %c0_i32_0 : i32, i32
  }
  func.func @transform_5(%arg0: i32) -> (i32, i32) {
    %c0_i32 = arith.constant 0 : i32
    %c0_i32_0 = arith.constant 0 : i32
    %c0_i32_1 = arith.constant 0 : i32
    return %c0_i32, %c0_i32_0 : i32, i32
  }
  func.func @transform_6(%arg0: i32) -> (i32, i32) {
    %c0_i32 = arith.constant 0 : i32
    %c0_i32_0 = arith.constant 0 : i32
    %c0_i32_1 = arith.constant 0 : i32
    return %c0_i32, %c0_i32_0 : i32, i32
  }
}

</mosaic_0001>

<bundles_post_ra>
// kernel: lstm_model_forward.2
= control target key start
LH: loop header
LB: loop body
LE: loop exit
PB: predicated region body
PF: predicated region fallthrough
CT: control target
= control target key end

     0   :  { %vm184_vm0 = vcmask 523264   ;;  %v2008_v1 = vmov 0   ;;  %v2009_v2 = vmov 0.0   ;;  %vm82_vm1 = vcmask 261120   ;;  %s2010_s14 = smov 32   ;;  %s2515_s1 = inlined_call_operand.vmem [shape: bf16[32,256], index: 1, kind: input, shape index: {}]   ;;  %s2516_s3 = inlined_call_operand.vmem [shape: bf16[64,256], index: 3, kind: input, shape index: {}]   ;;  %s2517_s0 = inlined_call_operand.vmem [shape: bf16[64,32], index: 0, kind: input, shape index: {}]   ;;  %s2518_s2 = inlined_call_operand.vmem [shape: f32[1,256], index: 2, kind: input, shape index: {}]   ;;  %s2519_s4 = inlined_call_operand.vmem [shape: bf16[64,64], index: 4, kind: output, shape index: {}]  }
   0x1   :  { %v1846_v0 = vld [vmem:[%s2515_s1 + $0x4] ss:$8 sps:$4 sm:$0xff]   ;;  %127 = vmatprep.mubr.bf16.mxu0 %v2008_v1  ;;  %272 = vmatprep.mubr.bf16.mxu1 %v2008_v1  ;;  %185 = vst.msk [vmem:[#allocation3] sm:$0xff] %vm184_vm0, %v2009_v2  ;;  %186 = vst.msk [vmem:[#allocation4] sm:$0xff] %vm184_vm0, %v2009_v2  ;;  %v1850_v4 = vld [vmem:[%s2515_s1] ss:$8 sps:$4 sm:$0xff]   ;;  %v32_v21 = vlaneseq }
   0x2   :  { %v2048_v3 = vld [vmem:[%s2516_s3 + $0x4] ss:$8 sps:$4 sm:$0xff]   ;;  %95 = vmatprep.subr.bf16.mxu0 %v1846_v0  ;;  %v2056_v5 = vld [vmem:[%s2516_s3] ss:$8 sps:$4 sm:$0xff]   ;;  %v1852_v6 = vld [vmem:[%s2515_s1 + $0x14] ss:$8 sps:$4 sm:$0xff]  }
   0x3   :  { %240 = vmatprep.subr.bf16.mxu1 %v2048_v3  ;;  %96 = vmatpush1.bf16.msra.mxu0 %v1850_v4  ;;  %v2066_v7 = vld [vmem:[%s2516_s3 + $0x14] ss:$8 sps:$4 sm:$0xff]   ;;  %v1856_v8 = vld [vmem:[%s2515_s1 + $0x10] ss:$8 sps:$4 sm:$0xff]   ;;  %v1858_v10 = vld [vmem:[%s2517_s0] sm:$0xff]   ;;  %v33_v22 = vshrl.u32 %v32_v21, 7 }
   0x4   :  { %241 = vmatpush1.bf16.msra.mxu1 %v2056_v5  ;;  %97 = vmatprep.subr.bf16.mxu0 %v1852_v6  ;;  %v2074_v9 = vld [vmem:[%s2516_s3 + $0x10] ss:$8 sps:$4 sm:$0xff]   ;;  %v2083_v11 = vld [vmem:[%s2516_s3 + $0x24] ss:$8 sps:$4 sm:$0xff]   ;;  %v2089_v12 = vld [vmem:[%s2516_s3 + $0x20] ss:$8 sps:$4 sm:$0xff]  }
   0x5   :  { %242 = vmatprep.subr.bf16.mxu1 %v2066_v7  ;;  %v2095_v13 = vld [vmem:[%s2516_s3 + $0x34] ss:$8 sps:$4 sm:$0xff]   ;;  %v2103_v14 = vld [vmem:[%s2516_s3 + $0x30] ss:$8 sps:$4 sm:$0xff]   ;;  %v1865_v17 = vld [vmem:[%s2517_s0 + $0x8] sm:$0xff]   ;;  %v38_v23 = vsub.s32 1, %v33_v22 }
   0x6   :  { %v1866_v19 = vld [vmem:[%s2517_s0 + $0x10] sm:$0xff]   ;;  %v1867_v20 = vld [vmem:[%s2517_s0 + $0x18] sm:$0xff]   ;;  %v30_v24 = vld [vmem:[%s2518_s2] sm:$0x3]  ;;  %v34_v25 = vsub.s32 0, %v33_v22  ;;  %s2011_s0 = smov 64  }
   0x7   :  { %98 = vmatpush1.bf16.msra.mxu0 %v1856_v8  ;;  %v39_v26 = vrot.slane %v30_v24, %v38_v23  ;;  %s2012_s2 = smov 96   ;;  %vm367_vm2 = vcmask 257024   ;;  %vm377_vm3 = vcmask 519424  }
   0x8   :  { %243 = vmatpush1.bf16.msra.mxu1 %v2074_v9  ;;  %623 = vmatprep.subr.bf16.mxu0 %v2048_v3  ;;  %v187_v15 = vld [vmem:[#allocation3] sm:$0xff]  ;;  %v2106_v16 = vld [vmem:[#allocation4] sm:$0xff]  ;;  %v35_v28 = vrot.slane %v30_v24, %v34_v25 }
   0x9   :  { %244 = vmatprep.subr.bf16.mxu1 %v2083_v11  ;;  %300 = vrot.lane.b32.xlu1 %v2106_v16, %s2010_s14  ;;  %v188_v18 = vpack.c.bf16 %v187_v15, %v187_v15 }
   0xa   :  { %1703 = vmatmul.mubr.msk.bf16.vlgmr.msra.gmra.mrb[0].mxu0 %vm82_vm1, %v1858_v10 }
   0xb   :  { %137 = vmatprep.mubr.bf16.mxu0 %v2008_v1  ;;  %624 = vmatpush1.bf16.msra.mxu0 %v2056_v5 }
   0xc   :  { %245 = vmatpush1.bf16.msra.mxu1 %v2089_v12  ;;  %625 = vmatprep.subr.bf16.mxu0 %v2066_v7 }
   0xd   :  { %246 = vmatprep.subr.bf16.mxu1 %v2095_v13 }
   0xf   :  { %626 = vmatpush1.bf16.msra.mxu0 %v2074_v9 }
  0x10   :  { %247 = vmatpush1.bf16.msra.mxu1 %v2103_v14  ;;  %627 = vmatprep.subr.bf16.mxu0 %v2083_v11 }
  0x11   :  { %432 = vmatprep.subr.bf16.mxu1 %v2048_v3 }
  0x12   :  { %1704 = vmatmul.mubr.msk.bf16.gmra.mrb[4].mxu0 %vm82_vm1, %v1865_v17 }
  0x13   :  { %1715 = vmatmul.mubr.msk.bf16.vlgmr.msra.gmra.mrb[0].mxu1 %vm184_vm0, %v188_v18  ;;  %147 = vmatprep.mubr.bf16.mxu0 %v2008_v1 }
  0x14   :  { %433 = vmatpush1.bf16.msra.mxu1 %v2056_v5  ;;  %464 = vmatprep.mubr.bf16.mxu1 %v2008_v1 }
  0x15   :  { %434 = vmatprep.subr.bf16.mxu1 %v2066_v7  ;;  %628 = vmatpush1.bf16.msra.mxu0 %v2089_v12 }
  0x16   :  { %629 = vmatprep.subr.bf16.mxu0 %v2095_v13 }
  0x18   :  { %435 = vmatpush1.bf16.msra.mxu1 %v2074_v9 }
  0x19   :  { %436 = vmatprep.subr.bf16.mxu1 %v2083_v11  ;;  %630 = vmatpush1.bf16.msra.mxu0 %v2103_v14 }
  0x1a   :  { %1705 = vmatmul.mubr.msk.bf16.gmra.mrb[8].mxu0 %vm82_vm1, %v1866_v19  ;;  %1005 = vmatprep.subr.bf16.mxu0 %v2048_v3 }
  0x1b   :  { %157 = vmatprep.mubr.bf16.mxu0 %v2008_v1 }
  0x1c   :  { %437 = vmatpush1.bf16.msra.mxu1 %v2089_v12 }
  0x1d   :  { %438 = vmatprep.subr.bf16.mxu1 %v2095_v13 }
  0x20   :  { %439 = vmatpush1.bf16.msra.mxu1 %v2103_v14 }
  0x21   :  { %814 = vmatprep.subr.bf16.mxu1 %v2048_v3 }
  0x22   :  { %1706 = vmatmul.mubr.msk.bf16.gmra.mrb[12].mxu0 %vm82_vm1, %v1867_v20 }
  0x23   :  { %655 = vmatprep.mubr.bf16.mxu0 %v2008_v1 }
  0xdd   :  { %v129_v27 = vpop.f32.mrb[0].mxu0 }
  0xde   :  { %v131_v29 = vpop.f32.mrb[1].mxu0  ;;  %v130_v35 = vadd.f32 %v129_v27, %v35_v28 }
  0xdf   :  { %v2149_v30 = vadd.f32 %v131_v29, %v39_v26  ;;  %v133_v31 = vpop.f32.mrb[2].mxu0 }
  0xe0   :  { %v2151_v32 = vadd.f32 %v133_v31, %v35_v28  ;;  %v135_v33 = vpop.f32.mrb[3].mxu0 }
  0xe1   :  { %v2153_v34 = vadd.f32 %v135_v33, %v39_v26 }
  0xe5   :  { %v139_v36 = vpop.f32.mrb[4].mxu0 }
  0xe6   :  { %v274_v37 = vpop.f32.mrb[0].mxu1  ;;  %v2155_v38 = vadd.f32 %v139_v36, %v35_v28  ;;  %v141_v40 = vpop.f32.mrb[5].mxu0 }
  0xe7   :  { %v285_v39 = vadd.f32 %v274_v37, %v130_v35  ;;  %v276_v41 = vpop.f32.mrb[1].mxu1  ;;  %v2157_v42 = vadd.f32 %v141_v40, %v39_v26  ;;  %v143_v43 = vpop.f32.mrb[6].mxu0 }
  0xe8   :  { %v278_v44 = vpop.f32.mrb[2].mxu1  ;;  %v2159_v45 = vadd.f32 %v143_v43, %v35_v28  ;;  %v145_v46 = vpop.f32.mrb[7].mxu0 }
  0xe9   :  { %1880 = vtanh.f32 %v285_v39  ;;  %v279_v47 = vpop.f32.mrb[3].mxu1  ;;  %v2161_v48 = vadd.f32 %v145_v46, %v39_v26  ;;  %v1716_v8 = vmul.f32 -1.442695, %v285_v39 }
  0xed   :  { %v149_v49 = vpop.f32.mrb[8].mxu0 }
  0xee   :  { %v2163_v50 = vadd.f32 %v149_v49, %v35_v28  ;;  %v151_v51 = vpop.f32.mrb[9].mxu0 }
  0xef   :  { %v2165_v52 = vadd.f32 %v151_v51, %v39_v26  ;;  %v153_v53 = vpop.f32.mrb[10].mxu0 }
  0xf0   :  { %v2167_v54 = vadd.f32 %v153_v53, %v35_v28  ;;  %v155_v55 = vpop.f32.mrb[11].mxu0 }
  0xf1   :  { %v2169_v56 = vadd.f32 %v155_v55, %v39_v26 }
  0xf3   :  { %v1881_v57 = vpop.eup %1880 }
  0xf4   :  { %305 = vrot.lane.b32.xlu0 %v1881_v57, %s2011_s0 }
  0xf5   :  { %v159_v58 = vpop.f32.mrb[12].mxu0 }
  0xf6   :  { %v2172_v59 = vadd.f32 %v159_v58, %v35_v28  ;;  %v161_v60 = vpop.f32.mrb[13].mxu0 }
  0xf7   :  { %v2174_v61 = vadd.f32 %v161_v60, %v39_v26  ;;  %v163_v62 = vpop.f32.mrb[14].mxu0 }
  0xf8   :  { %v2176_v63 = vadd.f32 %v163_v62, %v35_v28  ;;  %v165_v0 = vpop.f32.mrb[15].mxu0 }
  0xf9   :  { %v166_v2 = vadd.f32 %v165_v0, %v39_v26  ;;  %v301_v26 = vpop.permute.xlu1 %300 }
  0xfb   :  { %v290_v4 = vadd.f32 %v276_v41, %v166_v2 }
  0xfd   :  { %1882 = vtanh.f32 %v290_v4  ;;  %v1717_v17 = vmul.f32 -1.442695, %v290_v4 }
  0xfe   :  { %1884 = vpow2.f32 %v1716_v8 }
 0x107   :  { %v1883_v6 = vpop.eup %1882 }
 0x108   :  { %329 = vrot.lane.b32.xlu0 %v1883_v6, %s2011_s0  ;;  %v1885_v10 = vpop.eup %1884 }
 0x109   :  { %v295_v15 = vadd.f32 1.0, %v1885_v10 }
 0x10b   :  { %1886 = vrcp.f32 %v295_v15 }
 0x10c   :  { %1888 = vpow2.f32 %v1717_v17 }
 0x115   :  { %v1887_v18 = vpop.eup %1886 }
 0x116   :  { %v1889_v21 = vpop.eup %1888  ;;  %v303_v27 = vmul.f32 %v1887_v18, %v301_v26 }
 0x117   :  { %v323_v22 = vadd.f32 1.0, %v1889_v21 }
 0x119   :  { %1890 = vrcp.f32 %v323_v22 }
 0x123   :  { %v1891_v23 = vpop.eup %1890 }
 0x124   :  { %v327_v33 = vmul.f32 %v1891_v23, %v2106_v16 }
 0x166   :  { %v306_v19 = vpop.permute.xlu0 %305 }
 0x167   :  { %v308_v20 = vmul.f32 %v1887_v18, %v306_v19 }
 0x169   :  { %310 = vrot.lane.b32.xlu1 %v308_v20, %s2010_s14 }
 0x17a   :  { %v330_v24 = vpop.permute.xlu0 %329 }
 0x17b   :  { %v332_v25 = vmul.f32 %v1891_v23, %v330_v24 }
 0x17d   :  { %334 = vrot.lane.b32.xlu0 %v332_v25, %s2010_s14 }
 0x1db   :  { %v311_v28 = vpop.permute.xlu1 %310 }
 0x1dc   :  { %v313_v29 = vadd.f32 %v311_v28, %v303_v27 }
 0x1de   :  { %1892 = vtanh.f32 %v313_v29 }
 0x1e8   :  { %v1893_v31 = vpop.eup %1892 }
 0x1e9   :  { %316 = vrot.lane.b32.xlu1 %v1893_v31, %s2011_s0 }
 0x1ef   :  { %v335_v35 = vpop.permute.xlu0 %334 }
 0x1f0   :  { %v337_v36 = vadd.f32 %v335_v35, %v327_v33 }
 0x1f2   :  { %1894 = vtanh.f32 %v337_v36 }
 0x1fc   :  { %v1895_v37 = vpop.eup %1894 }
 0x1fd   :  { %340 = vrot.lane.b32.xlu0 %v1895_v37, %s2011_s0 }
 0x25b   :  { %v317_v39 = vpop.permute.xlu1 %316 }
 0x25c   :  { %v2184_v40 = vmul.f32 %v1887_v18, %v317_v39 }
 0x25e   :  { %345 = vrot.lane.b32.xlu1 %v2184_v40, %s2010_s14 }
 0x262   :  { %355 = vrot.lane.b32.xlu1 %v313_v29, %s2012_s2 }
 0x26f   :  { %v341_v41 = vpop.permute.xlu0 %340 }
 0x270   :  { %v2189_v43 = vmul.f32 %v1891_v23, %v341_v41 }
 0x272   :  { %349 = vrot.lane.b32.xlu0 %v2189_v43, %s2011_s0 }
 0x2d0   :  { %v346_v16 = vpop.permute.xlu1 %345 }
 0x2d4   :  { %v356_v44 = vpop.permute.xlu1 %355 }
 0x2d5   :  { %v358_v46 = vsel %vm82_vm1, %v356_v44, %v337_v36 }
 0x2d6   :  { %359 = vst.msk [vmem:[#allocation4] sm:$0xff] %vm184_vm0, %v358_v46 }
 0x2dd   :  { %v483_v6 = vld [vmem:[#allocation4] sm:$0xff] }
 0x2e4   :  { %v350_v47 = vpop.permute.xlu0 %349 }
 0x2e5   :  { %v352_v49 = vsel %vm82_vm1, %v346_v16, %v350_v47 }
 0x2e6   :  { %353 = vst.msk [vmem:[#allocation3] sm:$0xff] %vm184_vm0, %v352_v49 }
 0x2ed   :  { %v379_v51 = vld [vmem:[#allocation3] sm:$0xff] }
 0x2ee   :  { %v380_v53 = vpack.c.bf16 %v379_v51, %v379_v51 }
 0x2f0   :  { %1729 = vmatmul.mubr.msk.bf16.vlgmr.msra.gmra.mrb[4].mxu1 %vm184_vm0, %v380_v53 }
 0x2f1   :  { %815 = vmatpush1.bf16.msra.mxu1 %v2056_v5  ;;  %846 = vmatprep.mubr.bf16.mxu1 %v2008_v1 }
 0x2f2   :  { %816 = vmatprep.subr.bf16.mxu1 %v2066_v7 }
 0x2f5   :  { %817 = vmatpush1.bf16.msra.mxu1 %v2074_v9 }
 0x2f6   :  { %818 = vmatprep.subr.bf16.mxu1 %v2083_v11 }
 0x2f9   :  { %819 = vmatpush1.bf16.msra.mxu1 %v2089_v12 }
 0x2fa   :  { %820 = vmatprep.subr.bf16.mxu1 %v2095_v13 }
 0x2fd   :  { %821 = vmatpush1.bf16.msra.mxu1 %v2103_v14 }
 0x2fe   :  { %1188 = vmatprep.subr.bf16.mxu1 %v2048_v3 }
 0x3c3   :  { %v466_v55 = vpop.f32.mrb[4].mxu1 }
 0x3c4   :  { %v477_v57 = vadd.f32 %v466_v55, %v2151_v32  ;;  %v468_v58 = vpop.f32.mrb[5].mxu1 }
 0x3c5   :  { %v482_v60 = vadd.f32 %v468_v58, %v2174_v61  ;;  %v470_v62 = vpop.f32.mrb[6].mxu1 }
 0x3c6   :  { %1896 = vtanh.f32 %v477_v57  ;;  %v471_v0 = vpop.f32.mrb[7].mxu1  ;;  %v1730_v3 = vmul.f32 -1.442695, %v477_v57 }
 0x3c7   :  { %1898 = vtanh.f32 %v482_v60  ;;  %v1731_v8 = vmul.f32 -1.442695, %v482_v60 }
 0x3c8   :  { %1900 = vpow2.f32 %v1730_v3 }
 0x3c9   :  { %1902 = vpow2.f32 %v1731_v8 }
 0x3d0   :  { %v1897_v2 = vpop.eup %1896 }
 0x3d1   :  { %v1899_v4 = vpop.eup %1898  ;;  %497 = vrot.lane.b32.xlu0 %v1897_v2, %s2011_s0 }
 0x3d2   :  { %521 = vrot.lane.b32.xlu1 %v1899_v4, %s2011_s0  ;;  %v1901_v32 = vpop.eup %1900 }
 0x3d3   :  { %v1903_v10 = vpop.eup %1902  ;;  %v487_v61 = vadd.f32 1.0, %v1901_v32 }
 0x3d4   :  { %v515_v15 = vadd.f32 1.0, %v1903_v10 }
 0x3d5   :  { %492 = vrot.lane.b32.xlu0 %v483_v6, %s2010_s14  ;;  %1904 = vrcp.f32 %v487_v61 }
 0x3d6   :  { %1906 = vrcp.f32 %v515_v15 }
 0x3df   :  { %v1905_v17 = vpop.eup %1904 }
 0x3e0   :  { %v1907_v19 = vpop.eup %1906 }
 0x3e1   :  { %v519_v26 = vmul.f32 %v1907_v19, %v483_v6 }
 0x443   :  { %v498_v18 = vpop.permute.xlu0 %497 }
 0x444   :  { %v500_v20 = vmul.f32 %v1905_v17, %v498_v18  ;;  %v522_v21 = vpop.permute.xlu1 %521 }
 0x445   :  { %v524_v22 = vmul.f32 %v1907_v19, %v522_v21 }
 0x446   :  { %502 = vrot.lane.b32.xlu1 %v500_v20, %s2010_s14 }
 0x447   :  { %526 = vrot.lane.b32.xlu0 %v524_v22, %s2010_s14  ;;  %v493_v23 = vpop.permute.xlu0 %492 }
 0x448   :  { %v495_v24 = vmul.f32 %v1905_v17, %v493_v23 }
 0x4b8   :  { %v503_v25 = vpop.permute.xlu1 %502 }
 0x4b9   :  { %v505_v27 = vadd.f32 %v503_v25, %v495_v24  ;;  %v527_v28 = vpop.permute.xlu0 %526 }
 0x4ba   :  { %v529_v29 = vadd.f32 %v527_v28, %v519_v26 }
 0x4bb   :  { %1908 = vtanh.f32 %v505_v27 }
 0x4bc   :  { %1910 = vtanh.f32 %v529_v29 }
 0x4c5   :  { %v1909_v31 = vpop.eup %1908 }
 0x4c6   :  { %v1911_v33 = vpop.eup %1910  ;;  %508 = vrot.lane.b32.xlu1 %v1909_v31, %s2011_s0 }
 0x4c7   :  { %532 = vrot.lane.b32.xlu0 %v1911_v33, %s2011_s0 }
 0x538   :  { %v509_v35 = vpop.permute.xlu1 %508 }
 0x539   :  { %v2216_v36 = vmul.f32 %v1905_v17, %v509_v35  ;;  %v533_v37 = vpop.permute.xlu0 %532 }
 0x53a   :  { %v2218_v39 = vmul.f32 %v1907_v19, %v533_v37 }
 0x53b   :  { %537 = vrot.lane.b32.xlu1 %v2216_v36, %s2010_s14 }
 0x53c   :  { %541 = vrot.lane.b32.xlu0 %v2218_v39, %s2011_s0 }
 0x53f   :  { %547 = vrot.lane.b32.xlu1 %v505_v27, %s2012_s2 }
 0x5ad   :  { %v538_v41 = vpop.permute.xlu1 %537 }
 0x5ae   :  { %v542_v16 = vpop.permute.xlu0 %541 }
 0x5af   :  { %v544_v44 = vsel %vm82_vm1, %v538_v41, %v542_v16 }
 0x5b0   :  { %545 = vst.msk [vmem:[#allocation3] sm:$0xff] %vm184_vm0, %v544_v44 }
 0x5b1   :  { %v548_v46 = vpop.permute.xlu1 %547 }
 0x5b2   :  { %v550_v47 = vsel %vm82_vm1, %v548_v46, %v529_v29 }
 0x5b3   :  { %551 = vst.msk [vmem:[#allocation4] sm:$0xff] %vm184_vm0, %v550_v47 }
 0x5b7   :  { %v570_v49 = vld [vmem:[#allocation3] sm:$0xff] }
 0x5b8   :  { %v571_v51 = vpack.c.bf16 %v570_v49, %v570_v49 }
 0x5ba   :  { %1744 = vmatmul.mubr.msk.bf16.vlgmr.msra.gmra.mrb[16].mxu0 %vm184_vm0, %v571_v51  ;;  %v674_v4 = vld [vmem:[#allocation4] sm:$0xff] }
 0x5bb   :  { %1006 = vmatpush1.bf16.msra.mxu0 %v2056_v5  ;;  %1037 = vmatprep.mubr.bf16.mxu0 %v2008_v1 }
 0x5bc   :  { %1007 = vmatprep.subr.bf16.mxu0 %v2066_v7 }
 0x5bf   :  { %1008 = vmatpush1.bf16.msra.mxu0 %v2074_v9 }
 0x5c0   :  { %1009 = vmatprep.subr.bf16.mxu0 %v2083_v11 }
 0x5c3   :  { %1010 = vmatpush1.bf16.msra.mxu0 %v2089_v12 }
 0x5c4   :  { %1011 = vmatprep.subr.bf16.mxu0 %v2095_v13 }
 0x5c7   :  { %1012 = vmatpush1.bf16.msra.mxu0 %v2103_v14 }
 0x68d   :  { %v657_v53 = vpop.f32.mrb[16].mxu0 }
 0x68e   :  { %v668_v55 = vadd.f32 %v657_v53, %v2155_v38  ;;  %v659_v57 = vpop.f32.mrb[17].mxu0 }
 0x68f   :  { %v673_v58 = vadd.f32 %v659_v57, %v2169_v56  ;;  %v661_v60 = vpop.f32.mrb[18].mxu0 }
 0x690   :  { %1912 = vtanh.f32 %v668_v55  ;;  %v662_v62 = vpop.f32.mrb[19].mxu0  ;;  %v1745_v6 = vmul.f32 -1.442695, %v668_v55 }
 0x691   :  { %1914 = vtanh.f32 %v673_v58  ;;  %v1746_v3 = vmul.f32 -1.442695, %v673_v58 }
 0x692   :  { %1916 = vpow2.f32 %v1745_v6 }
 0x693   :  { %1918 = vpow2.f32 %v1746_v3 }
 0x69a   :  { %v1913_v0 = vpop.eup %1912 }
 0x69b   :  { %v1915_v2 = vpop.eup %1914  ;;  %688 = vrot.lane.b32.xlu0 %v1913_v0, %s2011_s0 }
 0x69c   :  { %712 = vrot.lane.b32.xlu1 %v1915_v2, %s2011_s0  ;;  %v1917_v38 = vpop.eup %1916 }
 0x69d   :  { %v1919_v8 = vpop.eup %1918  ;;  %v678_v56 = vadd.f32 1.0, %v1917_v38 }
 0x69e   :  { %v706_v32 = vadd.f32 1.0, %v1919_v8 }
 0x69f   :  { %683 = vrot.lane.b32.xlu0 %v674_v4, %s2010_s14  ;;  %1920 = vrcp.f32 %v678_v56 }
 0x6a0   :  { %1922 = vrcp.f32 %v706_v32 }
 0x6a9   :  { %v1921_v10 = vpop.eup %1920 }
 0x6aa   :  { %v1923_v15 = vpop.eup %1922 }
 0x6ab   :  { %v710_v23 = vmul.f32 %v1923_v15, %v674_v4 }
 0x70d   :  { %v689_v61 = vpop.permute.xlu0 %688 }
 0x70e   :  { %v691_v17 = vmul.f32 %v1921_v10, %v689_v61  ;;  %v713_v18 = vpop.permute.xlu1 %712 }
 0x70f   :  { %v715_v19 = vmul.f32 %v1923_v15, %v713_v18 }
 0x710   :  { %693 = vrot.lane.b32.xlu1 %v691_v17, %s2010_s14 }
 0x711   :  { %717 = vrot.lane.b32.xlu0 %v715_v19, %s2010_s14  ;;  %v684_v20 = vpop.permute.xlu0 %683 }
 0x712   :  { %v686_v21 = vmul.f32 %v1921_v10, %v684_v20 }
 0x782   :  { %v694_v22 = vpop.permute.xlu1 %693 }
 0x783   :  { %v696_v24 = vadd.f32 %v694_v22, %v686_v21  ;;  %v718_v25 = vpop.permute.xlu0 %717 }
 0x784   :  { %v720_v26 = vadd.f32 %v718_v25, %v710_v23 }
 0x785   :  { %1924 = vtanh.f32 %v696_v24 }
 0x786   :  { %1926 = vtanh.f32 %v720_v26 }
 0x78f   :  { %v1925_v27 = vpop.eup %1924 }
 0x790   :  { %v1927_v28 = vpop.eup %1926  ;;  %699 = vrot.lane.b32.xlu1 %v1925_v27, %s2011_s0 }
 0x791   :  { %723 = vrot.lane.b32.xlu0 %v1927_v28, %s2011_s0 }
 0x802   :  { %v700_v29 = vpop.permute.xlu1 %699 }
 0x803   :  { %v2247_v31 = vmul.f32 %v1921_v10, %v700_v29  ;;  %v724_v33 = vpop.permute.xlu0 %723 }
 0x804   :  { %v2249_v35 = vmul.f32 %v1923_v15, %v724_v33 }
 0x805   :  { %728 = vrot.lane.b32.xlu1 %v2247_v31, %s2010_s14 }
 0x806   :  { %732 = vrot.lane.b32.xlu0 %v2249_v35, %s2011_s0 }
 0x809   :  { %738 = vrot.lane.b32.xlu1 %v696_v24, %s2012_s2 }
 0x877   :  { %v729_v37 = vpop.permute.xlu1 %728 }
 0x878   :  { %v733_v41 = vpop.permute.xlu0 %732 }
 0x879   :  { %v735_v16 = vsel %vm82_vm1, %v729_v37, %v733_v41 }
 0x87a   :  { %736 = vst.msk [vmem:[#allocation3] sm:$0xff] %vm184_vm0, %v735_v16 }
 0x87b   :  { %v739_v44 = vpop.permute.xlu1 %738 }
 0x87c   :  { %v741_v46 = vsel %vm82_vm1, %v739_v44, %v720_v26 }
 0x87d   :  { %742 = vst.msk [vmem:[#allocation4] sm:$0xff] %vm184_vm0, %v741_v46 }
 0x881   :  { %v761_v47 = vld [vmem:[#allocation3] sm:$0xff] }
 0x882   :  { %v762_v49 = vpack.c.bf16 %v761_v47, %v761_v47 }
 0x884   :  { %1759 = vmatmul.mubr.msk.bf16.vlgmr.msra.gmra.mrb[8].mxu1 %vm184_vm0, %v762_v49 }
 0x885   :  { %1189 = vmatpush1.bf16.msra.mxu1 %v2056_v5  ;;  %1220 = vmatprep.mubr.bf16.mxu1 %v2008_v1 }
 0x886   :  { %1190 = vmatprep.subr.bf16.mxu1 %v2066_v7 }
 0x889   :  { %1191 = vmatpush1.bf16.msra.mxu1 %v2074_v9 }
 0x88a   :  { %1192 = vmatprep.subr.bf16.mxu1 %v2083_v11  ;;  %v865_v11 = vld [vmem:[#allocation4] sm:$0xff] }
 0x88d   :  { %1193 = vmatpush1.bf16.msra.mxu1 %v2089_v12 }
 0x88e   :  { %1194 = vmatprep.subr.bf16.mxu1 %v2095_v13 }
 0x891   :  { %1195 = vmatpush1.bf16.msra.mxu1 %v2103_v14 }
 0x957   :  { %v848_v51 = vpop.f32.mrb[8].mxu1 }
 0x958   :  { %v859_v53 = vadd.f32 %v848_v51, %v2159_v45  ;;  %v850_v55 = vpop.f32.mrb[9].mxu1 }
 0x959   :  { %v864_v5 = vadd.f32 %v850_v55, %v2165_v52  ;;  %v852_v57 = vpop.f32.mrb[10].mxu1 }
 0x95a   :  { %1928 = vtanh.f32 %v859_v53  ;;  %v853_v58 = vpop.f32.mrb[11].mxu1  ;;  %v1760_v12 = vmul.f32 -1.442695, %v859_v53 }
 0x95b   :  { %1930 = vtanh.f32 %v864_v5  ;;  %v1761_v13 = vmul.f32 -1.442695, %v864_v5 }
 0x95c   :  { %1932 = vpow2.f32 %v1760_v12 }
 0x95d   :  { %1934 = vpow2.f32 %v1761_v13 }
 0x964   :  { %v1929_v7 = vpop.eup %1928 }
 0x965   :  { %v1931_v9 = vpop.eup %1930  ;;  %879 = vrot.lane.b32.xlu0 %v1929_v7, %s2011_s0 }
 0x966   :  { %903 = vrot.lane.b32.xlu1 %v1931_v9, %s2011_s0  ;;  %v1933_v14 = vpop.eup %1932 }
 0x967   :  { %v1935_v45 = vpop.eup %1934  ;;  %v869_v52 = vadd.f32 1.0, %v1933_v14 }
 0x968   :  { %v897_v60 = vadd.f32 1.0, %v1935_v45 }
 0x969   :  { %874 = vrot.lane.b32.xlu0 %v865_v11, %s2010_s14  ;;  %1936 = vrcp.f32 %v869_v52 }
 0x96a   :  { %1938 = vrcp.f32 %v897_v60 }
 0x973   :  { %v1937_v62 = vpop.eup %1936 }
 0x974   :  { %v1939_v2 = vpop.eup %1938 }
 0x975   :  { %v901_v32 = vmul.f32 %v1939_v2, %v865_v11 }
 0x9d7   :  { %v880_v0 = vpop.permute.xlu0 %879 }
 0x9d8   :  { %v882_v4 = vmul.f32 %v1937_v62, %v880_v0  ;;  %v904_v6 = vpop.permute.xlu1 %903 }
 0x9d9   :  { %v906_v3 = vmul.f32 %v1939_v2, %v904_v6 }
 0x9da   :  { %884 = vrot.lane.b32.xlu1 %v882_v4, %s2010_s14 }
 0x9db   :  { %908 = vrot.lane.b32.xlu0 %v906_v3, %s2010_s14  ;;  %v875_v38 = vpop.permute.xlu0 %874 }
 0x9dc   :  { %v877_v8 = vmul.f32 %v1937_v62, %v875_v38 }
 0xa4c   :  { %v885_v56 = vpop.permute.xlu1 %884 }
 0xa4d   :  { %v887_v10 = vadd.f32 %v885_v56, %v877_v8  ;;  %v909_v61 = vpop.permute.xlu0 %908 }
 0xa4e   :  { %v911_v15 = vadd.f32 %v909_v61, %v901_v32 }
 0xa4f   :  { %1940 = vtanh.f32 %v887_v10 }
 0xa50   :  { %1942 = vtanh.f32 %v911_v15 }
 0xa59   :  { %v1941_v17 = vpop.eup %1940 }
 0xa5a   :  { %v1943_v18 = vpop.eup %1942  ;;  %890 = vrot.lane.b32.xlu1 %v1941_v17, %s2011_s0 }
 0xa5b   :  { %914 = vrot.lane.b32.xlu0 %v1943_v18, %s2011_s0 }
 0xacc   :  { %v891_v19 = vpop.permute.xlu1 %890 }
 0xacd   :  { %v2278_v20 = vmul.f32 %v1937_v62, %v891_v19  ;;  %v915_v21 = vpop.permute.xlu0 %914 }
 0xace   :  { %v2280_v22 = vmul.f32 %v1939_v2, %v915_v21 }
 0xacf   :  { %919 = vrot.lane.b32.xlu1 %v2278_v20, %s2010_s14 }
 0xad0   :  { %923 = vrot.lane.b32.xlu0 %v2280_v22, %s2011_s0 }
 0xad3   :  { %929 = vrot.lane.b32.xlu1 %v887_v10, %s2012_s2 }
 0xb41   :  { %v920_v23 = vpop.permute.xlu1 %919 }
 0xb42   :  { %v924_v24 = vpop.permute.xlu0 %923 }
 0xb43   :  { %v926_v25 = vsel %vm82_vm1, %v920_v23, %v924_v24 }
 0xb44   :  { %927 = vst.msk [vmem:[#allocation3] sm:$0xff] %vm184_vm0, %v926_v25 }
 0xb45   :  { %v930_v26 = vpop.permute.xlu1 %929 }
 0xb46   :  { %v932_v27 = vsel %vm82_vm1, %v930_v26, %v911_v15 }
 0xb47   :  { %933 = vst.msk [vmem:[#allocation4] sm:$0xff] %vm184_vm0, %v932_v27 }
 0xb4b   :  { %v952_v28 = vld [vmem:[#allocation3] sm:$0xff] }
 0xb4c   :  { %v953_v29 = vpack.c.bf16 %v952_v28, %v952_v28 }
 0xb4e   :  { %1774 = vmatmul.mubr.msk.bf16.vlgmr.msra.gmra.mrb[20].mxu0 %vm184_vm0, %v953_v29  ;;  %v1050_v51 = vld [vmem:[#allocation4] sm:$0xff] }
 0xb4f   :  { %1403 = vmatprep.mubr.bf16.mxu0 %v2008_v1 }
 0xc21   :  { %v1039_v33 = vpop.f32.mrb[20].mxu0 }
 0xc22   :  { %v1047_v37 = vadd.f32 %v1039_v33, %v2163_v50  ;;  %v1041_v41 = vpop.f32.mrb[21].mxu0 }
 0xc23   :  { %v1049_v16 = vadd.f32 %v1041_v41, %v2161_v48  ;;  %v1043_v44 = vpop.f32.mrb[22].mxu0 }
 0xc24   :  { %1944 = vtanh.f32 %v1047_v37  ;;  %v1044_v46 = vpop.f32.mrb[23].mxu0  ;;  %v1775_v53 = vmul.f32 -1.442695, %v1047_v37 }
 0xc25   :  { %1946 = vtanh.f32 %v1049_v16  ;;  %v1776_v55 = vmul.f32 -1.442695, %v1049_v16 }
 0xc26   :  { %1948 = vpow2.f32 %v1775_v53 }
 0xc27   :  { %1950 = vpow2.f32 %v1776_v55 }
 0xc2e   :  { %v1945_v47 = vpop.eup %1944 }
 0xc2f   :  { %v1947_v49 = vpop.eup %1946  ;;  %1064 = vrot.lane.b32.xlu0 %v1945_v47, %s2011_s0 }
 0xc30   :  { %1088 = vrot.lane.b32.xlu1 %v1947_v49, %s2011_s0  ;;  %v1949_v50 = vpop.eup %1948 }
 0xc31   :  { %v1951_v5 = vpop.eup %1950  ;;  %v1054_v48 = vadd.f32 1.0, %v1949_v50 }
 0xc32   :  { %v1082_v57 = vadd.f32 1.0, %v1951_v5 }
 0xc33   :  { %1059 = vrot.lane.b32.xlu0 %v1050_v51, %s2010_s14  ;;  %1952 = vrcp.f32 %v1054_v48 }
 0xc34   :  { %1954 = vrcp.f32 %v1082_v57 }
 0xc3d   :  { %v1953_v58 = vpop.eup %1952 }
 0xc3e   :  { %v1955_v9 = vpop.eup %1954 }
 0xc3f   :  { %v1086_v60 = vmul.f32 %v1955_v9, %v1050_v51 }
 0xca1   :  { %v1065_v7 = vpop.permute.xlu0 %1064 }
 0xca2   :  { %v1067_v11 = vmul.f32 %v1953_v58, %v1065_v7  ;;  %v1089_v12 = vpop.permute.xlu1 %1088 }
 0xca3   :  { %v1091_v13 = vmul.f32 %v1955_v9, %v1089_v12 }
 0xca4   :  { %1069 = vrot.lane.b32.xlu1 %v1067_v11, %s2010_s14  ;;  %v1870_v11 = vld [vmem:[%s2516_s3 + $0x4] ss:$8 sps:$4 sm:$0xff]  }
 0xca5   :  { %1093 = vrot.lane.b32.xlu0 %v1091_v13, %s2010_s14  ;;  %v1060_v14 = vpop.permute.xlu0 %1059  ;;  %1371 = vmatprep.subr.bf16.mxu0 %v1870_v11 }
 0xca6   :  { %v1062_v45 = vmul.f32 %v1953_v58, %v1060_v14  ;;  %1554 = vmatprep.subr.bf16.mxu1 %v1870_v11  ;;  %v1873_v14 = vld [vmem:[%s2516_s3 + $0x14] ss:$8 sps:$4 sm:$0xff]  }
 0xd16   :  { %v1070_v52 = vpop.permute.xlu1 %1069 }
 0xd17   :  { %v1072_v62 = vadd.f32 %v1070_v52, %v1062_v45  ;;  %v1094_v0 = vpop.permute.xlu0 %1093  ;;  %v1871_v45 = vld [vmem:[%s2516_s3 + $0x10] ss:$8 sps:$4 sm:$0xff]   ;;  %v1876_v52 = vld [vmem:[%s2516_s3 + $0x24] ss:$8 sps:$4 sm:$0xff]  }
 0xd18   :  { %v1096_v2 = vadd.f32 %v1094_v0, %v1086_v60  ;;  %v1874_v60 = vld [vmem:[%s2516_s3 + $0x20] ss:$8 sps:$4 sm:$0xff]   ;;  %v1879_v0 = vld [vmem:[%s2516_s3 + $0x34] ss:$8 sps:$4 sm:$0xff]  }
 0xd19   :  { %1956 = vtanh.f32 %v1072_v62 }
 0xd1a   :  { %1958 = vtanh.f32 %v1096_v2 }
 0xd23   :  { %v1957_v4 = vpop.eup %1956 }
 0xd24   :  { %v1959_v6 = vpop.eup %1958  ;;  %1075 = vrot.lane.b32.xlu1 %v1957_v4, %s2011_s0 }
 0xd25   :  { %1099 = vrot.lane.b32.xlu0 %v1959_v6, %s2011_s0 }
 0xd96   :  { %v1076_v3 = vpop.permute.xlu1 %1075 }
 0xd97   :  { %v2302_v38 = vmul.f32 %v1953_v58, %v1076_v3  ;;  %v1100_v8 = vpop.permute.xlu0 %1099 }
 0xd98   :  { %v2304_v56 = vmul.f32 %v1955_v9, %v1100_v8  ;;  %v1868_v9 = vld [vmem:[%s2516_s3] ss:$8 sps:$4 sm:$0xff]  }
 0xd99   :  { %1104 = vrot.lane.b32.xlu1 %v2302_v38, %s2010_s14  ;;  %1372 = vmatpush1.bf16.msra.mxu0 %v1868_v9 }
 0xd9a   :  { %1108 = vrot.lane.b32.xlu0 %v2304_v56, %s2011_s0  ;;  %1373 = vmatprep.subr.bf16.mxu0 %v1873_v14 }
 0xd9d   :  { %1114 = vrot.lane.b32.xlu1 %v1072_v62, %s2012_s2  ;;  %1374 = vmatpush1.bf16.msra.mxu0 %v1871_v45  ;;  %v1877_v62 = vld [vmem:[%s2516_s3 + $0x30] ss:$8 sps:$4 sm:$0xff]  }
 0xd9e   :  { %1375 = vmatprep.subr.bf16.mxu0 %v1876_v52 }
 0xda1   :  { %1376 = vmatpush1.bf16.msra.mxu0 %v1874_v60 }
 0xda2   :  { %1377 = vmatprep.subr.bf16.mxu0 %v1879_v0 }
 0xda5   :  { %1378 = vmatpush1.bf16.msra.mxu0 %v1877_v62 }
 0xe0b   :  { %v1105_v32 = vpop.permute.xlu1 %1104 }
 0xe0c   :  { %v1109_v10 = vpop.permute.xlu0 %1108 }
 0xe0d   :  { %v1111_v61 = vsel %vm82_vm1, %v1105_v32, %v1109_v10 }
 0xe0e   :  { %1112 = vst.msk [vmem:[#allocation3] sm:$0xff] %vm184_vm0, %v1111_v61 }
 0xe0f   :  { %v1115_v15 = vpop.permute.xlu1 %1114 }
 0xe10   :  { %v1117_v17 = vsel %vm82_vm1, %v1115_v15, %v1096_v2 }
 0xe11   :  { %1118 = vst.msk [vmem:[#allocation4] sm:$0xff] %vm184_vm0, %v1117_v17 }
 0xe15   :  { %v1135_v18 = vld [vmem:[#allocation3] sm:$0xff] }
 0xe16   :  { %v1136_v19 = vpack.c.bf16 %v1135_v18, %v1135_v18 }
 0xe18   :  { %1789 = vmatmul.mubr.msk.bf16.vlgmr.msra.gmra.mrb[12].mxu1 %vm184_vm0, %v1136_v19  ;;  %v1233_v33 = vld [vmem:[#allocation4] sm:$0xff] }
 0xe19   :  { %1586 = vmatprep.mubr.bf16.mxu1 %v2008_v1  ;;  %1555 = vmatpush1.bf16.msra.mxu1 %v1868_v9 }
 0xe1a   :  { %1556 = vmatprep.subr.bf16.mxu1 %v1873_v14 }
 0xe1d   :  { %1557 = vmatpush1.bf16.msra.mxu1 %v1871_v45 }
 0xe1e   :  { %1558 = vmatprep.subr.bf16.mxu1 %v1876_v52 }
 0xe21   :  { %1559 = vmatpush1.bf16.msra.mxu1 %v1874_v60 }
 0xe22   :  { %1560 = vmatprep.subr.bf16.mxu1 %v1879_v0 }
 0xe25   :  { %1561 = vmatpush1.bf16.msra.mxu1 %v1877_v62 }
 0xeeb   :  { %v1222_v21 = vpop.f32.mrb[12].mxu1 }
 0xeec   :  { %v1230_v23 = vadd.f32 %v1222_v21, %v2167_v54  ;;  %v1224_v24 = vpop.f32.mrb[13].mxu1 }
 0xeed   :  { %v1232_v25 = vadd.f32 %v1224_v24, %v2157_v42  ;;  %v1226_v26 = vpop.f32.mrb[14].mxu1 }
 0xeee   :  { %1960 = vtanh.f32 %v1230_v23  ;;  %v1227_v27 = vpop.f32.mrb[15].mxu1  ;;  %v1790_v1 = vmul.f32 -1.442695, %v1230_v23 }
 0xeef   :  { %1962 = vtanh.f32 %v1232_v25  ;;  %v1791_v37 = vmul.f32 -1.442695, %v1232_v25 }
 0xef0   :  { %1964 = vpow2.f32 %v1790_v1 }
 0xef1   :  { %1966 = vpow2.f32 %v1791_v37 }
 0xef8   :  { %v1961_v28 = vpop.eup %1960 }
 0xef9   :  { %v1963_v29 = vpop.eup %1962  ;;  %1247 = vrot.lane.b32.xlu0 %v1961_v28, %s2011_s0 }
 0xefa   :  { %1271 = vrot.lane.b32.xlu1 %v1963_v29, %s2011_s0  ;;  %v1965_v54 = vpop.eup %1964 }
 0xefb   :  { %v1967_v41 = vpop.eup %1966  ;;  %v1237_v42 = vadd.f32 1.0, %v1965_v54 }
 0xefc   :  { %v1265_v16 = vadd.f32 1.0, %v1967_v41 }
 0xefd   :  { %1242 = vrot.lane.b32.xlu0 %v1233_v33, %s2010_s14  ;;  %1968 = vrcp.f32 %v1237_v42 }
 0xefe   :  { %1970 = vrcp.f32 %v1265_v16 }
 0xf07   :  { %v1969_v44 = vpop.eup %1968 }
 0xf08   :  { %v1971_v47 = vpop.eup %1970 }
 0xf09   :  { %v1269_v48 = vmul.f32 %v1971_v47, %v1233_v33 }
 0xf6b   :  { %v1248_v46 = vpop.permute.xlu0 %1247 }
 0xf6c   :  { %v1250_v49 = vmul.f32 %v1969_v44, %v1248_v46  ;;  %v1272_v51 = vpop.permute.xlu1 %1271 }
 0xf6d   :  { %v1274_v53 = vmul.f32 %v1971_v47, %v1272_v51 }
 0xf6e   :  { %1252 = vrot.lane.b32.xlu1 %v1250_v49, %s2010_s14 }
 0xf6f   :  { %1276 = vrot.lane.b32.xlu0 %v1274_v53, %s2010_s14  ;;  %v1243_v55 = vpop.permute.xlu0 %1242 }
 0xf70   :  { %v1245_v50 = vmul.f32 %v1969_v44, %v1243_v55 }
 0xfe0   :  { %v1253_v5 = vpop.permute.xlu1 %1252 }
 0xfe1   :  { %v1255_v57 = vadd.f32 %v1253_v5, %v1245_v50  ;;  %v1277_v58 = vpop.permute.xlu0 %1276 }
 0xfe2   :  { %v1279_v7 = vadd.f32 %v1277_v58, %v1269_v48 }
 0xfe3   :  { %1972 = vtanh.f32 %v1255_v57 }
 0xfe4   :  { %1974 = vtanh.f32 %v1279_v7 }
 0xfed   :  { %v1973_v12 = vpop.eup %1972 }
 0xfee   :  { %v1975_v13 = vpop.eup %1974  ;;  %1258 = vrot.lane.b32.xlu1 %v1973_v12, %s2011_s0 }
 0xfef   :  { %1282 = vrot.lane.b32.xlu0 %v1975_v13, %s2011_s0 }
0x1060   :  { %v1259_v2 = vpop.permute.xlu1 %1258 }
0x1061   :  { %v2350_v4 = vmul.f32 %v1969_v44, %v1259_v2  ;;  %v1283_v6 = vpop.permute.xlu0 %1282 }
0x1062   :  { %v2352_v3 = vmul.f32 %v1971_v47, %v1283_v6 }
0x1063   :  { %1287 = vrot.lane.b32.xlu1 %v2350_v4, %s2010_s14 }
0x1064   :  { %1291 = vrot.lane.b32.xlu0 %v2352_v3, %s2011_s0 }
0x1067   :  { %1297 = vrot.lane.b32.xlu1 %v1255_v57, %s2012_s2 }
0x10d5   :  { %v1288_v8 = vpop.permute.xlu1 %1287 }
0x10d6   :  { %v1292_v32 = vpop.permute.xlu0 %1291 }
0x10d7   :  { %v1294_v10 = vsel %vm82_vm1, %v1288_v8, %v1292_v32 }
0x10d8   :  { %1295 = vst.msk [vmem:[#allocation3] sm:$0xff] %vm184_vm0, %v1294_v10 }
0x10d9   :  { %v1298_v61 = vpop.permute.xlu1 %1297 }
0x10da   :  { %v1300_v15 = vsel %vm82_vm1, %v1298_v61, %v1279_v7 }
0x10db   :  { %1301 = vst.msk [vmem:[#allocation4] sm:$0xff] %vm184_vm0, %v1300_v15 }
0x10df   :  { %v1318_v17 = vld [vmem:[#allocation3] sm:$0xff] }
0x10e0   :  { %v1319_v18 = vpack.c.bf16 %v1318_v17, %v1318_v17 }
0x10e2   :  { %1804 = vmatmul.mubr.msk.bf16.vlgmr.msra.gmra.mrb[24].mxu0 %vm184_vm0, %v1319_v18  ;;  %v1416_v29 = vld [vmem:[#allocation4] sm:$0xff] }
0x11b5   :  { %v1405_v19 = vpop.f32.mrb[24].mxu0 }
0x11b6   :  { %v1413_v21 = vadd.f32 %v1405_v19, %v2172_v59  ;;  %v1407_v23 = vpop.f32.mrb[25].mxu0 }
0x11b7   :  { %v1415_v24 = vadd.f32 %v1407_v23, %v2153_v34  ;;  %v1409_v25 = vpop.f32.mrb[26].mxu0 }
0x11b8   :  { %1976 = vtanh.f32 %v1413_v21  ;;  %v1410_v26 = vpop.f32.mrb[27].mxu0  ;;  %v1805_v33 = vmul.f32 -1.442695, %v1413_v21 }
0x11b9   :  { %1978 = vtanh.f32 %v1415_v24  ;;  %v1806_v1 = vmul.f32 -1.442695, %v1415_v24 }
0x11ba   :  { %1980 = vpow2.f32 %v1805_v33 }
0x11bb   :  { %1982 = vpow2.f32 %v1806_v1 }
0x11c2   :  { %v1977_v27 = vpop.eup %1976 }
0x11c3   :  { %v1979_v28 = vpop.eup %1978  ;;  %1430 = vrot.lane.b32.xlu0 %v1977_v27, %s2011_s0 }
0x11c4   :  { %1454 = vrot.lane.b32.xlu1 %v1979_v28, %s2011_s0  ;;  %v1981_v59 = vpop.eup %1980 }
0x11c5   :  { %v1983_v37 = vpop.eup %1982  ;;  %v1420_v34 = vadd.f32 1.0, %v1981_v59 }
0x11c6   :  { %v1448_v54 = vadd.f32 1.0, %v1983_v37 }
0x11c7   :  { %1425 = vrot.lane.b32.xlu0 %v1416_v29, %s2010_s14  ;;  %1984 = vrcp.f32 %v1420_v34 }
0x11c8   :  { %1986 = vrcp.f32 %v1448_v54 }
0x11d1   :  { %v1985_v41 = vpop.eup %1984 }
0x11d2   :  { %v1987_v16 = vpop.eup %1986 }
0x11d3   :  { %v1452_v55 = vmul.f32 %v1987_v16, %v1416_v29 }
0x1235   :  { %v1431_v42 = vpop.permute.xlu0 %1430 }
0x1236   :  { %v1433_v44 = vmul.f32 %v1985_v41, %v1431_v42  ;;  %v1455_v46 = vpop.permute.xlu1 %1454 }
0x1237   :  { %v1457_v47 = vmul.f32 %v1987_v16, %v1455_v46  ;;  %v1825_v46 = vpack.c.bf16 %v2184_v40, %v2184_v40  ;;  %v1829_v40 = vpack.c.bf16 %v2247_v31, %v2247_v31  ;;  %v1833_v31 = vpack.c.bf16 %v2302_v38, %v2302_v38 }
0x1238   :  { %1435 = vrot.lane.b32.xlu1 %v1433_v44, %s2010_s14 }
0x1239   :  { %1459 = vrot.lane.b32.xlu0 %v1457_v47, %s2010_s14  ;;  %v1426_v49 = vpop.permute.xlu0 %1425  ;;  %v1826_v47 = vpack.c.bf16 %v2189_v43, %v2189_v43  ;;  %v1830_v43 = vpack.c.bf16 %v2249_v35, %v2249_v35  ;;  %v1834_v35 = vpack.c.bf16 %v2304_v56, %v2304_v56 }
0x123a   :  { %v1428_v51 = vmul.f32 %v1985_v41, %v1426_v49  ;;  %v1827_v49 = vpack.c.bf16 %v2216_v36, %v2216_v36  ;;  %v1831_v36 = vpack.c.bf16 %v2278_v20, %v2278_v20  ;;  %v1835_v20 = vpack.c.bf16 %v2350_v4, %v2350_v4 }
0x12aa   :  { %v1436_v53 = vpop.permute.xlu1 %1435 }
0x12ab   :  { %v1438_v50 = vadd.f32 %v1436_v53, %v1428_v51  ;;  %v1460_v5 = vpop.permute.xlu0 %1459  ;;  %v1828_v51 = vpack.c.bf16 %v2218_v39, %v2218_v39  ;;  %v1832_v39 = vpack.c.bf16 %v2280_v22, %v2280_v22  ;;  %v1836_v22 = vpack.c.bf16 %v2352_v3, %v2352_v3 }
0x12ac   :  { %v1462_v48 = vadd.f32 %v1460_v5, %v1452_v55 }
0x12ad   :  { %1988 = vtanh.f32 %v1438_v50 }
0x12ae   :  { %1990 = vtanh.f32 %v1462_v48 }
0x12b7   :  { %v1989_v57 = vpop.eup %1988 }
0x12b8   :  { %v1991_v58 = vpop.eup %1990  ;;  %1441 = vrot.lane.b32.xlu1 %v1989_v57, %s2011_s0 }
0x12b9   :  { %1465 = vrot.lane.b32.xlu0 %v1991_v58, %s2011_s0 }
0x132a   :  { %v1442_v7 = vpop.permute.xlu1 %1441 }
0x132b   :  { %v2373_v9 = vmul.f32 %v1985_v41, %v1442_v7  ;;  %v1466_v11 = vpop.permute.xlu0 %1465 }
0x132c   :  { %v2375_v12 = vmul.f32 %v1987_v16, %v1466_v11 }
0x132d   :  { %1470 = vrot.lane.b32.xlu1 %v2373_v9, %s2010_s14  ;;  %v1837_v38 = vpack.c.bf16 %v2373_v9, %v2373_v9 }
0x132e   :  { %1474 = vrot.lane.b32.xlu0 %v2375_v12, %s2011_s0  ;;  %v1838_v56 = vpack.c.bf16 %v2375_v12, %v2375_v12 }
0x1331   :  { %1480 = vrot.lane.b32.xlu1 %v1438_v50, %s2012_s2 }
0x139f   :  { %v1471_v13 = vpop.permute.xlu1 %1470 }
0x13a0   :  { %v1475_v14 = vpop.permute.xlu0 %1474 }
0x13a1   :  { %v1477_v45 = vsel %vm82_vm1, %v1471_v13, %v1475_v14 }
0x13a2   :  { %1478 = vst.msk [vmem:[#allocation3] sm:$0xff] %vm184_vm0, %v1477_v45 }
0x13a3   :  { %v1481_v52 = vpop.permute.xlu1 %1480 }
0x13a4   :  { %v1483_v60 = vsel %vm82_vm1, %v1481_v52, %v1462_v48 }
0x13a5   :  { %1484 = vst.msk [vmem:[#allocation4] sm:$0xff] %vm184_vm0, %v1483_v60 }
0x13a9   :  { %v1501_v62 = vld [vmem:[#allocation3] sm:$0xff] }
0x13aa   :  { %v1502_v0 = vpack.c.bf16 %v1501_v62, %v1501_v62 }
0x13ac   :  { %1819 = vmatmul.mubr.msk.bf16.vlgmr.msra.gmra.mrb[16].mxu1 %vm184_vm0, %v1502_v0  ;;  %v1599_v18 = vld [vmem:[#allocation4] sm:$0xff] }
0x147f   :  { %v1588_v2 = vpop.f32.mrb[16].mxu1 }
0x1480   :  { %v1596_v6 = vadd.f32 %v1588_v2, %v2176_v63  ;;  %v1590_v8 = vpop.f32.mrb[17].mxu1 }
0x1481   :  { %v1598_v32 = vadd.f32 %v1590_v8, %v2149_v30  ;;  %v1592_v10 = vpop.f32.mrb[18].mxu1 }
0x1482   :  { %1992 = vtanh.f32 %v1596_v6  ;;  %v1593_v61 = vpop.f32.mrb[19].mxu1  ;;  %v1820_v19 = vmul.f32 -1.442695, %v1596_v6 }
0x1483   :  { %1994 = vtanh.f32 %v1598_v32  ;;  %v1821_v21 = vmul.f32 -1.442695, %v1598_v32 }
0x1484   :  { %1996 = vpow2.f32 %v1820_v19 }
0x1485   :  { %1998 = vpow2.f32 %v1821_v21 }
0x148c   :  { %v1993_v15 = vpop.eup %1992 }
0x148d   :  { %v1995_v17 = vpop.eup %1994  ;;  %1613 = vrot.lane.b32.xlu0 %v1993_v15, %s2011_s0 }
0x148e   :  { %1637 = vrot.lane.b32.xlu1 %v1995_v17, %s2011_s0  ;;  %v1997_v63 = vpop.eup %1996 }
0x148f   :  { %v1999_v23 = vpop.eup %1998  ;;  %v1603_v30 = vadd.f32 1.0, %v1997_v63 }
0x1490   :  { %v1631_v24 = vadd.f32 1.0, %v1999_v23 }
0x1491   :  { %1608 = vrot.lane.b32.xlu0 %v1599_v18, %s2010_s14  ;;  %2000 = vrcp.f32 %v1603_v30 }
0x1492   :  { %2002 = vrcp.f32 %v1631_v24 }
0x149b   :  { %v2001_v25 = vpop.eup %2000 }
0x149c   :  { %v2003_v27 = vpop.eup %2002 }
0x149d   :  { %v1635_v34 = vmul.f32 %v2003_v27, %v1599_v18 }
0x14ff   :  { %v1614_v26 = vpop.permute.xlu0 %1613 }
0x1500   :  { %v1616_v28 = vmul.f32 %v2001_v25, %v1614_v26  ;;  %v1638_v29 = vpop.permute.xlu1 %1637 }
0x1501   :  { %v1640_v33 = vmul.f32 %v2003_v27, %v1638_v29 }
0x1502   :  { %1618 = vrot.lane.b32.xlu1 %v1616_v28, %s2010_s14 }
0x1503   :  { %1642 = vrot.lane.b32.xlu0 %v1640_v33, %s2010_s14  ;;  %v1609_v1 = vpop.permute.xlu0 %1608 }
0x1504   :  { %v1611_v59 = vmul.f32 %v2001_v25, %v1609_v1 }
0x1574   :  { %v1619_v37 = vpop.permute.xlu1 %1618 }
0x1575   :  { %v1621_v54 = vadd.f32 %v1619_v37, %v1611_v59  ;;  %v1643_v41 = vpop.permute.xlu0 %1642 }
0x1576   :  { %v2394_v42 = vadd.f32 %v1643_v41, %v1635_v34 }
0x1577   :  { %2004 = vtanh.f32 %v1621_v54 }
0x1578   :  { %2006 = vtanh.f32 %v2394_v42 }
0x1581   :  { %v2005_v16 = vpop.eup %2004 }
0x1582   :  { %v2007_v44 = vpop.eup %2006  ;;  %1624 = vrot.lane.b32.xlu1 %v2005_v16, %s2011_s0 }
0x1583   :  { %1648 = vrot.lane.b32.xlu0 %v2007_v44, %s2011_s0 }
0x1586   :  { %364 = vrot.lane.b32.xlu1 %v1825_v46, %s2010_s14 }
0x1587   :  { %373 = vrot.lane.b32.xlu0 %v1826_v47, %s2011_s0 }
0x158a   :  { %556 = vrot.lane.b32.xlu1 %v1827_v49, %s2010_s14 }
0x158b   :  { %565 = vrot.lane.b32.xlu0 %v1828_v51, %s2011_s0 }
0x158e   :  { %747 = vrot.lane.b32.xlu1 %v1829_v40, %s2010_s14 }
0x158f   :  { %756 = vrot.lane.b32.xlu0 %v1830_v43, %s2011_s0 }
0x1592   :  { %938 = vrot.lane.b32.xlu1 %v1831_v36, %s2010_s14 }
0x1593   :  { %947 = vrot.lane.b32.xlu0 %v1832_v39, %s2011_s0 }
0x1596   :  { %1663 = vrot.lane.b32.xlu1 %v1621_v54, %s2012_s2 }
0x1597   :  { %1123 = vrot.lane.b32.xlu0 %v1833_v31, %s2010_s14 }
0x159a   :  { %1131 = vrot.lane.b32.xlu1 %v1834_v35, %s2011_s0 }
0x159b   :  { %1306 = vrot.lane.b32.xlu0 %v1835_v20, %s2010_s14 }
0x159e   :  { %1314 = vrot.lane.b32.xlu1 %v1836_v22, %s2011_s0 }
0x159f   :  { %1489 = vrot.lane.b32.xlu0 %v1837_v38, %s2010_s14 }
0x15a2   :  { %1497 = vrot.lane.b32.xlu1 %v1838_v56, %s2011_s0 }
0x15f4   :  { %v1625_v4 = vpop.permute.xlu1 %1624 }
0x15f5   :  { %v1627_v53 = vmul.f32 %v2001_v25, %v1625_v4  ;;  %v1649_v55 = vpop.permute.xlu0 %1648 }
0x15f6   :  { %v1651_v50 = vmul.f32 %v2003_v27, %v1649_v55 }
0x15f7   :  { %1653 = vrot.lane.b32.xlu1 %v1627_v53, %s2010_s14  ;;  %v1839_v57 = vpack.c.bf16 %v1627_v53, %v1627_v53 }
0x15f8   :  { %v1840_v3 = vpack.c.bf16 %v1651_v50, %v1651_v50  ;;  %1657 = vrot.lane.b32.xlu0 %v1651_v50, %s2011_s0  ;;  %v365_v5 = vpop.permute.xlu1 %364 }
0x15f9   :  { %368 = vst.msk [vmem:[%s2519_s4] sm:$0xf] %vm367_vm2, %v365_v5  ;;  %v374_v48 = vpop.permute.xlu0 %373 }
0x15fa   :  { %1720 = vst.msk [vmem:[%s2519_s4 + $0x1c] sm:$0xf] %vm377_vm3, %v374_v48 }
0x15fb   :  { %1680 = vrot.lane.b32.xlu1 %v1840_v3, %s2011_s0 }
0x15fc   :  { %1672 = vrot.lane.b32.xlu0 %v1839_v57, %s2010_s14  ;;  %v557_v58 = vpop.permute.xlu1 %556 }
0x15fd   :  { %1733 = vst.msk [vmem:[%s2519_s4 + $0x4] sm:$0xf] %vm367_vm2, %v557_v58  ;;  %v566_v7 = vpop.permute.xlu0 %565 }
0x15fe   :  { %1735 = vst.msk [vmem:[%s2519_s4 + $0x18] sm:$0xf] %vm377_vm3, %v566_v7 }
0x1600   :  { %v748_v9 = vpop.permute.xlu1 %747 }
0x1601   :  { %1748 = vst.msk [vmem:[%s2519_s4 + $0x8] sm:$0xf] %vm367_vm2, %v748_v9  ;;  %v757_v11 = vpop.permute.xlu0 %756 }
0x1602   :  { %1750 = vst.msk [vmem:[%s2519_s4 + $0x14] sm:$0xf] %vm377_vm3, %v757_v11 }
0x1604   :  { %v939_v12 = vpop.permute.xlu1 %938 }
0x1605   :  { %1763 = vst.msk [vmem:[%s2519_s4 + $0xc] sm:$0xf] %vm367_vm2, %v939_v12  ;;  %v948_v13 = vpop.permute.xlu0 %947 }
0x1606   :  { %1765 = vst.msk [vmem:[%s2519_s4 + $0x10] sm:$0xf] %vm377_vm3, %v948_v13 }
0x1608   :  { %v1664_v14 = vpop.permute.xlu1 %1663 }
0x1609   :  { %v1666_v45 = vsel %vm82_vm1, %v1664_v14, %v2394_v42  ;;  %v1124_v52 = vpop.permute.xlu0 %1123 }
0x160a   :  { %1667 = vst.msk [vmem:[#allocation4] sm:$0xff] %vm184_vm0, %v1666_v45 }
0x160b   :  { %1778 = vst.msk [vmem:[%s2519_s4 + $0x10] sm:$0xf] %vm367_vm2, %v1124_v52 }
0x160c   :  { %v1132_v60 = vpop.permute.xlu1 %1131 }
0x160d   :  { %1780 = vst.msk [vmem:[%s2519_s4 + $0xc] sm:$0xf] %vm377_vm3, %v1132_v60  ;;  %v1307_v62 = vpop.permute.xlu0 %1306 }
0x160e   :  { %1793 = vst.msk [vmem:[%s2519_s4 + $0x14] sm:$0xf] %vm367_vm2, %v1307_v62 }
0x1610   :  { %v1315_v0 = vpop.permute.xlu1 %1314 }
0x1611   :  { %1795 = vst.msk [vmem:[%s2519_s4 + $0x8] sm:$0xf] %vm377_vm3, %v1315_v0  ;;  %v1490_v2 = vpop.permute.xlu0 %1489 }
0x1612   :  { %1808 = vst.msk [vmem:[%s2519_s4 + $0x18] sm:$0xf] %vm367_vm2, %v1490_v2 }
0x1614   :  { %v1498_v6 = vpop.permute.xlu1 %1497 }
0x1615   :  { %1810 = vst.msk [vmem:[%s2519_s4 + $0x4] sm:$0xf] %vm377_vm3, %v1498_v6 }
0x1669   :  { %v1654_v8 = vpop.permute.xlu1 %1653 }
0x166a   :  { %v1658_v32 = vpop.permute.xlu0 %1657 }
0x166b   :  { %v1660_v10 = vsel %vm82_vm1, %v1654_v8, %v1658_v32 }
0x166c   :  { %1661 = vst.msk [vmem:[#allocation3] sm:$0xff] %vm184_vm0, %v1660_v10 }
0x166d   :  { %v1681_v61 = vpop.permute.xlu1 %1680 }
0x166e   :  { %1683 = vst.msk [vmem:[%s2519_s4] sm:$0xf] %vm377_vm3, %v1681_v61  ;;  %v1673_v15 = vpop.permute.xlu0 %1672 }
0x166f   :  { %1823 = vst.msk [vmem:[%s2519_s4 + $0x1c] sm:$0xf] %vm367_vm2, %v1673_v15 }

// kernel: lstm_model_forward.3
= control target key start
LH: loop header
LB: loop body
LE: loop exit
PB: predicated region body
PF: predicated region fallthrough
CT: control target
= control target key end

     0   :  { %vm112_vm0 = vcmask 523264   ;;  %v2126_v1 = vmov 0   ;;  %v2127_v2 = vmov 0.0   ;;  %s2128_s22 = smov 32   ;;  %v42_v24 = vlaneseq  ;;  %s2130_s13 = smov 96   ;;  %s2593_s1 = inlined_call_operand.vmem [shape: bf16[64,256], index: 1, kind: input, shape index: {}]   ;;  %s2594_s0 = inlined_call_operand.vmem [shape: bf16[64,64], index: 0, kind: input, shape index: {}]   ;;  %s2595_s3 = inlined_call_operand.vmem [shape: bf16[64,256], index: 3, kind: input, shape index: {}]   ;;  %s2596_s2 = inlined_call_operand.vmem [shape: f32[1,256], index: 2, kind: input, shape index: {}]   ;;  %s2597_s4 = inlined_call_operand.vmem [shape: f32[64,128], index: 4, kind: input, shape index: {}]   ;;  %s2598_s5 = inlined_call_operand.vmem [shape: f32[1,128], index: 5, kind: input, shape index: {}]   ;;  %s2599_s6 = inlined_call_operand.vmem [shape: f32[64,128], index: 6, kind: output, shape index: {}]  }
   0x1   :  { %v1958_v0 = vld [vmem:[%s2593_s1 + $0x4] ss:$8 sps:$4 sm:$0xff]   ;;  %177 = vmatprep.mubr.bf16.mxu1 %v2126_v1  ;;  %157 = vmatprep.mubr.bf16.mxu0 %v2126_v1  ;;  %214 = vst.msk [vmem:[#allocation3] sm:$0xff] %vm112_vm0, %v2127_v2  ;;  %215 = vst.msk [vmem:[#allocation4] sm:$0xff] %vm112_vm0, %v2127_v2  ;;  %v1960_v3 = vld [vmem:[%s2593_s1] ss:$8 sps:$4 sm:$0xff]  }
   0x2   :  { %1945 = vmatprep.subr.bf16.mxu1 %v1958_v0  ;;  %v1961_v4 = vld [vmem:[%s2593_s1 + $0x14] ss:$8 sps:$4 sm:$0xff]   ;;  %125 = vmatprep.subr.bf16.mxu0 %v1958_v0  ;;  %v1963_v5 = vld [vmem:[%s2593_s1 + $0x10] ss:$8 sps:$4 sm:$0xff]   ;;  %v1964_v6 = vld [vmem:[%s2593_s1 + $0x24] ss:$8 sps:$4 sm:$0xff]  }
   0x3   :  { %1949 = vmatpush1.bf16.msra.mxu1 %v1960_v3  ;;  %126 = vmatpush1.bf16.msra.mxu0 %v1960_v3  ;;  %v1966_v7 = vld [vmem:[%s2593_s1 + $0x20] ss:$8 sps:$4 sm:$0xff]   ;;  %v1967_v8 = vld [vmem:[%s2593_s1 + $0x34] ss:$8 sps:$4 sm:$0xff]   ;;  %v1969_v9 = vld [vmem:[%s2593_s1 + $0x30] ss:$8 sps:$4 sm:$0xff]  }
   0x4   :  { %1946 = vmatprep.subr.bf16.mxu1 %v1961_v4  ;;  %127 = vmatprep.subr.bf16.mxu0 %v1961_v4  ;;  %v2197_v10 = vld [vmem:[%s2595_s3 + $0x4] ss:$8 sps:$4 sm:$0xff]   ;;  %v1970_v11 = vld [vmem:[%s2594_s0 + $0x10] sm:$0xff]   ;;  %v2205_v12 = vld [vmem:[%s2595_s3] ss:$8 sps:$4 sm:$0xff]   ;;  %v43_v31 = vshrl.u32 %v42_v24, 7 }
   0x5   :  { %v2210_v13 = vld [vmem:[%s2595_s3 + $0x14] ss:$8 sps:$4 sm:$0xff]   ;;  %v1981_v14 = vld [vmem:[%s2594_s0] sm:$0xff]   ;;  %v2227_v16 = vld [vmem:[%s2595_s3 + $0x10] ss:$8 sps:$4 sm:$0xff]   ;;  %vm381_vm1 = vcmask 261120  }
   0x6   :  { %v2234_v17 = vld [vmem:[%s2595_s3 + $0x24] ss:$8 sps:$4 sm:$0xff]   ;;  %v1977_v18 = vld [vmem:[%s2594_s0 + $0x18] sm:$0xff]   ;;  %v2246_v19 = vld [vmem:[%s2595_s3 + $0x20] ss:$8 sps:$4 sm:$0xff]   ;;  %v44_v34 = vsub.s32 0, %v43_v31 }
   0x7   :  { %1950 = vmatpush1.bf16.msra.mxu1 %v1963_v5  ;;  %128 = vmatpush1.bf16.msra.mxu0 %v1963_v5  ;;  %v2252_v20 = vld [vmem:[%s2595_s3 + $0x34] ss:$8 sps:$4 sm:$0xff]   ;;  %v2261_v21 = vld [vmem:[%s2595_s3 + $0x30] ss:$8 sps:$4 sm:$0xff]   ;;  %v40_v35 = vld [vmem:[%s2596_s2] sm:$0x3] }
   0x8   :  { %1947 = vmatprep.subr.bf16.mxu1 %v1964_v6  ;;  %129 = vmatprep.subr.bf16.mxu0 %v1964_v6  ;;  %v2215_v15 = vld [vmem:[#allocation4] sm:$0xff]  ;;  %v216_v22 = vld [vmem:[#allocation3] sm:$0xff]  ;;  %v48_v38 = vsub.s32 1, %v43_v31  ;;  %v2304_v40 = vrot.slane %v40_v35, %v44_v34  ;;  %s2129_s2 = smov 64   ;;  %vm392_vm2 = vcmask 523520  }
   0x9   :  { %329 = vrot.lane.b32.xlu1 %v2215_v15, %s2128_s22  ;;  %v217_v23 = vpack.c.bf16 %v216_v22, %v216_v22 }
   0xa   :  { %v2307_v43 = vrot.slane %v40_v35, %v48_v38 }
   0xb   :  { %1951 = vmatpush1.bf16.msra.mxu1 %v1966_v7  ;;  %130 = vmatpush1.bf16.msra.mxu0 %v1966_v7 }
   0xc   :  { %1948 = vmatprep.subr.bf16.mxu1 %v1967_v8  ;;  %131 = vmatprep.subr.bf16.mxu0 %v1967_v8 }
   0xf   :  { %1952 = vmatpush1.bf16.msra.mxu1 %v1969_v9  ;;  %132 = vmatpush1.bf16.msra.mxu0 %v1969_v9 }
  0x10   :  { %269 = vmatprep.subr.bf16.mxu1 %v2197_v10  ;;  %624 = vmatprep.subr.bf16.mxu0 %v2197_v10 }
  0x12   :  { %1786 = vmatmul.mubr.msk.bf16.vlgmr.msra.gmra.mrb[0].mxu1 %vm112_vm0, %v1970_v11  ;;  %1784 = vmatmul.mubr.msk.bf16.vlgmr.msra.gmra.mrb[0].mxu0 %vm112_vm0, %v1981_v14 }
  0x13   :  { %270 = vmatpush1.bf16.msra.mxu1 %v2205_v12  ;;  %187 = vmatprep.mubr.bf16.mxu1 %v2126_v1 }
  0x14   :  { %271 = vmatprep.subr.bf16.mxu1 %v2210_v13  ;;  %625 = vmatpush1.bf16.msra.mxu0 %v2205_v12 }
  0x15   :  { %626 = vmatprep.subr.bf16.mxu0 %v2210_v13  ;;  %167 = vmatprep.mubr.bf16.mxu0 %v2126_v1 }
  0x17   :  { %272 = vmatpush1.bf16.msra.mxu1 %v2227_v16 }
  0x18   :  { %273 = vmatprep.subr.bf16.mxu1 %v2234_v17  ;;  %627 = vmatpush1.bf16.msra.mxu0 %v2227_v16 }
  0x19   :  { %628 = vmatprep.subr.bf16.mxu0 %v2234_v17 }
  0x1a   :  { %1787 = vmatmul.mubr.msk.bf16.gmra.mrb[4].mxu1 %vm112_vm0, %v1977_v18 }
  0x1b   :  { %274 = vmatpush1.bf16.msra.mxu1 %v2246_v19  ;;  %301 = vmatprep.mubr.bf16.mxu1 %v2126_v1 }
  0x1c   :  { %275 = vmatprep.subr.bf16.mxu1 %v2252_v20  ;;  %629 = vmatpush1.bf16.msra.mxu0 %v2246_v19 }
  0x1d   :  { %630 = vmatprep.subr.bf16.mxu0 %v2252_v20 }
  0x1f   :  { %276 = vmatpush1.bf16.msra.mxu1 %v2261_v21 }
  0x20   :  { %447 = vmatprep.subr.bf16.mxu1 %v2197_v10  ;;  %631 = vmatpush1.bf16.msra.mxu0 %v2261_v21 }
  0x21   :  { %978 = vmatprep.subr.bf16.mxu0 %v2197_v10 }
  0x22   :  { %1796 = vmatmul.mubr.msk.bf16.vlgmr.msra.gmra.mrb[8].mxu1 %vm112_vm0, %v217_v23 }
  0x23   :  { %448 = vmatpush1.bf16.msra.mxu1 %v2205_v12  ;;  %479 = vmatprep.mubr.bf16.mxu1 %v2126_v1 }
  0x24   :  { %449 = vmatprep.subr.bf16.mxu1 %v2210_v13 }
  0x27   :  { %450 = vmatpush1.bf16.msra.mxu1 %v2227_v16 }
  0x28   :  { %451 = vmatprep.subr.bf16.mxu1 %v2234_v17 }
  0x2b   :  { %452 = vmatpush1.bf16.msra.mxu1 %v2246_v19 }
  0x2c   :  { %453 = vmatprep.subr.bf16.mxu1 %v2252_v20 }
  0x2f   :  { %454 = vmatpush1.bf16.msra.mxu1 %v2261_v21 }
  0x30   :  { %801 = vmatprep.subr.bf16.mxu1 %v2197_v10 }
  0x7b   :  { %v330_v2 = vpop.permute.xlu1 %329 }
  0xe5   :  { %v2281_v25 = vpop.f32.mrb[0].mxu1  ;;  %v159_v26 = vpop.f32.mrb[0].mxu0 }
  0xe6   :  { %v2283_v27 = vpop.f32.mrb[1].mxu1  ;;  %v2285_v28 = vpop.f32.mrb[1].mxu0  ;;  %v160_v42 = vadd.f32 %v159_v26, %v2304_v40 }
  0xe7   :  { %v2287_v29 = vpop.f32.mrb[2].mxu1  ;;  %v2289_v30 = vpop.f32.mrb[2].mxu0 }
  0xe8   :  { %v2291_v32 = vpop.f32.mrb[3].mxu1  ;;  %v2293_v33 = vpop.f32.mrb[3].mxu0 }
  0xed   :  { %v2298_v36 = vpop.f32.mrb[4].mxu1 }
  0xee   :  { %v2300_v37 = vpop.f32.mrb[5].mxu1 }
  0xef   :  { %v2302_v39 = vpop.f32.mrb[6].mxu1 }
  0xf0   :  { %v195_v41 = vpop.f32.mrb[7].mxu1 }
  0xf1   :  { %v196_v44 = vadd.f32 %v195_v41, %v2307_v43  ;;  %v164_v41 = vadd.f32 %v2289_v30, %v2304_v40 }
  0xf5   :  { %v303_v45 = vpop.f32.mrb[8].mxu1 }
  0xf6   :  { %v314_v46 = vadd.f32 %v303_v45, %v160_v42  ;;  %v305_v47 = vpop.f32.mrb[9].mxu1  ;;  %v192_v42 = vadd.f32 %v2300_v37, %v2307_v43 }
  0xf7   :  { %v319_v48 = vadd.f32 %v305_v47, %v196_v44  ;;  %v307_v49 = vpop.f32.mrb[10].mxu1 }
  0xf8   :  { %1998 = vtanh.f32 %v314_v46  ;;  %v308_v50 = vpop.f32.mrb[11].mxu1  ;;  %v1797_v53 = vmul.f32 -1.442695, %v314_v46 }
  0xf9   :  { %2000 = vtanh.f32 %v319_v48  ;;  %v1798_v54 = vmul.f32 -1.442695, %v319_v48 }
  0xfa   :  { %2002 = vpow2.f32 %v1797_v53 }
  0xfb   :  { %2004 = vpow2.f32 %v1798_v54 }
 0x102   :  { %v1999_v51 = vpop.eup %1998 }
 0x103   :  { %334 = vrot.lane.b32.xlu0 %v1999_v51, %s2129_s2  ;;  %v2001_v52 = vpop.eup %2000 }
 0x104   :  { %v2003_v55 = vpop.eup %2002 }
 0x105   :  { %v324_v56 = vadd.f32 1.0, %v2003_v55  ;;  %v2005_v57 = vpop.eup %2004 }
 0x106   :  { %v352_v58 = vadd.f32 1.0, %v2005_v57 }
 0x107   :  { %358 = vrot.lane.b32.xlu0 %v2001_v52, %s2129_s2  ;;  %2006 = vrcp.f32 %v324_v56 }
 0x108   :  { %2008 = vrcp.f32 %v352_v58 }
 0x111   :  { %v2007_v59 = vpop.eup %2006 }
 0x112   :  { %v2009_v62 = vpop.eup %2008  ;;  %v332_v3 = vmul.f32 %v2007_v59, %v330_v2 }
 0x113   :  { %v356_v6 = vmul.f32 %v2009_v62, %v2215_v15 }
 0x175   :  { %v335_v60 = vpop.permute.xlu0 %334 }
 0x176   :  { %v337_v61 = vmul.f32 %v2007_v59, %v335_v60 }
 0x178   :  { %339 = vrot.lane.b32.xlu1 %v337_v61, %s2128_s22 }
 0x179   :  { %v359_v63 = vpop.permute.xlu0 %358 }
 0x17a   :  { %v361_v0 = vmul.f32 %v2009_v62, %v359_v63 }
 0x17c   :  { %363 = vrot.lane.b32.xlu0 %v361_v0, %s2128_s22 }
 0x1ea   :  { %v340_v4 = vpop.permute.xlu1 %339 }
 0x1eb   :  { %v342_v5 = vadd.f32 %v340_v4, %v332_v3 }
 0x1ed   :  { %2010 = vtanh.f32 %v342_v5 }
 0x1ee   :  { %v364_v7 = vpop.permute.xlu0 %363 }
 0x1ef   :  { %v366_v8 = vadd.f32 %v364_v7, %v356_v6 }
 0x1f1   :  { %2012 = vtanh.f32 %v366_v8 }
 0x1f7   :  { %v2011_v9 = vpop.eup %2010 }
 0x1f8   :  { %345 = vrot.lane.b32.xlu1 %v2011_v9, %s2129_s2 }
 0x1fb   :  { %v2013_v11 = vpop.eup %2012 }
 0x1fc   :  { %369 = vrot.lane.b32.xlu0 %v2013_v11, %s2129_s2 }
 0x26a   :  { %v346_v14 = vpop.permute.xlu1 %345 }
 0x26b   :  { %v348_v18 = vmul.f32 %v2007_v59, %v346_v14 }
 0x26d   :  { %374 = vrot.lane.b32.xlu1 %v348_v18, %s2128_s22 }
 0x26e   :  { %v370_v22 = vpop.permute.xlu0 %369 }
 0x26f   :  { %v372_v23 = vmul.f32 %v2009_v62, %v370_v22 }
 0x271   :  { %378 = vrot.lane.b32.xlu0 %v372_v23, %s2129_s2  ;;  %385 = vrot.lane.b32.xlu1 %v342_v5, %s2130_s13 }
 0x2df   :  { %v375_v15 = vpop.permute.xlu1 %374 }
 0x2e0   :  { %390 = vst.msk [vmem:[#allocation5] sm:$0xff] %vm381_vm1, %v375_v15 }
 0x2e3   :  { %v379_v24 = vpop.permute.xlu0 %378  ;;  %v386_v26 = vpop.permute.xlu1 %385 }
 0x2e4   :  { %v382_v31 = vsel %vm381_vm1, %v375_v15, %v379_v24  ;;  %393 = vst.msk [vmem:[#allocation5 + $0x38] sm:$0xff] %vm392_vm2, %v379_v24  ;;  %v388_v34 = vsel %vm381_vm1, %v386_v26, %v366_v8  ;;  %v1985_v8 = vld [vmem:[%s2594_s0 + $0x8] sm:$0xff]  }
 0x2e5   :  { %383 = vst.msk [vmem:[#allocation3] sm:$0xff] %vm112_vm0, %v382_v31  ;;  %389 = vst.msk [vmem:[#allocation4] sm:$0xff] %vm112_vm0, %v388_v34  ;;  %1785 = vmatmul.mubr.msk.bf16.gmra.mrb[4].mxu0 %vm112_vm0, %v1985_v8 }
 0x2e6   :  { %656 = vmatprep.mubr.bf16.mxu0 %v2126_v1 }
 0x2ec   :  { %v394_v35 = vld [vmem:[#allocation3] sm:$0xff] }
 0x2ed   :  { %v395_v38 = vpack.c.bf16 %v394_v35, %v394_v35 }
 0x2ef   :  { %1807 = vmatmul.mubr.msk.bf16.vlgmr.msra.gmra.mrb[12].mxu1 %vm112_vm0, %v395_v38 }
 0x2f0   :  { %802 = vmatpush1.bf16.msra.mxu1 %v2205_v12  ;;  %833 = vmatprep.mubr.bf16.mxu1 %v2126_v1 }
 0x2f1   :  { %803 = vmatprep.subr.bf16.mxu1 %v2210_v13 }
 0x2f4   :  { %804 = vmatpush1.bf16.msra.mxu1 %v2227_v16 }
 0x2f5   :  { %805 = vmatprep.subr.bf16.mxu1 %v2234_v17 }
 0x2f8   :  { %806 = vmatpush1.bf16.msra.mxu1 %v2246_v19 }
 0x2f9   :  { %807 = vmatprep.subr.bf16.mxu1 %v2252_v20 }
 0x2fc   :  { %808 = vmatpush1.bf16.msra.mxu1 %v2261_v21 }
 0x2fd   :  { %1147 = vmatprep.subr.bf16.mxu1 %v2197_v10  ;;  %v498_v10 = vld [vmem:[#allocation4] sm:$0xff] }
 0x3b8   :  { %v169_v35 = vpop.f32.mrb[4].mxu0 }
 0x3b9   :  { %v2370_v38 = vpop.f32.mrb[5].mxu0 }
 0x3c2   :  { %v481_v44 = vpop.f32.mrb[12].mxu1 }
 0x3c3   :  { %v492_v45 = vadd.f32 %v481_v44, %v164_v41  ;;  %v483_v46 = vpop.f32.mrb[13].mxu1  ;;  %v2372_v41 = vpop.f32.mrb[6].mxu0  ;;  %v170_v44 = vadd.f32 %v169_v35, %v2304_v40 }
 0x3c4   :  { %v497_v47 = vadd.f32 %v483_v46, %v192_v42  ;;  %v485_v48 = vpop.f32.mrb[14].mxu1  ;;  %v2374_v42 = vpop.f32.mrb[7].mxu0  ;;  %v174_v35 = vadd.f32 %v2372_v41, %v2304_v40 }
 0x3c5   :  { %2014 = vtanh.f32 %v492_v45  ;;  %v486_v49 = vpop.f32.mrb[15].mxu1  ;;  %v1808_v30 = vmul.f32 -1.442695, %v492_v45  ;;  %v186_v45 = vadd.f32 %v2291_v32, %v2307_v43 }
 0x3c6   :  { %2016 = vtanh.f32 %v497_v47  ;;  %v1809_v52 = vmul.f32 -1.442695, %v497_v47 }
 0x3c7   :  { %2018 = vpow2.f32 %v1808_v30 }
 0x3c8   :  { %2020 = vpow2.f32 %v1809_v52 }
 0x3cf   :  { %v2015_v50 = vpop.eup %2014 }
 0x3d0   :  { %v2017_v51 = vpop.eup %2016  ;;  %512 = vrot.lane.b32.xlu0 %v2015_v50, %s2129_s2 }
 0x3d1   :  { %536 = vrot.lane.b32.xlu1 %v2017_v51, %s2129_s2  ;;  %v2019_v37 = vpop.eup %2018 }
 0x3d2   :  { %v2021_v53 = vpop.eup %2020  ;;  %v502_v54 = vadd.f32 1.0, %v2019_v37 }
 0x3d3   :  { %v530_v55 = vadd.f32 1.0, %v2021_v53 }
 0x3d4   :  { %507 = vrot.lane.b32.xlu0 %v498_v10, %s2128_s22  ;;  %2022 = vrcp.f32 %v502_v54 }
 0x3d5   :  { %2024 = vrcp.f32 %v530_v55 }
 0x3de   :  { %v2023_v56 = vpop.eup %2022 }
 0x3df   :  { %v2025_v58 = vpop.eup %2024 }
 0x3e0   :  { %v534_v2 = vmul.f32 %v2025_v58, %v498_v10 }
 0x442   :  { %v513_v57 = vpop.permute.xlu0 %512 }
 0x443   :  { %v515_v59 = vmul.f32 %v2023_v56, %v513_v57  ;;  %v537_v60 = vpop.permute.xlu1 %536 }
 0x444   :  { %v539_v61 = vmul.f32 %v2025_v58, %v537_v60 }
 0x445   :  { %517 = vrot.lane.b32.xlu1 %v515_v59, %s2128_s22 }
 0x446   :  { %541 = vrot.lane.b32.xlu0 %v539_v61, %s2128_s22  ;;  %v508_v62 = vpop.permute.xlu0 %507 }
 0x447   :  { %v510_v63 = vmul.f32 %v2023_v56, %v508_v62 }
 0x4b7   :  { %v518_v0 = vpop.permute.xlu1 %517 }
 0x4b8   :  { %v520_v3 = vadd.f32 %v518_v0, %v510_v63  ;;  %v542_v4 = vpop.permute.xlu0 %541 }
 0x4b9   :  { %v544_v5 = vadd.f32 %v542_v4, %v534_v2 }
 0x4ba   :  { %2026 = vtanh.f32 %v520_v3 }
 0x4bb   :  { %2028 = vtanh.f32 %v544_v5 }
 0x4c4   :  { %v2027_v6 = vpop.eup %2026 }
 0x4c5   :  { %v2029_v7 = vpop.eup %2028  ;;  %523 = vrot.lane.b32.xlu1 %v2027_v6, %s2129_s2 }
 0x4c6   :  { %547 = vrot.lane.b32.xlu0 %v2029_v7, %s2129_s2 }
 0x537   :  { %v524_v9 = vpop.permute.xlu1 %523 }
 0x538   :  { %v526_v11 = vmul.f32 %v2023_v56, %v524_v9  ;;  %v548_v14 = vpop.permute.xlu0 %547 }
 0x539   :  { %v550_v18 = vmul.f32 %v2025_v58, %v548_v14 }
 0x53a   :  { %552 = vrot.lane.b32.xlu1 %v526_v11, %s2128_s22 }
 0x53b   :  { %556 = vrot.lane.b32.xlu0 %v550_v18, %s2129_s2 }
 0x53e   :  { %562 = vrot.lane.b32.xlu1 %v520_v3, %s2130_s13 }
 0x5ac   :  { %v553_v22 = vpop.permute.xlu1 %552 }
 0x5ad   :  { %568 = vst.msk [vmem:[#allocation5 + $0x8] sm:$0xff] %vm381_vm1, %v553_v22  ;;  %v557_v23 = vpop.permute.xlu0 %556 }
 0x5ae   :  { %v559_v15 = vsel %vm381_vm1, %v553_v22, %v557_v23  ;;  %570 = vst.msk [vmem:[#allocation5 + $0x30] sm:$0xff] %vm392_vm2, %v557_v23 }
 0x5af   :  { %560 = vst.msk [vmem:[#allocation3] sm:$0xff] %vm112_vm0, %v559_v15 }
 0x5b0   :  { %v563_v24 = vpop.permute.xlu1 %562 }
 0x5b1   :  { %v565_v26 = vsel %vm381_vm1, %v563_v24, %v544_v5 }
 0x5b2   :  { %566 = vst.msk [vmem:[#allocation4] sm:$0xff] %vm112_vm0, %v565_v26 }
 0x5b6   :  { %v571_v31 = vld [vmem:[#allocation3] sm:$0xff] }
 0x5b7   :  { %v572_v34 = vpack.c.bf16 %v571_v31, %v571_v31 }
 0x5b9   :  { %1818 = vmatmul.mubr.msk.bf16.vlgmr.msra.gmra.mrb[8].mxu0 %vm112_vm0, %v572_v34  ;;  %v675_v52 = vld [vmem:[#allocation4] sm:$0xff] }
 0x5ba   :  { %979 = vmatpush1.bf16.msra.mxu0 %v2205_v12  ;;  %1010 = vmatprep.mubr.bf16.mxu0 %v2126_v1 }
 0x5bb   :  { %980 = vmatprep.subr.bf16.mxu0 %v2210_v13 }
 0x5be   :  { %981 = vmatpush1.bf16.msra.mxu0 %v2227_v16 }
 0x5bf   :  { %982 = vmatprep.subr.bf16.mxu0 %v2234_v17 }
 0x5c2   :  { %983 = vmatpush1.bf16.msra.mxu0 %v2246_v19 }
 0x5c3   :  { %984 = vmatprep.subr.bf16.mxu0 %v2252_v20 }
 0x5c6   :  { %985 = vmatpush1.bf16.msra.mxu0 %v2261_v21 }
 0x68c   :  { %v658_v46 = vpop.f32.mrb[8].mxu0 }
 0x68d   :  { %v669_v47 = vadd.f32 %v658_v46, %v170_v44  ;;  %v660_v48 = vpop.f32.mrb[9].mxu0 }
 0x68e   :  { %v674_v49 = vadd.f32 %v660_v48, %v186_v45  ;;  %v662_v50 = vpop.f32.mrb[10].mxu0 }
 0x68f   :  { %2030 = vtanh.f32 %v669_v47  ;;  %v663_v51 = vpop.f32.mrb[11].mxu0  ;;  %v1819_v37 = vmul.f32 -1.442695, %v669_v47 }
 0x690   :  { %2032 = vtanh.f32 %v674_v49  ;;  %v1820_v53 = vmul.f32 -1.442695, %v674_v49 }
 0x691   :  { %2034 = vpow2.f32 %v1819_v37 }
 0x692   :  { %2036 = vpow2.f32 %v1820_v53 }
 0x699   :  { %v2031_v10 = vpop.eup %2030 }
 0x69a   :  { %v2033_v30 = vpop.eup %2032  ;;  %689 = vrot.lane.b32.xlu0 %v2031_v10, %s2129_s2 }
 0x69b   :  { %713 = vrot.lane.b32.xlu1 %v2033_v30, %s2129_s2  ;;  %v2035_v32 = vpop.eup %2034 }
 0x69c   :  { %v2037_v54 = vpop.eup %2036  ;;  %v679_v55 = vadd.f32 1.0, %v2035_v32 }
 0x69d   :  { %v707_v56 = vadd.f32 1.0, %v2037_v54 }
 0x69e   :  { %684 = vrot.lane.b32.xlu0 %v675_v52, %s2128_s22  ;;  %2038 = vrcp.f32 %v679_v55 }
 0x69f   :  { %2040 = vrcp.f32 %v707_v56 }
 0x6a8   :  { %v2039_v57 = vpop.eup %2038 }
 0x6a9   :  { %v2041_v59 = vpop.eup %2040 }
 0x6aa   :  { %v711_v3 = vmul.f32 %v2041_v59, %v675_v52 }
 0x70c   :  { %v690_v58 = vpop.permute.xlu0 %689 }
 0x70d   :  { %v692_v60 = vmul.f32 %v2039_v57, %v690_v58  ;;  %v714_v61 = vpop.permute.xlu1 %713 }
 0x70e   :  { %v716_v62 = vmul.f32 %v2041_v59, %v714_v61 }
 0x70f   :  { %694 = vrot.lane.b32.xlu1 %v692_v60, %s2128_s22 }
 0x710   :  { %718 = vrot.lane.b32.xlu0 %v716_v62, %s2128_s22  ;;  %v685_v63 = vpop.permute.xlu0 %684 }
 0x711   :  { %v687_v0 = vmul.f32 %v2039_v57, %v685_v63 }
 0x781   :  { %v695_v2 = vpop.permute.xlu1 %694 }
 0x782   :  { %v697_v4 = vadd.f32 %v695_v2, %v687_v0  ;;  %v719_v5 = vpop.permute.xlu0 %718 }
 0x783   :  { %v721_v6 = vadd.f32 %v719_v5, %v711_v3 }
 0x784   :  { %2042 = vtanh.f32 %v697_v4 }
 0x785   :  { %2044 = vtanh.f32 %v721_v6 }
 0x78e   :  { %v2043_v7 = vpop.eup %2042 }
 0x78f   :  { %v2045_v8 = vpop.eup %2044  ;;  %700 = vrot.lane.b32.xlu1 %v2043_v7, %s2129_s2 }
 0x790   :  { %724 = vrot.lane.b32.xlu0 %v2045_v8, %s2129_s2 }
 0x801   :  { %v701_v9 = vpop.permute.xlu1 %700 }
 0x802   :  { %v703_v11 = vmul.f32 %v2039_v57, %v701_v9  ;;  %v725_v14 = vpop.permute.xlu0 %724 }
 0x803   :  { %v727_v18 = vmul.f32 %v2041_v59, %v725_v14  ;;  %v176_v14 = vadd.f32 %v2374_v42, %v2307_v43 }
 0x804   :  { %729 = vrot.lane.b32.xlu1 %v703_v11, %s2128_s22  ;;  %v180_v11 = vadd.f32 %v2281_v25, %v2304_v40 }
 0x805   :  { %733 = vrot.lane.b32.xlu0 %v727_v18, %s2129_s2 }
 0x808   :  { %739 = vrot.lane.b32.xlu1 %v697_v4, %s2130_s13 }
 0x876   :  { %v730_v22 = vpop.permute.xlu1 %729 }
 0x877   :  { %745 = vst.msk [vmem:[#allocation5 + $0x10] sm:$0xff] %vm381_vm1, %v730_v22  ;;  %v734_v23 = vpop.permute.xlu0 %733 }
 0x878   :  { %v736_v15 = vsel %vm381_vm1, %v730_v22, %v734_v23  ;;  %747 = vst.msk [vmem:[#allocation5 + $0x28] sm:$0xff] %vm392_vm2, %v734_v23 }
 0x879   :  { %737 = vst.msk [vmem:[#allocation3] sm:$0xff] %vm112_vm0, %v736_v15 }
 0x87a   :  { %v740_v24 = vpop.permute.xlu1 %739 }
 0x87b   :  { %v742_v26 = vsel %vm381_vm1, %v740_v24, %v721_v6 }
 0x87c   :  { %743 = vst.msk [vmem:[#allocation4] sm:$0xff] %vm112_vm0, %v742_v26 }
 0x880   :  { %v748_v31 = vld [vmem:[#allocation3] sm:$0xff] }
 0x881   :  { %v749_v34 = vpack.c.bf16 %v748_v31, %v748_v31 }
 0x883   :  { %1829 = vmatmul.mubr.msk.bf16.vlgmr.msra.gmra.mrb[16].mxu1 %vm112_vm0, %v749_v34 }
 0x884   :  { %1148 = vmatpush1.bf16.msra.mxu1 %v2205_v12  ;;  %1179 = vmatprep.mubr.bf16.mxu1 %v2126_v1  ;;  %v182_v12 = vadd.f32 %v2283_v27, %v2307_v43 }
 0x885   :  { %1149 = vmatprep.subr.bf16.mxu1 %v2210_v13 }
 0x888   :  { %1150 = vmatpush1.bf16.msra.mxu1 %v2227_v16 }
 0x889   :  { %1151 = vmatprep.subr.bf16.mxu1 %v2234_v17 }
 0x88c   :  { %1152 = vmatpush1.bf16.msra.mxu1 %v2246_v19 }
 0x88d   :  { %1153 = vmatprep.subr.bf16.mxu1 %v2252_v20  ;;  %v852_v20 = vld [vmem:[#allocation4] sm:$0xff] }
 0x890   :  { %1154 = vmatpush1.bf16.msra.mxu1 %v2261_v21 }
 0x956   :  { %v835_v44 = vpop.f32.mrb[16].mxu1 }
 0x957   :  { %v846_v45 = vadd.f32 %v835_v44, %v174_v35  ;;  %v837_v46 = vpop.f32.mrb[17].mxu1 }
 0x958   :  { %v851_v13 = vadd.f32 %v837_v46, %v182_v12  ;;  %v839_v47 = vpop.f32.mrb[18].mxu1 }
 0x959   :  { %2046 = vtanh.f32 %v846_v45  ;;  %v840_v16 = vpop.f32.mrb[19].mxu1  ;;  %v1830_v21 = vmul.f32 -1.442695, %v846_v45 }
 0x95a   :  { %2048 = vtanh.f32 %v851_v13  ;;  %v1831_v41 = vmul.f32 -1.442695, %v851_v13 }
 0x95b   :  { %2050 = vpow2.f32 %v1830_v21 }
 0x95c   :  { %2052 = vpow2.f32 %v1831_v41 }
 0x963   :  { %v2047_v17 = vpop.eup %2046 }
 0x964   :  { %v2049_v19 = vpop.eup %2048  ;;  %866 = vrot.lane.b32.xlu0 %v2047_v17, %s2129_s2 }
 0x965   :  { %890 = vrot.lane.b32.xlu1 %v2049_v19, %s2129_s2  ;;  %v2051_v27 = vpop.eup %2050 }
 0x966   :  { %v2053_v48 = vpop.eup %2052  ;;  %v856_v49 = vadd.f32 1.0, %v2051_v27 }
 0x967   :  { %v884_v50 = vadd.f32 1.0, %v2053_v48 }
 0x968   :  { %861 = vrot.lane.b32.xlu0 %v852_v20, %s2128_s22  ;;  %2054 = vrcp.f32 %v856_v49 }
 0x969   :  { %2056 = vrcp.f32 %v884_v50 }
 0x972   :  { %v2055_v51 = vpop.eup %2054 }
 0x973   :  { %v2057_v30 = vpop.eup %2056 }
 0x974   :  { %v888_v56 = vmul.f32 %v2057_v30, %v852_v20 }
 0x9d6   :  { %v867_v10 = vpop.permute.xlu0 %866 }
 0x9d7   :  { %v869_v52 = vmul.f32 %v2055_v51, %v867_v10  ;;  %v891_v37 = vpop.permute.xlu1 %890 }
 0x9d8   :  { %v893_v53 = vmul.f32 %v2057_v30, %v891_v37 }
 0x9d9   :  { %871 = vrot.lane.b32.xlu1 %v869_v52, %s2128_s22 }
 0x9da   :  { %895 = vrot.lane.b32.xlu0 %v893_v53, %s2128_s22  ;;  %v862_v32 = vpop.permute.xlu0 %861 }
 0x9db   :  { %v864_v54 = vmul.f32 %v2055_v51, %v862_v32 }
 0xa4b   :  { %v872_v55 = vpop.permute.xlu1 %871 }
 0xa4c   :  { %v874_v57 = vadd.f32 %v872_v55, %v864_v54  ;;  %v896_v58 = vpop.permute.xlu0 %895 }
 0xa4d   :  { %v898_v59 = vadd.f32 %v896_v58, %v888_v56 }
 0xa4e   :  { %2058 = vtanh.f32 %v874_v57 }
 0xa4f   :  { %2060 = vtanh.f32 %v898_v59 }
 0xa58   :  { %v2059_v60 = vpop.eup %2058 }
 0xa59   :  { %v2061_v61 = vpop.eup %2060  ;;  %877 = vrot.lane.b32.xlu1 %v2059_v60, %s2129_s2 }
 0xa5a   :  { %901 = vrot.lane.b32.xlu0 %v2061_v61, %s2129_s2  ;;  %v184_v61 = vadd.f32 %v2287_v29, %v2304_v40 }
 0xacb   :  { %v878_v62 = vpop.permute.xlu1 %877 }
 0xacc   :  { %v880_v63 = vmul.f32 %v2055_v51, %v878_v62  ;;  %v902_v0 = vpop.permute.xlu0 %901  ;;  %v172_v62 = vadd.f32 %v2370_v38, %v2307_v43 }
 0xacd   :  { %v904_v2 = vmul.f32 %v2057_v30, %v902_v0 }
 0xace   :  { %906 = vrot.lane.b32.xlu1 %v880_v63, %s2128_s22 }
 0xacf   :  { %910 = vrot.lane.b32.xlu0 %v904_v2, %s2129_s2 }
 0xad2   :  { %916 = vrot.lane.b32.xlu1 %v874_v57, %s2130_s13 }
 0xb40   :  { %v907_v3 = vpop.permute.xlu1 %906 }
 0xb41   :  { %922 = vst.msk [vmem:[#allocation5 + $0x18] sm:$0xff] %vm381_vm1, %v907_v3  ;;  %v911_v4 = vpop.permute.xlu0 %910 }
 0xb42   :  { %v913_v5 = vsel %vm381_vm1, %v907_v3, %v911_v4  ;;  %924 = vst.msk [vmem:[#allocation5 + $0x20] sm:$0xff] %vm392_vm2, %v911_v4 }
 0xb43   :  { %914 = vst.msk [vmem:[#allocation3] sm:$0xff] %vm112_vm0, %v913_v5 }
 0xb44   :  { %v917_v6 = vpop.permute.xlu1 %916 }
 0xb45   :  { %v919_v7 = vsel %vm381_vm1, %v917_v6, %v898_v59 }
 0xb46   :  { %920 = vst.msk [vmem:[#allocation4] sm:$0xff] %vm112_vm0, %v919_v7 }
 0xb4a   :  { %v925_v8 = vld [vmem:[#allocation3] sm:$0xff] }
 0xb4b   :  { %v926_v9 = vpack.c.bf16 %v925_v8, %v925_v8 }
 0xb4d   :  { %1840 = vmatmul.mubr.msk.bf16.vlgmr.msra.gmra.mrb[12].mxu0 %vm112_vm0, %v926_v9  ;;  %v1023_v35 = vld [vmem:[#allocation4] sm:$0xff] }
 0xb4e   :  { %1348 = vmatprep.mubr.bf16.mxu0 %v2126_v1 }
 0xc20   :  { %v1012_v18 = vpop.f32.mrb[12].mxu0 }
 0xc21   :  { %v1020_v22 = vadd.f32 %v1012_v18, %v180_v11  ;;  %v1014_v23 = vpop.f32.mrb[13].mxu0 }
 0xc22   :  { %v1022_v15 = vadd.f32 %v1014_v23, %v176_v14  ;;  %v1016_v24 = vpop.f32.mrb[14].mxu0 }
 0xc23   :  { %2062 = vtanh.f32 %v1020_v22  ;;  %v1017_v26 = vpop.f32.mrb[15].mxu0  ;;  %v1841_v25 = vmul.f32 -1.442695, %v1020_v22 }
 0xc24   :  { %2064 = vtanh.f32 %v1022_v15  ;;  %v1842_v12 = vmul.f32 -1.442695, %v1022_v15 }
 0xc25   :  { %2066 = vpow2.f32 %v1841_v25 }
 0xc26   :  { %2068 = vpow2.f32 %v1842_v12 }
 0xc2d   :  { %v2063_v31 = vpop.eup %2062 }
 0xc2e   :  { %v2065_v34 = vpop.eup %2064  ;;  %1037 = vrot.lane.b32.xlu0 %v2063_v31, %s2129_s2 }
 0xc2f   :  { %1061 = vrot.lane.b32.xlu1 %v2065_v34, %s2129_s2  ;;  %v2067_v42 = vpop.eup %2066 }
 0xc30   :  { %v2069_v44 = vpop.eup %2068  ;;  %v1027_v45 = vadd.f32 1.0, %v2067_v42 }
 0xc31   :  { %v1055_v46 = vadd.f32 1.0, %v2069_v44 }
 0xc32   :  { %1032 = vrot.lane.b32.xlu0 %v1023_v35, %s2128_s22  ;;  %2070 = vrcp.f32 %v1027_v45  ;;  %v1986_v45 = vld [vmem:[%s2595_s3] ss:$8 sps:$4 sm:$0xff]  }
 0xc33   :  { %2072 = vrcp.f32 %v1055_v46  ;;  %v1988_v46 = vld [vmem:[%s2595_s3 + $0x4] ss:$8 sps:$4 sm:$0xff]  }
 0xc34   :  { %1316 = vmatprep.subr.bf16.mxu0 %v1988_v46  ;;  %1485 = vmatprep.subr.bf16.mxu1 %v1988_v46 }
 0xc35   :  { %1317 = vmatpush1.bf16.msra.mxu0 %v1986_v45 }
 0xc3c   :  { %v2071_v13 = vpop.eup %2070 }
 0xc3d   :  { %v2073_v16 = vpop.eup %2072 }
 0xc3e   :  { %v1059_v48 = vmul.f32 %v2073_v16, %v1023_v35 }
 0xca0   :  { %v1038_v47 = vpop.permute.xlu0 %1037 }
 0xca1   :  { %v1040_v17 = vmul.f32 %v2071_v13, %v1038_v47  ;;  %v1062_v19 = vpop.permute.xlu1 %1061 }
 0xca2   :  { %v1064_v20 = vmul.f32 %v2073_v16, %v1062_v19  ;;  %v1994_v19 = vld [vmem:[%s2595_s3 + $0x24] ss:$8 sps:$4 sm:$0xff]  }
 0xca3   :  { %1042 = vrot.lane.b32.xlu1 %v1040_v17, %s2128_s22  ;;  %v1989_v17 = vld [vmem:[%s2595_s3 + $0x10] ss:$8 sps:$4 sm:$0xff]  }
 0xca4   :  { %1066 = vrot.lane.b32.xlu0 %v1064_v20, %s2128_s22  ;;  %v1033_v21 = vpop.permute.xlu0 %1032  ;;  %v1992_v20 = vld [vmem:[%s2595_s3 + $0x20] ss:$8 sps:$4 sm:$0xff]  }
 0xca5   :  { %v1035_v41 = vmul.f32 %v2071_v13, %v1033_v21  ;;  %v1995_v21 = vld [vmem:[%s2595_s3 + $0x30] ss:$8 sps:$4 sm:$0xff]  }
 0xd15   :  { %v1043_v27 = vpop.permute.xlu1 %1042 }
 0xd16   :  { %v1045_v49 = vadd.f32 %v1043_v27, %v1035_v41  ;;  %v1067_v50 = vpop.permute.xlu0 %1066  ;;  %v1997_v41 = vld [vmem:[%s2595_s3 + $0x34] ss:$8 sps:$4 sm:$0xff]  }
 0xd17   :  { %v1069_v51 = vadd.f32 %v1067_v50, %v1059_v48 }
 0xd18   :  { %2074 = vtanh.f32 %v1045_v49 }
 0xd19   :  { %2076 = vtanh.f32 %v1069_v51 }
 0xd22   :  { %v2075_v10 = vpop.eup %2074 }
 0xd23   :  { %v2077_v30 = vpop.eup %2076  ;;  %1048 = vrot.lane.b32.xlu1 %v2075_v10, %s2129_s2 }
 0xd24   :  { %1072 = vrot.lane.b32.xlu0 %v2077_v30, %s2129_s2 }
 0xd95   :  { %v1049_v52 = vpop.permute.xlu1 %1048 }
 0xd96   :  { %v1051_v37 = vmul.f32 %v2071_v13, %v1049_v52  ;;  %v1073_v53 = vpop.permute.xlu0 %1072 }
 0xd97   :  { %v1075_v32 = vmul.f32 %v2073_v16, %v1073_v53  ;;  %v1991_v16 = vld [vmem:[%s2595_s3 + $0x14] ss:$8 sps:$4 sm:$0xff]  }
 0xd98   :  { %1077 = vrot.lane.b32.xlu1 %v1051_v37, %s2128_s22  ;;  %1318 = vmatprep.subr.bf16.mxu0 %v1991_v16 }
 0xd99   :  { %1081 = vrot.lane.b32.xlu0 %v1075_v32, %s2129_s2  ;;  %1319 = vmatpush1.bf16.msra.mxu0 %v1989_v17 }
 0xd9a   :  { %1320 = vmatprep.subr.bf16.mxu0 %v1994_v19 }
 0xd9c   :  { %1087 = vrot.lane.b32.xlu1 %v1045_v49, %s2130_s13 }
 0xd9d   :  { %1321 = vmatpush1.bf16.msra.mxu0 %v1992_v20 }
 0xd9e   :  { %1322 = vmatprep.subr.bf16.mxu0 %v1997_v41 }
 0xda1   :  { %1323 = vmatpush1.bf16.msra.mxu0 %v1995_v21 }
 0xe0a   :  { %v1078_v54 = vpop.permute.xlu1 %1077 }
 0xe0b   :  { %1092 = vst.msk [vmem:[#allocation5 + $0x20] sm:$0xff] %vm381_vm1, %v1078_v54  ;;  %v1082_v55 = vpop.permute.xlu0 %1081 }
 0xe0c   :  { %v1084_v56 = vsel %vm381_vm1, %v1078_v54, %v1082_v55  ;;  %1093 = vst.msk [vmem:[#allocation5 + $0x18] sm:$0xff] %vm392_vm2, %v1082_v55  ;;  %v190_v54 = vadd.f32 %v2298_v36, %v2304_v40  ;;  %v166_v55 = vadd.f32 %v2293_v33, %v2307_v43 }
 0xe0d   :  { %1085 = vst.msk [vmem:[#allocation3] sm:$0xff] %vm112_vm0, %v1084_v56 }
 0xe0e   :  { %v1088_v57 = vpop.permute.xlu1 %1087 }
 0xe0f   :  { %v1090_v58 = vsel %vm381_vm1, %v1088_v57, %v1069_v51 }
 0xe10   :  { %1091 = vst.msk [vmem:[#allocation4] sm:$0xff] %vm112_vm0, %v1090_v58 }
 0xe14   :  { %v1094_v59 = vld [vmem:[#allocation3] sm:$0xff] }
 0xe15   :  { %v1095_v60 = vpack.c.bf16 %v1094_v59, %v1094_v59 }
 0xe17   :  { %1851 = vmatmul.mubr.msk.bf16.vlgmr.msra.gmra.mrb[20].mxu1 %vm112_vm0, %v1095_v60 }
 0xe18   :  { %1517 = vmatprep.mubr.bf16.mxu1 %v2126_v1  ;;  %v1192_v1 = vld [vmem:[#allocation4] sm:$0xff]  ;;  %1486 = vmatpush1.bf16.msra.mxu1 %v1986_v45 }
 0xe19   :  { %1487 = vmatprep.subr.bf16.mxu1 %v1991_v16  ;;  %v194_v16 = vadd.f32 %v2302_v39, %v2304_v40 }
 0xe1c   :  { %1488 = vmatpush1.bf16.msra.mxu1 %v1989_v17  ;;  %v162_v17 = vadd.f32 %v2285_v28, %v2307_v43 }
 0xe1d   :  { %1489 = vmatprep.subr.bf16.mxu1 %v1994_v19 }
 0xe20   :  { %1490 = vmatpush1.bf16.msra.mxu1 %v1992_v20 }
 0xe21   :  { %1491 = vmatprep.subr.bf16.mxu1 %v1997_v41 }
 0xe24   :  { %1492 = vmatpush1.bf16.msra.mxu1 %v1995_v21 }
 0xeea   :  { %v1181_v63 = vpop.f32.mrb[20].mxu1 }
 0xeeb   :  { %v1189_v0 = vadd.f32 %v1181_v63, %v184_v61  ;;  %v1183_v2 = vpop.f32.mrb[21].mxu1 }
 0xeec   :  { %v1191_v3 = vadd.f32 %v1183_v2, %v172_v62  ;;  %v1185_v4 = vpop.f32.mrb[22].mxu1 }
 0xeed   :  { %2078 = vtanh.f32 %v1189_v0  ;;  %v1186_v5 = vpop.f32.mrb[23].mxu1  ;;  %v1852_v29 = vmul.f32 -1.442695, %v1189_v0 }
 0xeee   :  { %2080 = vtanh.f32 %v1191_v3  ;;  %v1853_v8 = vmul.f32 -1.442695, %v1191_v3 }
 0xeef   :  { %2082 = vpow2.f32 %v1852_v29 }
 0xef0   :  { %2084 = vpow2.f32 %v1853_v8 }
 0xef7   :  { %v2079_v6 = vpop.eup %2078 }
 0xef8   :  { %v2081_v7 = vpop.eup %2080  ;;  %1206 = vrot.lane.b32.xlu0 %v2079_v6, %s2129_s2 }
 0xef9   :  { %1230 = vrot.lane.b32.xlu1 %v2081_v7, %s2129_s2  ;;  %v2083_v38 = vpop.eup %2082 }
 0xefa   :  { %v2085_v9 = vpop.eup %2084  ;;  %v1196_v11 = vadd.f32 1.0, %v2083_v38 }
 0xefb   :  { %v1224_v14 = vadd.f32 1.0, %v2085_v9 }
 0xefc   :  { %1201 = vrot.lane.b32.xlu0 %v1192_v1, %s2128_s22  ;;  %2086 = vrcp.f32 %v1196_v11 }
 0xefd   :  { %2088 = vrcp.f32 %v1224_v14 }
 0xf06   :  { %v2087_v18 = vpop.eup %2086 }
 0xf07   :  { %v2089_v23 = vpop.eup %2088 }
 0xf08   :  { %v1228_v25 = vmul.f32 %v2089_v23, %v1192_v1 }
 0xf6a   :  { %v1207_v22 = vpop.permute.xlu0 %1206 }
 0xf6b   :  { %v1209_v15 = vmul.f32 %v2087_v18, %v1207_v22  ;;  %v1231_v24 = vpop.permute.xlu1 %1230 }
 0xf6c   :  { %v1233_v26 = vmul.f32 %v2089_v23, %v1231_v24 }
 0xf6d   :  { %1211 = vrot.lane.b32.xlu1 %v1209_v15, %s2128_s22 }
 0xf6e   :  { %1235 = vrot.lane.b32.xlu0 %v1233_v26, %s2128_s22  ;;  %v1202_v31 = vpop.permute.xlu0 %1201 }
 0xf6f   :  { %v1204_v34 = vmul.f32 %v2087_v18, %v1202_v31 }
 0xfdf   :  { %v1212_v35 = vpop.permute.xlu1 %1211 }
 0xfe0   :  { %v1214_v12 = vadd.f32 %v1212_v35, %v1204_v34  ;;  %v1236_v42 = vpop.permute.xlu0 %1235 }
 0xfe1   :  { %v1238_v44 = vadd.f32 %v1236_v42, %v1228_v25 }
 0xfe2   :  { %2090 = vtanh.f32 %v1214_v12 }
 0xfe3   :  { %2092 = vtanh.f32 %v1238_v44 }
 0xfec   :  { %v2091_v13 = vpop.eup %2090 }
 0xfed   :  { %v2093_v47 = vpop.eup %2092  ;;  %1217 = vrot.lane.b32.xlu1 %v2091_v13, %s2129_s2 }
 0xfee   :  { %1241 = vrot.lane.b32.xlu0 %v2093_v47, %s2129_s2 }
0x105f   :  { %v1218_v27 = vpop.permute.xlu1 %1217 }
0x1060   :  { %v1220_v48 = vmul.f32 %v2087_v18, %v1218_v27  ;;  %v1242_v49 = vpop.permute.xlu0 %1241 }
0x1061   :  { %v1244_v50 = vmul.f32 %v2089_v23, %v1242_v49 }
0x1062   :  { %1246 = vrot.lane.b32.xlu1 %v1220_v48, %s2128_s22 }
0x1063   :  { %1250 = vrot.lane.b32.xlu0 %v1244_v50, %s2129_s2 }
0x1066   :  { %1256 = vrot.lane.b32.xlu1 %v1214_v12, %s2130_s13 }
0x10d4   :  { %v1247_v51 = vpop.permute.xlu1 %1246 }
0x10d5   :  { %1261 = vst.msk [vmem:[#allocation5 + $0x28] sm:$0xff] %vm381_vm1, %v1247_v51  ;;  %v1251_v10 = vpop.permute.xlu0 %1250 }
0x10d6   :  { %v1253_v30 = vsel %vm381_vm1, %v1247_v51, %v1251_v10  ;;  %1262 = vst.msk [vmem:[#allocation5 + $0x10] sm:$0xff] %vm392_vm2, %v1251_v10 }
0x10d7   :  { %1254 = vst.msk [vmem:[#allocation3] sm:$0xff] %vm112_vm0, %v1253_v30 }
0x10d8   :  { %v1257_v52 = vpop.permute.xlu1 %1256 }
0x10d9   :  { %v1259_v37 = vsel %vm381_vm1, %v1257_v52, %v1238_v44 }
0x10da   :  { %1260 = vst.msk [vmem:[#allocation4] sm:$0xff] %vm112_vm0, %v1259_v37 }
0x10de   :  { %v1263_v53 = vld [vmem:[#allocation3] sm:$0xff] }
0x10df   :  { %v1264_v32 = vpack.c.bf16 %v1263_v53, %v1263_v53 }
0x10e1   :  { %1862 = vmatmul.mubr.msk.bf16.vlgmr.msra.gmra.mrb[16].mxu0 %vm112_vm0, %v1264_v32  ;;  %v1361_v0 = vld [vmem:[#allocation4] sm:$0xff] }
0x11b4   :  { %v1350_v56 = vpop.f32.mrb[16].mxu0 }
0x11b5   :  { %v1358_v57 = vadd.f32 %v1350_v56, %v190_v54  ;;  %v1352_v58 = vpop.f32.mrb[17].mxu0 }
0x11b6   :  { %v1360_v59 = vadd.f32 %v1352_v58, %v166_v55  ;;  %v1354_v60 = vpop.f32.mrb[18].mxu0 }
0x11b7   :  { %2094 = vtanh.f32 %v1358_v57  ;;  %v1355_v61 = vpop.f32.mrb[19].mxu0  ;;  %v1863_v36 = vmul.f32 -1.442695, %v1358_v57 }
0x11b8   :  { %2096 = vtanh.f32 %v1360_v59  ;;  %v1864_v2 = vmul.f32 -1.442695, %v1360_v59 }
0x11b9   :  { %2098 = vpow2.f32 %v1863_v36  ;;  %v1611_v36 = vld [vmem:[%s2597_s4 + $0x10] sm:$0xff] }
0x11ba   :  { %2100 = vpow2.f32 %v1864_v2 }
0x11c1   :  { %v2095_v62 = vpop.eup %2094 }
0x11c2   :  { %v2097_v63 = vpop.eup %2096  ;;  %1375 = vrot.lane.b32.xlu0 %v2095_v62, %s2129_s2 }
0x11c3   :  { %1399 = vrot.lane.b32.xlu1 %v2097_v63, %s2129_s2  ;;  %v2099_v33 = vpop.eup %2098  ;;  %v1609_v63 = vld [vmem:[%s2597_s4] sm:$0xff] }
0x11c4   :  { %v2101_v3 = vpop.eup %2100  ;;  %v1365_v4 = vadd.f32 1.0, %v2099_v33  ;;  %v1612_v33 = vld [vmem:[%s2597_s4 + $0x18] sm:$0xff] }
0x11c5   :  { %v1393_v5 = vadd.f32 1.0, %v2101_v3  ;;  %v1933_v3 = vpack.c.bf16 %v1612_v33, %v1611_v36 }
0x11c6   :  { %1370 = vrot.lane.b32.xlu0 %v1361_v0, %s2128_s22  ;;  %2102 = vrcp.f32 %v1365_v4 }
0x11c7   :  { %2104 = vrcp.f32 %v1393_v5 }
0x11d0   :  { %v2103_v6 = vpop.eup %2102 }
0x11d1   :  { %v2105_v1 = vpop.eup %2104 }
0x11d2   :  { %v1397_v18 = vmul.f32 %v2105_v1, %v1361_v0  ;;  %v1610_v0 = vld [vmem:[%s2597_s4 + $0x8] sm:$0xff] }
0x11d3   :  { %v1929_v2 = vpack.c.bf16 %v1610_v0, %v1609_v63 }
0x11d5   :  { %1930 = vmatprep.subr.bf16.mxu0 %v1929_v2 }
0x11d6   :  { %1932 = vmatpush3.bf16.msra.mxu0 %v1929_v2 }
0x11d7   :  { %1934 = vmatprep.subr.bf16.mxu0 %v1933_v3 }
0x11da   :  { %1936 = vmatpush3.bf16.msra.mxu0 %v1933_v3 }
0x1234   :  { %v1376_v7 = vpop.permute.xlu0 %1375 }
0x1235   :  { %v1378_v29 = vmul.f32 %v2103_v6, %v1376_v7  ;;  %v1400_v8 = vpop.permute.xlu1 %1399  ;;  %v1614_v7 = vld [vmem:[%s2597_s4 + $0x28] sm:$0xff] }
0x1236   :  { %v1402_v38 = vmul.f32 %v2105_v1, %v1400_v8  ;;  %v1616_v8 = vld [vmem:[%s2597_s4 + $0x38] sm:$0xff] }
0x1237   :  { %1380 = vrot.lane.b32.xlu1 %v1378_v29, %s2128_s22  ;;  %v1615_v29 = vld [vmem:[%s2597_s4 + $0x30] sm:$0xff] }
0x1238   :  { %1404 = vrot.lane.b32.xlu0 %v1402_v38, %s2128_s22  ;;  %v1371_v9 = vpop.permute.xlu0 %1370  ;;  %v1941_v38 = vpack.c.bf16 %v1616_v8, %v1615_v29 }
0x1239   :  { %v1373_v11 = vmul.f32 %v2103_v6, %v1371_v9 }
0x12a9   :  { %v1381_v14 = vpop.permute.xlu1 %1380 }
0x12aa   :  { %v1383_v22 = vadd.f32 %v1381_v14, %v1373_v11  ;;  %v1405_v23 = vpop.permute.xlu0 %1404 }
0x12ab   :  { %v1407_v15 = vadd.f32 %v1405_v23, %v1397_v18 }
0x12ac   :  { %2106 = vtanh.f32 %v1383_v22 }
0x12ad   :  { %2108 = vtanh.f32 %v1407_v15 }
0x12b6   :  { %v2107_v24 = vpop.eup %2106 }
0x12b7   :  { %v2109_v26 = vpop.eup %2108  ;;  %1386 = vrot.lane.b32.xlu1 %v2107_v24, %s2129_s2 }
0x12b8   :  { %1410 = vrot.lane.b32.xlu0 %v2109_v26, %s2129_s2 }
0x1329   :  { %v1387_v31 = vpop.permute.xlu1 %1386 }
0x132a   :  { %v1389_v34 = vmul.f32 %v2103_v6, %v1387_v31  ;;  %v1411_v35 = vpop.permute.xlu0 %1410  ;;  %v1613_v6 = vld [vmem:[%s2597_s4 + $0x20] sm:$0xff] }
0x132b   :  { %v1413_v25 = vmul.f32 %v2105_v1, %v1411_v35  ;;  %v1937_v1 = vpack.c.bf16 %v1614_v7, %v1613_v6  ;;  %v1603_v35 = vld [vmem:[#allocation5 + $0x10] sm:$0xff] }
0x132c   :  { %1415 = vrot.lane.b32.xlu1 %v1389_v34, %s2128_s22 }
0x132d   :  { %1419 = vrot.lane.b32.xlu0 %v1413_v25, %s2129_s2  ;;  %1938 = vmatprep.subr.bf16.mxu0 %v1937_v1  ;;  %v1604_v25 = vld [vmem:[#allocation5 + $0x18] sm:$0xff] }
0x132e   :  { %1940 = vmatpush3.bf16.msra.mxu0 %v1937_v1 }
0x132f   :  { %1942 = vmatprep.subr.bf16.mxu0 %v1941_v38 }
0x1331   :  { %1425 = vrot.lane.b32.xlu0 %v1383_v22, %s2130_s13 }
0x1332   :  { %1944 = vmatpush3.bf16.msra.mxu0 %v1941_v38 }
0x139e   :  { %v1416_v12 = vpop.permute.xlu1 %1415 }
0x139f   :  { %1430 = vst.msk [vmem:[#allocation5 + $0x30] sm:$0xff] %vm381_vm1, %v1416_v12  ;;  %v1420_v42 = vpop.permute.xlu0 %1419 }
0x13a0   :  { %v1422_v44 = vsel %vm381_vm1, %v1416_v12, %v1420_v42  ;;  %1431 = vst.msk [vmem:[#allocation5 + $0x8] sm:$0xff] %vm392_vm2, %v1420_v42  ;;  %v1605_v12 = vld [vmem:[#allocation5 + $0x20] sm:$0xff]  ;;  %v1606_v42 = vld [vmem:[#allocation5 + $0x28] sm:$0xff] }
0x13a1   :  { %1423 = vst.msk [vmem:[#allocation3] sm:$0xff] %vm112_vm0, %v1422_v44 }
0x13a3   :  { %v1426_v45 = vpop.permute.xlu0 %1425 }
0x13a4   :  { %v1428_v46 = vsel %vm381_vm1, %v1426_v45, %v1407_v15 }
0x13a5   :  { %1429 = vst.msk [vmem:[#allocation4] sm:$0xff] %vm112_vm0, %v1428_v46  ;;  %v1876_v46 = vld [vmem:[%s2598_s5] ss:$0 sm:$0xff] }
0x13a6   :  { %v1607_v44 = vld [vmem:[#allocation5 + $0x30] sm:$0xff] }
0x13a7   :  { %v1602_v34 = vld [vmem:[#allocation5 + $0x8] sm:$0xff] }
0x13a8   :  { %v1432_v13 = vld [vmem:[#allocation3] sm:$0xff] }
0x13a9   :  { %v1433_v47 = vpack.c.bf16 %v1432_v13, %v1432_v13 }
0x13ab   :  { %1873 = vmatmul.mubr.msk.bf16.vlgmr.msra.gmra.mrb[24].mxu1 %vm112_vm0, %v1433_v47 }
0x13ac   :  { %v1530_v51 = vld [vmem:[#allocation4] sm:$0xff] }
0x147e   :  { %v1519_v19 = vpop.f32.mrb[24].mxu1 }
0x147f   :  { %v1527_v20 = vadd.f32 %v1519_v19, %v194_v16  ;;  %v1521_v21 = vpop.f32.mrb[25].mxu1 }
0x1480   :  { %v1529_v41 = vadd.f32 %v1521_v21, %v162_v17  ;;  %v1523_v27 = vpop.f32.mrb[26].mxu1 }
0x1481   :  { %v1524_v48 = vpop.f32.mrb[27].mxu1  ;;  %v1874_v40 = vmul.f32 -1.442695, %v1527_v20 }
0x1482   :  { %2110 = vtanh.f32 %v1529_v41  ;;  %v1875_v39 = vmul.f32 -1.442695, %v1529_v41 }
0x1483   :  { %2112 = vtanh.f32 %v1527_v20 }
0x1484   :  { %2114 = vpow2.f32 %v1875_v39 }
0x1485   :  { %2116 = vpow2.f32 %v1874_v40 }
0x148c   :  { %v2111_v49 = vpop.eup %2110 }
0x148d   :  { %1568 = vrot.lane.b32.xlu1 %v2111_v49, %s2129_s2  ;;  %v2113_v50 = vpop.eup %2112 }
0x148e   :  { %v2115_v28 = vpop.eup %2114 }
0x148f   :  { %v1562_v43 = vadd.f32 1.0, %v2115_v28  ;;  %v2117_v10 = vpop.eup %2116 }
0x1490   :  { %v1534_v30 = vadd.f32 1.0, %v2117_v10 }
0x1491   :  { %1544 = vrot.lane.b32.xlu1 %v2113_v50, %s2129_s2  ;;  %2118 = vrcp.f32 %v1562_v43 }
0x1492   :  { %2120 = vrcp.f32 %v1534_v30 }
0x1495   :  { %1539 = vrot.lane.b32.xlu1 %v1530_v51, %s2128_s22 }
0x149b   :  { %v2119_v52 = vpop.eup %2118 }
0x149c   :  { %v2121_v32 = vpop.eup %2120  ;;  %v1566_v56 = vmul.f32 %v2119_v52, %v1530_v51 }
0x14ff   :  { %v1569_v37 = vpop.permute.xlu1 %1568 }
0x1500   :  { %v1571_v53 = vmul.f32 %v2119_v52, %v1569_v37 }
0x1502   :  { %1573 = vrot.lane.b32.xlu0 %v1571_v53, %s2128_s22 }
0x1503   :  { %v1545_v54 = vpop.permute.xlu1 %1544 }
0x1504   :  { %v1547_v55 = vmul.f32 %v2121_v32, %v1545_v54 }
0x1506   :  { %1549 = vrot.lane.b32.xlu0 %v1547_v55, %s2128_s22 }
0x1507   :  { %v1540_v57 = vpop.permute.xlu1 %1539 }
0x1508   :  { %v1542_v60 = vmul.f32 %v2121_v32, %v1540_v57 }
0x1574   :  { %v1574_v58 = vpop.permute.xlu0 %1573 }
0x1575   :  { %v1576_v59 = vadd.f32 %v1574_v58, %v1566_v56 }
0x1577   :  { %2122 = vtanh.f32 %v1576_v59 }
0x1578   :  { %v1550_v61 = vpop.permute.xlu0 %1549 }
0x1579   :  { %v1552_v62 = vadd.f32 %v1550_v61, %v1542_v60 }
0x157b   :  { %2124 = vtanh.f32 %v1552_v62 }
0x1581   :  { %v2123_v4 = vpop.eup %2122 }
0x1582   :  { %1579 = vrot.lane.b32.xlu1 %v2123_v4, %s2129_s2 }
0x1585   :  { %v2125_v5 = vpop.eup %2124 }
0x1586   :  { %1555 = vrot.lane.b32.xlu0 %v2125_v5, %s2129_s2 }
0x15f4   :  { %v1580_v9 = vpop.permute.xlu1 %1579 }
0x15f5   :  { %v1582_v11 = vmul.f32 %v2119_v52, %v1580_v9 }
0x15f7   :  { %1588 = vrot.lane.b32.xlu1 %v1582_v11, %s2129_s2 }
0x15f8   :  { %v1556_v14 = vpop.permute.xlu0 %1555 }
0x15f9   :  { %v1558_v18 = vmul.f32 %v2121_v32, %v1556_v14 }
0x15fb   :  { %1584 = vrot.lane.b32.xlu0 %v1558_v18, %s2128_s22  ;;  %1594 = vrot.lane.b32.xlu1 %v1552_v62, %s2130_s13 }
0x1669   :  { %v1589_v22 = vpop.permute.xlu1 %1588 }
0x166a   :  { %1600 = vst.msk [vmem:[#allocation5] sm:$0xff] %vm392_vm2, %v1589_v22 }
0x166d   :  { %v1585_v23 = vpop.permute.xlu0 %1584  ;;  %v1595_v15 = vpop.permute.xlu1 %1594 }
0x166e   :  { %v1591_v24 = vsel %vm381_vm1, %v1585_v23, %v1589_v22  ;;  %1599 = vst.msk [vmem:[#allocation5 + $0x38] sm:$0xff] %vm381_vm1, %v1585_v23  ;;  %v1597_v26 = vsel %vm381_vm1, %v1595_v15, %v1576_v59 }
0x166f   :  { %1592 = vst.msk [vmem:[#allocation3] sm:$0xff] %vm112_vm0, %v1591_v24  ;;  %1598 = vst.msk [vmem:[#allocation4] sm:$0xff] %vm112_vm0, %v1597_v26 }
0x1671   :  { %v1601_v31 = vld [vmem:[#allocation5] sm:$0xff] }
0x1672   :  { %1917 = vmatprep.mubr.msk.f32.mxu0 %vm112_vm0, %v1601_v31 }
0x1673   :  { %1918 = vmatmul.mubr.msk.f32.vlgmr.msra.gmra.mrb[20].mxu0 %vm112_vm0, %v1602_v34 }
0x1674   :  { %1920 = vmatprep.mubr.msk.f32.mxu0 %vm112_vm0, %v1603_v35 }
0x1675   :  { %v1608_v45 = vld [vmem:[#allocation5 + $0x38] sm:$0xff] }
0x1677   :  { %1921 = vmatmul.mubr.msk.f32.gmra.mrb[22].mxu0 %vm112_vm0, %v1604_v25 }
0x1678   :  { %1923 = vmatprep.mubr.msk.f32.mxu0 %vm112_vm0, %v1605_v12 }
0x167b   :  { %1924 = vmatmul.mubr.msk.f32.gmra.mrb[24].mxu0 %vm112_vm0, %v1606_v42 }
0x167c   :  { %1926 = vmatprep.mubr.msk.f32.mxu0 %vm112_vm0, %v1607_v44 }
0x167f   :  { %1927 = vmatmul.mubr.msk.f32.gmra.mrb[26].mxu0 %vm112_vm0, %v1608_v45 }
0x1746   :  { %v1919_v13 = vpop.f32.mrb[20].mxu0 }
0x1747   :  { %v1720_v47 = vadd.f32 %v1919_v13, %v1876_v46  ;;  %v1714_v16 = vpop.f32.mrb[21].mxu0 }
0x1748   :  { %v1715_v17 = vadd.f32 %v1876_v46, %v1714_v16 }
0x1749   :  { %1754 = vst [vmem:[%s2599_s6 + $0x8] sm:$0xff] %v1720_v47 }
0x174a   :  { %1753 = vst [vmem:[%s2599_s6] sm:$0xff] %v1715_v17  ;;  %v1922_v19 = vpop.f32.mrb[22].mxu0 }
0x174b   :  { %v1730_v20 = vadd.f32 %v1922_v19, %v1876_v46  ;;  %v1724_v21 = vpop.f32.mrb[23].mxu0 }
0x174c   :  { %v1725_v41 = vadd.f32 %v1876_v46, %v1724_v21 }
0x174d   :  { %1756 = vst [vmem:[%s2599_s6 + $0x18] sm:$0xff] %v1730_v20 }
0x174e   :  { %1755 = vst [vmem:[%s2599_s6 + $0x10] sm:$0xff] %v1725_v41  ;;  %v1925_v27 = vpop.f32.mrb[24].mxu0 }
0x174f   :  { %v1740_v48 = vadd.f32 %v1925_v27, %v1876_v46  ;;  %v1734_v49 = vpop.f32.mrb[25].mxu0 }
0x1750   :  { %v1735_v50 = vadd.f32 %v1876_v46, %v1734_v49 }
0x1751   :  { %1758 = vst [vmem:[%s2599_s6 + $0x28] sm:$0xff] %v1740_v48 }
0x1752   :  { %1757 = vst [vmem:[%s2599_s6 + $0x20] sm:$0xff] %v1735_v50  ;;  %v1928_v51 = vpop.f32.mrb[26].mxu0 }
0x1753   :  { %v1750_v39 = vadd.f32 %v1928_v51, %v1876_v46  ;;  %v1744_v40 = vpop.f32.mrb[27].mxu0 }
0x1754   :  { %v1745_v28 = vadd.f32 %v1876_v46, %v1744_v40 }
0x1755   :  { %1760 = vst [vmem:[%s2599_s6 + $0x38] sm:$0xff] %v1750_v39 }
0x1756   :  { %1759 = vst [vmem:[%s2599_s6 + $0x30] sm:$0xff] %v1745_v28 }

</bundles_post_ra>
